<compile_context>
chip_gen: v5e
topology: v5e:2x2
jax: 0.10.0
libtpu: 0.0.40
codegen_flags: <defaults>
</compile_context>

<pallas_src>
import functools

import jax
import jax.numpy as jnp
from jax.experimental import pallas as pl
from jax.experimental.pallas import tpu as pltpu


# ----------------------------------------------------------------------------
# Fused Pallas matmul:  out = post_act(x @ W + shift)
#   x     : (G, M, K)   bf16   (G = 1 for downconvs, 4 deconv polyphases)
#   W     : (G, K, Np)  bf16   (Np = Cout zero-padded to a multiple of 128)
#   shift : (G, 1, Np)  f32    (conv bias + folded BatchNorm already baked in)
# ----------------------------------------------------------------------------
def _fused_kernel(x_ref, w_ref, t_ref, o_ref, *, post_act):
    y = jnp.dot(x_ref[...], w_ref[...], preferred_element_type=jnp.float32)
    y = y + t_ref[...]
    if post_act == "sigmoid":
        y = jax.nn.sigmoid(y)
    elif post_act == "relu":
        y = jnp.maximum(y, 0.0)
    o_ref[...] = y


def _choose_tm(m, g):
    # >=2 grid steps for the large calls (v7x: use both TensorCores); tiny M stays whole.
    if g >= 2 or m < 64:
        return m
    for tm in (256, 128, 64, 32):
        if m % tm == 0 and m // tm >= 2:
            return tm
    return m


def fused_matmul(x, w, shift, post_act="none"):
    g, m, k = x.shape
    npad = w.shape[-1]
    m_pad = ((m + 15) // 16) * 16            # bf16-friendly sublane count
    if m_pad != m:
        x = jnp.pad(x, ((0, 0), (0, m_pad - m), (0, 0)))
    tm = _choose_tm(m_pad, g)
    kern = functools.partial(_fused_kernel, post_act=post_act)
    out = pl.pallas_call(
        kern,
        out_shape=jax.ShapeDtypeStruct((g, m_pad, npad), jnp.float32),
        grid=(g, m_pad // tm),
        in_specs=[
            pl.BlockSpec((None, tm, k), lambda p, i: (p, i, 0)),
            pl.BlockSpec((None, k, npad), lambda p, i: (p, 0, 0)),
            pl.BlockSpec((None, 1, npad), lambda p, i: (p, 0, 0)),
        ],
        out_specs=pl.BlockSpec((None, tm, npad), lambda p, i: (p, i, 0)),
        compiler_params=pltpu.CompilerParams(
            dimension_semantics=("parallel", "parallel")),
        cost_estimate=pl.CostEstimate(
            flops=2 * g * m_pad * k * npad,
            transcendentals=(g * m_pad * npad) if post_act == "sigmoid" else 0,
            bytes_accessed=(g * m_pad * k * 2 + g * k * npad * 2
                            + g * npad * 4 + g * m_pad * npad * 4)),
    )(x.astype(jnp.bfloat16), w.astype(jnp.bfloat16), shift.astype(jnp.float32))
    return out[:, :m, :]


# ----------------------------------------------------------------------------
# Glue: im2col / polyphase lowering (NHWC throughout)
# ----------------------------------------------------------------------------
def _round_up_128(n):
    return ((n + 127) // 128) * 128


def _pad_cols(a, npad):
    n = a.shape[-1]
    if n == npad:
        return a
    return jnp.pad(a, [(0, 0)] * (a.ndim - 1) + [(0, npad - n)])


def conv_down(x, w4, t4, cout, pre_leaky):
    """[LeakyReLU?] + Conv2d(k=4, s=2, p=1) + folded BN.  NHWC in / NHWC out."""
    n, h, wd, c = x.shape
    if pre_leaky:
        x = jnp.where(x > 0, x, 0.2 * x)          # LeakyReLU(0.2) on the un-expanded map
    x = x.astype(jnp.bfloat16)
    xp = jnp.pad(x, ((0, 0), (1, 1), (1, 1), (0, 0)))
    ho, wo = h // 2, wd // 2
    cols = [xp[:, ky::2, kx::2, :][:, :ho, :wo, :] for ky in range(4) for kx in range(4)]
    patches = jnp.concatenate(cols, axis=-1).reshape(1, n * ho * wo, 16 * c)
    y = fused_matmul(patches, w4, t4)             # (1, M, npad)
    return y[0, :, :cout].reshape(n, ho, wo, cout)


def deconv_up(x, w4, t4, cout, post_act):
    """ReLU + ConvTranspose2d(k=4, s=2, p=1) + folded bias/BN (or Sigmoid).  NHWC.

    Lowered to 4 polyphase 2x2 stride-1 convs batched on the grid's phase axis.
    """
    n, h, wd, c = x.shape
    x = jnp.maximum(x, 0.0).astype(jnp.bfloat16)  # ReLU before the transposed conv
    xp = jnp.pad(x, ((0, 0), (1, 1), (1, 1), (0, 0)))
    phases = []
    for py in range(2):
        for px in range(2):
            cols = [xp[:, py + dy:py + dy + h, px + dx:px + dx + wd, :]
                    for dy in range(2) for dx in range(2)]
            phases.append(jnp.concatenate(cols, axis=-1).reshape(n * h * wd, 4 * c))
    x4 = jnp.stack(phases, axis=0)                # (4, M, 4*Cin)
    y = fused_matmul(x4, w4, t4, post_act=post_act)        # (4, M, npad)
    y = y[:, :, :cout].reshape(2, 2, n, h, wd, cout)       # (py, px, n, m, w, c)
    y = jnp.transpose(y, (2, 3, 0, 4, 1, 5)).reshape(n, 2 * h, 2 * wd, cout)
    return y


# ----------------------------------------------------------------------------
# Parameters (deterministic synthetic init) with bias/BN folded into the weights
# ----------------------------------------------------------------------------
def _bn_fold(key, c):
    k1, k2, k3, k4 = jax.random.split(key, 4)
    gamma = 1.0 + 0.1 * jax.random.normal(k1, (c,), jnp.float32)
    beta = 0.1 * jax.random.normal(k2, (c,), jnp.float32)
    mean = 0.1 * jax.random.normal(k3, (c,), jnp.float32)
    var = 1.0 + 0.1 * jnp.abs(jax.random.normal(k4, (c,), jnp.float32))
    scale = gamma / jnp.sqrt(var + 1e-5)
    shift = beta - mean * scale
    return scale, shift


def _prep_down(w, scale, shift):
    # Conv2d weight (Cout, Cin, 4, 4); bias=False (BatchNorm).  Fold BN into W / shift.
    cout, cin = w.shape[0], w.shape[1]
    npad = _round_up_128(cout)
    wmat = jnp.transpose(w, (2, 3, 1, 0)).reshape(16 * cin, cout) * scale[None, :]
    w4 = _pad_cols(wmat, npad)[None].astype(jnp.bfloat16)             # (1, 16*Cin, npad)
    t4 = _pad_cols(shift, npad).reshape(1, 1, npad).astype(jnp.float32)
    return w4, t4


def _prep_up(w, bias, scale, shift):
    # ConvTranspose2d weight (Cin, Cout, 4, 4).  One 2x2 matmul weight per polyphase
    # output (py, px); output pixel (2m+py, 2n+px) uses taps ky = 3-py-2*dy,
    # kx = 3-px-2*dx over the 2x2 input window (dy, dx in {0,1}).
    cin, cout = w.shape[0], w.shape[1]
    npad = _round_up_128(cout)
    mats = []
    for py in range(2):
        for px in range(2):
            sel = w[:, :, (3 - py, 1 - py), :][:, :, :, (3 - px, 1 - px)]   # (ci,co,dy,dx)
            mat = jnp.transpose(sel, (2, 3, 0, 1)).reshape(4 * cin, cout) * scale[None, :]
            mats.append(_pad_cols(mat, npad))
    w4 = jnp.stack(mats, axis=0).astype(jnp.bfloat16)                  # (4, 4*Cin, npad)
    t = bias * scale + shift
    t4 = jnp.tile(_pad_cols(t, npad).reshape(1, 1, npad), (4, 1, 1)).astype(jnp.float32)
    return w4, t4


def build_cfgs(input_nc, output_nc, ngf, num_downs):
    cfgs = [dict(inp=input_nc, inner=ngf, outer=output_nc, outermost=True, innermost=False),
            dict(inp=ngf, inner=ngf * 2, outer=ngf, outermost=False, innermost=False),
            dict(inp=ngf * 2, inner=ngf * 4, outer=ngf * 2, outermost=False, innermost=False),
            dict(inp=ngf * 4, inner=ngf * 8, outer=ngf * 4, outermost=False, innermost=False)]
    for _ in range(num_downs - 5):
        cfgs.append(dict(inp=ngf * 8, inner=ngf * 8, outer=ngf * 8, outermost=False, innermost=False))
    cfgs.append(dict(inp=ngf * 8, inner=ngf * 8, outer=ngf * 8, outermost=False, innermost=True))
    return cfgs


def init_params(key, cfgs, light_dim=9):
    levels = []
    for cfg in cfgs:
        key, kd, ku, kbd, kbu, kb = jax.random.split(key, 6)
        inp, inner, outer = cfg["inp"], cfg["inner"], cfg["outer"]
        up_in = inner if cfg["innermost"] else inner * 2
        down_w = jax.random.normal(kd, (inner, inp, 4, 4), jnp.float32) / jnp.sqrt(16.0 * inp)
        up_w = jax.random.normal(ku, (up_in, outer, 4, 4), jnp.float32) / jnp.sqrt(16.0 * up_in)
        if cfg["outermost"]:
            d_scale, d_shift = jnp.ones((inner,), jnp.float32), jnp.zeros((inner,), jnp.float32)
            u_scale, u_shift = jnp.ones((outer,), jnp.float32), jnp.zeros((outer,), jnp.float32)
            up_b = 0.01 * jax.random.normal(kb, (outer,), jnp.float32)  # outermost ConvT: bias=True
        else:
            d_scale, d_shift = _bn_fold(kbd, inner)       # eval-mode BatchNorm, folded
            u_scale, u_shift = _bn_fold(kbu, outer)
            up_b = jnp.zeros((outer,), jnp.float32)       # use_bias=False with BatchNorm
        dw, dt = _prep_down(down_w, d_scale, d_shift)
        uw, ut = _prep_up(up_w, up_b, u_scale, u_shift)
        levels.append(dict(down_w=dw, down_t=dt, up_w=uw, up_t=ut))

    # TODO(synk): UnetReplaceLight source is not provided in the reference; synthetic
    # DPR-style light module: GAP -> FC predicts the original light; the new light is
    # injected via FC + ReLU and broadcast over the bottleneck spatial dims.
    key, k1, k2, k3, k4 = jax.random.split(key, 5)
    c_bot = cfgs[-1]["inner"]
    light = dict(
        w_pred=jax.random.normal(k1, (c_bot, light_dim), jnp.float32) / jnp.sqrt(float(c_bot)),
        b_pred=0.01 * jax.random.normal(k2, (light_dim,), jnp.float32),
        w_inj=jax.random.normal(k3, (light_dim, c_bot), jnp.float32) / jnp.sqrt(float(light_dim)),
        b_inj=0.01 * jax.random.normal(k4, (c_bot,), jnp.float32),
    )
    return dict(levels=levels, light=light)


# ----------------------------------------------------------------------------
# Forward pass (architecture config is static / captured by closure)
# ----------------------------------------------------------------------------
def _replace_light(lp, x_bot, new_light):
    # Tiny matmuls (M = batch): plain XLA — a pallas_call here is pure launch overhead.
    n, h, w, c = x_bot.shape
    gap = jnp.mean(x_bot, axis=(1, 2))                                  # (N, C)
    ori_light = gap @ lp["w_pred"] + lp["b_pred"]                       # (N, light_dim)
    feat = jax.nn.relu(new_light @ lp["w_inj"] + lp["b_inj"])           # (N, C)
    return ori_light, jnp.broadcast_to(feat[:, None, None, :], (n, h, w, c))


def make_forward(cfgs):
    n_levels = len(cfgs)

    def forward(params, x_image, x_new_light):
        """x_image: (N, input_nc, H, W) NCHW; x_new_light: (N, light_dim)."""
        levels, lp = params["levels"], params["light"]
        x = jnp.transpose(x_image, (0, 2, 3, 1))          # NHWC inside the network

        feats = []
        for i, cfg in enumerate(cfgs):                    # encoder: outermost -> innermost
            feats.append(x)
            x = conv_down(x, levels[i]["down_w"], levels[i]["down_t"],
                          cout=cfg["inner"], pre_leaky=not cfg["outermost"])

        ori_light, y = _replace_light(lp, x, x_new_light)  # bottleneck light replacement

        for i in reversed(range(n_levels)):               # decoder: innermost -> outermost
            cfg = cfgs[i]
            y = deconv_up(y, levels[i]["up_w"], levels[i]["up_t"], cout=cfg["outer"],
                          post_act="sigmoid" if cfg["outermost"] else "none")
            if not cfg["outermost"]:
                y = jnp.concatenate([feats[i], y], axis=-1)   # skip concat, channel-last

        return ori_light, jnp.transpose(y, (0, 3, 1, 2))  # back to NCHW at the boundary

    return jax.jit(forward)


# ----------------------------------------------------------------------------
if __name__ == "__main__":
    key = jax.random.PRNGKey(0)
    k_params, k_img, k_light = jax.random.split(key, 3)

    input_nc, output_nc, ngf, num_downs, light_dim = 3, 3, 8, 5, 9
    cfgs = build_cfgs(input_nc, output_nc, ngf, num_downs)
    params = init_params(k_params, cfgs, light_dim)

    batch, spatial = 2, 32  # spatial must be divisible by 2**num_downs
    x_image = jax.random.normal(k_img, (batch, input_nc, spatial, spatial), jnp.float32)
    x_new_light = jax.random.normal(k_light, (batch, light_dim), jnp.float32)

    fwd = make_forward(cfgs)
    y_ori_light, y_out = fwd(params, x_image, x_new_light)
    jax.block_until_ready((y_ori_light, y_out))

    assert y_ori_light.shape == (batch, light_dim)
    assert y_out.shape == (batch, output_nc, spatial, spatial)
    assert bool(jnp.all(jnp.isfinite(y_out))) and bool(jnp.all(jnp.isfinite(y_ori_light)))
    print("KERNEL_OK")
</pallas_src>

<mosaic_0001>
module attributes {stable_mosaic.version = 11 : i64} {
  func.func @_fused_kernel(%arg0: i32, %arg1: i32, %arg2: memref<1x256x48xbf16, #tpu.memory_space<vmem>>, %arg3: memref<1x48x128xbf16, #tpu.memory_space<vmem>>, %arg4: memref<1x1x128xf32, #tpu.memory_space<vmem>>, %arg5: memref<1x256x128xf32, #tpu.memory_space<vmem>>) attributes {dimension_semantics = [#tpu.dimension_semantics<parallel>, #tpu.dimension_semantics<parallel>], iteration_bounds = array<i64: 1, 2>, scalar_prefetch = 0 : i64, scratch_operands = 0 : i64, tpu.core_type = #tpu.core_type<tc>, window_params = [{transform_indices = @transform_0, window_bounds = array<i64: 1, 256, 48>}, {transform_indices = @transform_1, window_bounds = array<i64: 1, 48, 128>}, {transform_indices = @transform_2, window_bounds = array<i64: 1, 1, 128>}, {transform_indices = @transform_3, window_bounds = array<i64: 1, 256, 128>}]} {
    %c0 = arith.constant 0 : index
    %c0_0 = arith.constant 0 : index
    %c0_1 = arith.constant 0 : index
    %0 = vector.load %arg2[%c0, %c0_0, %c0_1] : memref<1x256x48xbf16, #tpu.memory_space<vmem>>, vector<1x256x48xbf16>
    %1 = vector.shape_cast %0 : vector<1x256x48xbf16> to vector<256x48xbf16>
    %c0_2 = arith.constant 0 : index
    %c0_3 = arith.constant 0 : index
    %c0_4 = arith.constant 0 : index
    %2 = vector.load %arg3[%c0_2, %c0_3, %c0_4] : memref<1x48x128xbf16, #tpu.memory_space<vmem>>, vector<1x48x128xbf16>
    %3 = vector.shape_cast %2 : vector<1x48x128xbf16> to vector<48x128xbf16>
    %cst = arith.constant dense<0.000000e+00> : vector<256x128xf32>
    %4 = tpu.matmul %1, %3, %cst {dimension_numbers = #tpu.dot_dimension_numbers<[1], [0], [0], [1], [0, 0, 1, 1], [], []>} : vector<256x48xbf16>, vector<48x128xbf16>, vector<256x128xf32> -> vector<256x128xf32>
    %c0_5 = arith.constant 0 : index
    %c0_6 = arith.constant 0 : index
    %c0_7 = arith.constant 0 : index
    %5 = vector.load %arg4[%c0_5, %c0_6, %c0_7] : memref<1x1x128xf32, #tpu.memory_space<vmem>>, vector<1x1x128xf32>
    %6 = vector.shape_cast %5 : vector<1x1x128xf32> to vector<1x128xf32>
    %7 = vector.broadcast %6 : vector<1x128xf32> to vector<256x128xf32>
    %8 = arith.addf %4, %7 : vector<256x128xf32>
    %c0_8 = arith.constant 0 : index
    %c0_9 = arith.constant 0 : index
    %c0_10 = arith.constant 0 : index
    %9 = vector.load %arg5[%c0_8, %c0_9, %c0_10] : memref<1x256x128xf32, #tpu.memory_space<vmem>>, vector<1x256x128xf32>
    %10 = vector.shape_cast %9 : vector<1x256x128xf32> to vector<256x128xf32>
    %11 = vector.shape_cast %8 : vector<256x128xf32> to vector<1x256x128xf32>
    tpu.vector_store %arg5[%c0_8, %c0_9, %c0_10], %11 {strides = array<i32>} : memref<1x256x128xf32, #tpu.memory_space<vmem>>, vector<1x256x128xf32>,
    return
  }
  func.func @transform_0(%arg0: i32, %arg1: i32) -> (i32, i32, i32) {
    %c0_i32 = arith.constant 0 : i32
    %c0_i32_0 = arith.constant 0 : i32
    return %arg0, %arg1, %c0_i32 : i32, i32, i32
  }
  func.func @transform_1(%arg0: i32, %arg1: i32) -> (i32, i32, i32) {
    %c0_i32 = arith.constant 0 : i32
    %c0_i32_0 = arith.constant 0 : i32
    %c0_i32_1 = arith.constant 0 : i32
    return %arg0, %c0_i32, %c0_i32_0 : i32, i32, i32
  }
  func.func @transform_2(%arg0: i32, %arg1: i32) -> (i32, i32, i32) {
    %c0_i32 = arith.constant 0 : i32
    %c0_i32_0 = arith.constant 0 : i32
    %c0_i32_1 = arith.constant 0 : i32
    return %arg0, %c0_i32, %c0_i32_0 : i32, i32, i32
  }
  func.func @transform_3(%arg0: i32, %arg1: i32) -> (i32, i32, i32) {
    %c0_i32 = arith.constant 0 : i32
    %c0_i32_0 = arith.constant 0 : i32
    return %arg0, %arg1, %c0_i32 : i32, i32, i32
  }
}

module attributes {stable_mosaic.version = 11 : i64} {
  func.func @_fused_kernel(%arg0: i32, %arg1: i32, %arg2: memref<1x64x128xbf16, #tpu.memory_space<vmem>>, %arg3: memref<1x128x128xbf16, #tpu.memory_space<vmem>>, %arg4: memref<1x1x128xf32, #tpu.memory_space<vmem>>, %arg5: memref<1x64x128xf32, #tpu.memory_space<vmem>>) attributes {dimension_semantics = [#tpu.dimension_semantics<parallel>, #tpu.dimension_semantics<parallel>], iteration_bounds = array<i64: 1, 2>, scalar_prefetch = 0 : i64, scratch_operands = 0 : i64, tpu.core_type = #tpu.core_type<tc>, window_params = [{transform_indices = @transform_0, window_bounds = array<i64: 1, 64, 128>}, {transform_indices = @transform_1, window_bounds = array<i64: 1, 128, 128>}, {transform_indices = @transform_2, window_bounds = array<i64: 1, 1, 128>}, {transform_indices = @transform_3, window_bounds = array<i64: 1, 64, 128>}]} {
    %c0 = arith.constant 0 : index
    %c0_0 = arith.constant 0 : index
    %c0_1 = arith.constant 0 : index
    %0 = vector.load %arg2[%c0, %c0_0, %c0_1] : memref<1x64x128xbf16, #tpu.memory_space<vmem>>, vector<1x64x128xbf16>
    %1 = vector.shape_cast %0 : vector<1x64x128xbf16> to vector<64x128xbf16>
    %c0_2 = arith.constant 0 : index
    %c0_3 = arith.constant 0 : index
    %c0_4 = arith.constant 0 : index
    %2 = vector.load %arg3[%c0_2, %c0_3, %c0_4] : memref<1x128x128xbf16, #tpu.memory_space<vmem>>, vector<1x128x128xbf16>
    %3 = vector.shape_cast %2 : vector<1x128x128xbf16> to vector<128x128xbf16>
    %cst = arith.constant dense<0.000000e+00> : vector<64x128xf32>
    %4 = tpu.matmul %1, %3, %cst {dimension_numbers = #tpu.dot_dimension_numbers<[1], [0], [0], [1], [0, 0, 1, 1], [], []>} : vector<64x128xbf16>, vector<128x128xbf16>, vector<64x128xf32> -> vector<64x128xf32>
    %c0_5 = arith.constant 0 : index
    %c0_6 = arith.constant 0 : index
    %c0_7 = arith.constant 0 : index
    %5 = vector.load %arg4[%c0_5, %c0_6, %c0_7] : memref<1x1x128xf32, #tpu.memory_space<vmem>>, vector<1x1x128xf32>
    %6 = vector.shape_cast %5 : vector<1x1x128xf32> to vector<1x128xf32>
    %7 = vector.broadcast %6 : vector<1x128xf32> to vector<64x128xf32>
    %8 = arith.addf %4, %7 : vector<64x128xf32>
    %c0_8 = arith.constant 0 : index
    %c0_9 = arith.constant 0 : index
    %c0_10 = arith.constant 0 : index
    %9 = vector.load %arg5[%c0_8, %c0_9, %c0_10] : memref<1x64x128xf32, #tpu.memory_space<vmem>>, vector<1x64x128xf32>
    %10 = vector.shape_cast %9 : vector<1x64x128xf32> to vector<64x128xf32>
    %11 = vector.shape_cast %8 : vector<64x128xf32> to vector<1x64x128xf32>
    tpu.vector_store %arg5[%c0_8, %c0_9, %c0_10], %11 {strides = array<i32>} : memref<1x64x128xf32, #tpu.memory_space<vmem>>, vector<1x64x128xf32>,
    return
  }
  func.func @transform_0(%arg0: i32, %arg1: i32) -> (i32, i32, i32) {
    %c0_i32 = arith.constant 0 : i32
    %c0_i32_0 = arith.constant 0 : i32
    return %arg0, %arg1, %c0_i32 : i32, i32, i32
  }
  func.func @transform_1(%arg0: i32, %arg1: i32) -> (i32, i32, i32) {
    %c0_i32 = arith.constant 0 : i32
    %c0_i32_0 = arith.constant 0 : i32
    %c0_i32_1 = arith.constant 0 : i32
    return %arg0, %c0_i32, %c0_i32_0 : i32, i32, i32
  }
  func.func @transform_2(%arg0: i32, %arg1: i32) -> (i32, i32, i32) {
    %c0_i32 = arith.constant 0 : i32
    %c0_i32_0 = arith.constant 0 : i32
    %c0_i32_1 = arith.constant 0 : i32
    return %arg0, %c0_i32, %c0_i32_0 : i32, i32, i32
  }
  func.func @transform_3(%arg0: i32, %arg1: i32) -> (i32, i32, i32) {
    %c0_i32 = arith.constant 0 : i32
    %c0_i32_0 = arith.constant 0 : i32
    return %arg0, %arg1, %c0_i32 : i32, i32, i32
  }
}

module attributes {stable_mosaic.version = 11 : i64} {
  func.func @_fused_kernel(%arg0: i32, %arg1: i32, %arg2: memref<1x32x256xbf16, #tpu.memory_space<vmem>>, %arg3: memref<1x256x128xbf16, #tpu.memory_space<vmem>>, %arg4: memref<1x1x128xf32, #tpu.memory_space<vmem>>, %arg5: memref<1x32x128xf32, #tpu.memory_space<vmem>>) attributes {dimension_semantics = [#tpu.dimension_semantics<parallel>, #tpu.dimension_semantics<parallel>], iteration_bounds = array<i64: 1, 1>, scalar_prefetch = 0 : i64, scratch_operands = 0 : i64, tpu.core_type = #tpu.core_type<tc>, window_params = [{transform_indices = @transform_0, window_bounds = array<i64: 1, 32, 256>}, {transform_indices = @transform_1, window_bounds = array<i64: 1, 256, 128>}, {transform_indices = @transform_2, window_bounds = array<i64: 1, 1, 128>}, {transform_indices = @transform_3, window_bounds = array<i64: 1, 32, 128>}]} {
    %c0 = arith.constant 0 : index
    %c0_0 = arith.constant 0 : index
    %c0_1 = arith.constant 0 : index
    %0 = vector.load %arg2[%c0, %c0_0, %c0_1] : memref<1x32x256xbf16, #tpu.memory_space<vmem>>, vector<1x32x256xbf16>
    %1 = vector.shape_cast %0 : vector<1x32x256xbf16> to vector<32x256xbf16>
    %c0_2 = arith.constant 0 : index
    %c0_3 = arith.constant 0 : index
    %c0_4 = arith.constant 0 : index
    %2 = vector.load %arg3[%c0_2, %c0_3, %c0_4] : memref<1x256x128xbf16, #tpu.memory_space<vmem>>, vector<1x256x128xbf16>
    %3 = vector.shape_cast %2 : vector<1x256x128xbf16> to vector<256x128xbf16>
    %cst = arith.constant dense<0.000000e+00> : vector<32x128xf32>
    %4 = tpu.matmul %1, %3, %cst {dimension_numbers = #tpu.dot_dimension_numbers<[1], [0], [0], [1], [0, 0, 1, 1], [], []>} : vector<32x256xbf16>, vector<256x128xbf16>, vector<32x128xf32> -> vector<32x128xf32>
    %c0_5 = arith.constant 0 : index
    %c0_6 = arith.constant 0 : index
    %c0_7 = arith.constant 0 : index
    %5 = vector.load %arg4[%c0_5, %c0_6, %c0_7] : memref<1x1x128xf32, #tpu.memory_space<vmem>>, vector<1x1x128xf32>
    %6 = vector.shape_cast %5 : vector<1x1x128xf32> to vector<1x128xf32>
    %7 = vector.broadcast %6 : vector<1x128xf32> to vector<32x128xf32>
    %8 = arith.addf %4, %7 : vector<32x128xf32>
    %c0_8 = arith.constant 0 : index
    %c0_9 = arith.constant 0 : index
    %c0_10 = arith.constant 0 : index
    %9 = vector.load %arg5[%c0_8, %c0_9, %c0_10] : memref<1x32x128xf32, #tpu.memory_space<vmem>>, vector<1x32x128xf32>
    %10 = vector.shape_cast %9 : vector<1x32x128xf32> to vector<32x128xf32>
    %11 = vector.shape_cast %8 : vector<32x128xf32> to vector<1x32x128xf32>
    tpu.vector_store %arg5[%c0_8, %c0_9, %c0_10], %11 {strides = array<i32>} : memref<1x32x128xf32, #tpu.memory_space<vmem>>, vector<1x32x128xf32>,
    return
  }
  func.func @transform_0(%arg0: i32, %arg1: i32) -> (i32, i32, i32) {
    %c0_i32 = arith.constant 0 : i32
    %c0_i32_0 = arith.constant 0 : i32
    return %arg0, %arg1, %c0_i32 : i32, i32, i32
  }
  func.func @transform_1(%arg0: i32, %arg1: i32) -> (i32, i32, i32) {
    %c0_i32 = arith.constant 0 : i32
    %c0_i32_0 = arith.constant 0 : i32
    %c0_i32_1 = arith.constant 0 : i32
    return %arg0, %c0_i32, %c0_i32_0 : i32, i32, i32
  }
  func.func @transform_2(%arg0: i32, %arg1: i32) -> (i32, i32, i32) {
    %c0_i32 = arith.constant 0 : i32
    %c0_i32_0 = arith.constant 0 : i32
    %c0_i32_1 = arith.constant 0 : i32
    return %arg0, %c0_i32, %c0_i32_0 : i32, i32, i32
  }
  func.func @transform_3(%arg0: i32, %arg1: i32) -> (i32, i32, i32) {
    %c0_i32 = arith.constant 0 : i32
    %c0_i32_0 = arith.constant 0 : i32
    return %arg0, %arg1, %c0_i32 : i32, i32, i32
  }
}

module attributes {stable_mosaic.version = 11 : i64} {
  func.func @_fused_kernel(%arg0: i32, %arg1: i32, %arg2: memref<1x16x512xbf16, #tpu.memory_space<vmem>>, %arg3: memref<1x512x128xbf16, #tpu.memory_space<vmem>>, %arg4: memref<1x1x128xf32, #tpu.memory_space<vmem>>, %arg5: memref<1x16x128xf32, #tpu.memory_space<vmem>>) attributes {dimension_semantics = [#tpu.dimension_semantics<parallel>, #tpu.dimension_semantics<parallel>], iteration_bounds = array<i64: 1, 1>, scalar_prefetch = 0 : i64, scratch_operands = 0 : i64, tpu.core_type = #tpu.core_type<tc>, window_params = [{transform_indices = @transform_0, window_bounds = array<i64: 1, 16, 512>}, {transform_indices = @transform_1, window_bounds = array<i64: 1, 512, 128>}, {transform_indices = @transform_2, window_bounds = array<i64: 1, 1, 128>}, {transform_indices = @transform_3, window_bounds = array<i64: 1, 16, 128>}]} {
    %c0 = arith.constant 0 : index
    %c0_0 = arith.constant 0 : index
    %c0_1 = arith.constant 0 : index
    %0 = vector.load %arg2[%c0, %c0_0, %c0_1] : memref<1x16x512xbf16, #tpu.memory_space<vmem>>, vector<1x16x512xbf16>
    %1 = vector.shape_cast %0 : vector<1x16x512xbf16> to vector<16x512xbf16>
    %c0_2 = arith.constant 0 : index
    %c0_3 = arith.constant 0 : index
    %c0_4 = arith.constant 0 : index
    %2 = vector.load %arg3[%c0_2, %c0_3, %c0_4] : memref<1x512x128xbf16, #tpu.memory_space<vmem>>, vector<1x512x128xbf16>
    %3 = vector.shape_cast %2 : vector<1x512x128xbf16> to vector<512x128xbf16>
    %cst = arith.constant dense<0.000000e+00> : vector<16x128xf32>
    %4 = tpu.matmul %1, %3, %cst {dimension_numbers = #tpu.dot_dimension_numbers<[1], [0], [0], [1], [0, 0, 1, 1], [], []>} : vector<16x512xbf16>, vector<512x128xbf16>, vector<16x128xf32> -> vector<16x128xf32>
    %c0_5 = arith.constant 0 : index
    %c0_6 = arith.constant 0 : index
    %c0_7 = arith.constant 0 : index
    %5 = vector.load %arg4[%c0_5, %c0_6, %c0_7] : memref<1x1x128xf32, #tpu.memory_space<vmem>>, vector<1x1x128xf32>
    %6 = vector.shape_cast %5 : vector<1x1x128xf32> to vector<1x128xf32>
    %7 = vector.broadcast %6 : vector<1x128xf32> to vector<16x128xf32>
    %8 = arith.addf %4, %7 : vector<16x128xf32>
    %c0_8 = arith.constant 0 : index
    %c0_9 = arith.constant 0 : index
    %c0_10 = arith.constant 0 : index
    %9 = vector.load %arg5[%c0_8, %c0_9, %c0_10] : memref<1x16x128xf32, #tpu.memory_space<vmem>>, vector<1x16x128xf32>
    %10 = vector.shape_cast %9 : vector<1x16x128xf32> to vector<16x128xf32>
    %11 = vector.shape_cast %8 : vector<16x128xf32> to vector<1x16x128xf32>
    tpu.vector_store %arg5[%c0_8, %c0_9, %c0_10], %11 {strides = array<i32>} : memref<1x16x128xf32, #tpu.memory_space<vmem>>, vector<1x16x128xf32>,
    return
  }
  func.func @transform_0(%arg0: i32, %arg1: i32) -> (i32, i32, i32) {
    %c0_i32 = arith.constant 0 : i32
    %c0_i32_0 = arith.constant 0 : i32
    return %arg0, %arg1, %c0_i32 : i32, i32, i32
  }
  func.func @transform_1(%arg0: i32, %arg1: i32) -> (i32, i32, i32) {
    %c0_i32 = arith.constant 0 : i32
    %c0_i32_0 = arith.constant 0 : i32
    %c0_i32_1 = arith.constant 0 : i32
    return %arg0, %c0_i32, %c0_i32_0 : i32, i32, i32
  }
  func.func @transform_2(%arg0: i32, %arg1: i32) -> (i32, i32, i32) {
    %c0_i32 = arith.constant 0 : i32
    %c0_i32_0 = arith.constant 0 : i32
    %c0_i32_1 = arith.constant 0 : i32
    return %arg0, %c0_i32, %c0_i32_0 : i32, i32, i32
  }
  func.func @transform_3(%arg0: i32, %arg1: i32) -> (i32, i32, i32) {
    %c0_i32 = arith.constant 0 : i32
    %c0_i32_0 = arith.constant 0 : i32
    return %arg0, %arg1, %c0_i32 : i32, i32, i32
  }
}

module attributes {stable_mosaic.version = 11 : i64} {
  func.func @_fused_kernel(%arg0: i32, %arg1: i32, %arg2: memref<1x16x256xbf16, #tpu.memory_space<vmem>>, %arg3: memref<1x256x128xbf16, #tpu.memory_space<vmem>>, %arg4: memref<1x1x128xf32, #tpu.memory_space<vmem>>, %arg5: memref<1x16x128xf32, #tpu.memory_space<vmem>>) attributes {dimension_semantics = [#tpu.dimension_semantics<parallel>, #tpu.dimension_semantics<parallel>], iteration_bounds = array<i64: 4, 1>, scalar_prefetch = 0 : i64, scratch_operands = 0 : i64, tpu.core_type = #tpu.core_type<tc>, window_params = [{transform_indices = @transform_0, window_bounds = array<i64: 1, 16, 256>}, {transform_indices = @transform_1, window_bounds = array<i64: 1, 256, 128>}, {transform_indices = @transform_2, window_bounds = array<i64: 1, 1, 128>}, {transform_indices = @transform_3, window_bounds = array<i64: 1, 16, 128>}]} {
    %c0 = arith.constant 0 : index
    %c0_0 = arith.constant 0 : index
    %c0_1 = arith.constant 0 : index
    %0 = vector.load %arg2[%c0, %c0_0, %c0_1] : memref<1x16x256xbf16, #tpu.memory_space<vmem>>, vector<1x16x256xbf16>
    %1 = vector.shape_cast %0 : vector<1x16x256xbf16> to vector<16x256xbf16>
    %c0_2 = arith.constant 0 : index
    %c0_3 = arith.constant 0 : index
    %c0_4 = arith.constant 0 : index
    %2 = vector.load %arg3[%c0_2, %c0_3, %c0_4] : memref<1x256x128xbf16, #tpu.memory_space<vmem>>, vector<1x256x128xbf16>
    %3 = vector.shape_cast %2 : vector<1x256x128xbf16> to vector<256x128xbf16>
    %cst = arith.constant dense<0.000000e+00> : vector<16x128xf32>
    %4 = tpu.matmul %1, %3, %cst {dimension_numbers = #tpu.dot_dimension_numbers<[1], [0], [0], [1], [0, 0, 1, 1], [], []>} : vector<16x256xbf16>, vector<256x128xbf16>, vector<16x128xf32> -> vector<16x128xf32>
    %c0_5 = arith.constant 0 : index
    %c0_6 = arith.constant 0 : index
    %c0_7 = arith.constant 0 : index
    %5 = vector.load %arg4[%c0_5, %c0_6, %c0_7] : memref<1x1x128xf32, #tpu.memory_space<vmem>>, vector<1x1x128xf32>
    %6 = vector.shape_cast %5 : vector<1x1x128xf32> to vector<1x128xf32>
    %7 = vector.broadcast %6 : vector<1x128xf32> to vector<16x128xf32>
    %8 = arith.addf %4, %7 : vector<16x128xf32>
    %c0_8 = arith.constant 0 : index
    %c0_9 = arith.constant 0 : index
    %c0_10 = arith.constant 0 : index
    %9 = vector.load %arg5[%c0_8, %c0_9, %c0_10] : memref<1x16x128xf32, #tpu.memory_space<vmem>>, vector<1x16x128xf32>
    %10 = vector.shape_cast %9 : vector<1x16x128xf32> to vector<16x128xf32>
    %11 = vector.shape_cast %8 : vector<16x128xf32> to vector<1x16x128xf32>
    tpu.vector_store %arg5[%c0_8, %c0_9, %c0_10], %11 {strides = array<i32>} : memref<1x16x128xf32, #tpu.memory_space<vmem>>, vector<1x16x128xf32>,
    return
  }
  func.func @transform_0(%arg0: i32, %arg1: i32) -> (i32, i32, i32) {
    %c0_i32 = arith.constant 0 : i32
    %c0_i32_0 = arith.constant 0 : i32
    return %arg0, %arg1, %c0_i32 : i32, i32, i32
  }
  func.func @transform_1(%arg0: i32, %arg1: i32) -> (i32, i32, i32) {
    %c0_i32 = arith.constant 0 : i32
    %c0_i32_0 = arith.constant 0 : i32
    %c0_i32_1 = arith.constant 0 : i32
    return %arg0, %c0_i32, %c0_i32_0 : i32, i32, i32
  }
  func.func @transform_2(%arg0: i32, %arg1: i32) -> (i32, i32, i32) {
    %c0_i32 = arith.constant 0 : i32
    %c0_i32_0 = arith.constant 0 : i32
    %c0_i32_1 = arith.constant 0 : i32
    return %arg0, %c0_i32, %c0_i32_0 : i32, i32, i32
  }
  func.func @transform_3(%arg0: i32, %arg1: i32) -> (i32, i32, i32) {
    %c0_i32 = arith.constant 0 : i32
    %c0_i32_0 = arith.constant 0 : i32
    return %arg0, %arg1, %c0_i32 : i32, i32, i32
  }
}

module attributes {stable_mosaic.version = 11 : i64} {
  func.func @_fused_kernel(%arg0: i32, %arg1: i32, %arg2: memref<1x16x512xbf16, #tpu.memory_space<vmem>>, %arg3: memref<1x512x128xbf16, #tpu.memory_space<vmem>>, %arg4: memref<1x1x128xf32, #tpu.memory_space<vmem>>, %arg5: memref<1x16x128xf32, #tpu.memory_space<vmem>>) attributes {dimension_semantics = [#tpu.dimension_semantics<parallel>, #tpu.dimension_semantics<parallel>], iteration_bounds = array<i64: 4, 1>, scalar_prefetch = 0 : i64, scratch_operands = 0 : i64, tpu.core_type = #tpu.core_type<tc>, window_params = [{transform_indices = @transform_0, window_bounds = array<i64: 1, 16, 512>}, {transform_indices = @transform_1, window_bounds = array<i64: 1, 512, 128>}, {transform_indices = @transform_2, window_bounds = array<i64: 1, 1, 128>}, {transform_indices = @transform_3, window_bounds = array<i64: 1, 16, 128>}]} {
    %c0 = arith.constant 0 : index
    %c0_0 = arith.constant 0 : index
    %c0_1 = arith.constant 0 : index
    %0 = vector.load %arg2[%c0, %c0_0, %c0_1] : memref<1x16x512xbf16, #tpu.memory_space<vmem>>, vector<1x16x512xbf16>
    %1 = vector.shape_cast %0 : vector<1x16x512xbf16> to vector<16x512xbf16>
    %c0_2 = arith.constant 0 : index
    %c0_3 = arith.constant 0 : index
    %c0_4 = arith.constant 0 : index
    %2 = vector.load %arg3[%c0_2, %c0_3, %c0_4] : memref<1x512x128xbf16, #tpu.memory_space<vmem>>, vector<1x512x128xbf16>
    %3 = vector.shape_cast %2 : vector<1x512x128xbf16> to vector<512x128xbf16>
    %cst = arith.constant dense<0.000000e+00> : vector<16x128xf32>
    %4 = tpu.matmul %1, %3, %cst {dimension_numbers = #tpu.dot_dimension_numbers<[1], [0], [0], [1], [0, 0, 1, 1], [], []>} : vector<16x512xbf16>, vector<512x128xbf16>, vector<16x128xf32> -> vector<16x128xf32>
    %c0_5 = arith.constant 0 : index
    %c0_6 = arith.constant 0 : index
    %c0_7 = arith.constant 0 : index
    %5 = vector.load %arg4[%c0_5, %c0_6, %c0_7] : memref<1x1x128xf32, #tpu.memory_space<vmem>>, vector<1x1x128xf32>
    %6 = vector.shape_cast %5 : vector<1x1x128xf32> to vector<1x128xf32>
    %7 = vector.broadcast %6 : vector<1x128xf32> to vector<16x128xf32>
    %8 = arith.addf %4, %7 : vector<16x128xf32>
    %c0_8 = arith.constant 0 : index
    %c0_9 = arith.constant 0 : index
    %c0_10 = arith.constant 0 : index
    %9 = vector.load %arg5[%c0_8, %c0_9, %c0_10] : memref<1x16x128xf32, #tpu.memory_space<vmem>>, vector<1x16x128xf32>
    %10 = vector.shape_cast %9 : vector<1x16x128xf32> to vector<16x128xf32>
    %11 = vector.shape_cast %8 : vector<16x128xf32> to vector<1x16x128xf32>
    tpu.vector_store %arg5[%c0_8, %c0_9, %c0_10], %11 {strides = array<i32>} : memref<1x16x128xf32, #tpu.memory_space<vmem>>, vector<1x16x128xf32>,
    return
  }
  func.func @transform_0(%arg0: i32, %arg1: i32) -> (i32, i32, i32) {
    %c0_i32 = arith.constant 0 : i32
    %c0_i32_0 = arith.constant 0 : i32
    return %arg0, %arg1, %c0_i32 : i32, i32, i32
  }
  func.func @transform_1(%arg0: i32, %arg1: i32) -> (i32, i32, i32) {
    %c0_i32 = arith.constant 0 : i32
    %c0_i32_0 = arith.constant 0 : i32
    %c0_i32_1 = arith.constant 0 : i32
    return %arg0, %c0_i32, %c0_i32_0 : i32, i32, i32
  }
  func.func @transform_2(%arg0: i32, %arg1: i32) -> (i32, i32, i32) {
    %c0_i32 = arith.constant 0 : i32
    %c0_i32_0 = arith.constant 0 : i32
    %c0_i32_1 = arith.constant 0 : i32
    return %arg0, %c0_i32, %c0_i32_0 : i32, i32, i32
  }
  func.func @transform_3(%arg0: i32, %arg1: i32) -> (i32, i32, i32) {
    %c0_i32 = arith.constant 0 : i32
    %c0_i32_0 = arith.constant 0 : i32
    return %arg0, %arg1, %c0_i32 : i32, i32, i32
  }
}

module attributes {stable_mosaic.version = 11 : i64} {
  func.func @_fused_kernel(%arg0: i32, %arg1: i32, %arg2: memref<1x32x256xbf16, #tpu.memory_space<vmem>>, %arg3: memref<1x256x128xbf16, #tpu.memory_space<vmem>>, %arg4: memref<1x1x128xf32, #tpu.memory_space<vmem>>, %arg5: memref<1x32x128xf32, #tpu.memory_space<vmem>>) attributes {dimension_semantics = [#tpu.dimension_semantics<parallel>, #tpu.dimension_semantics<parallel>], iteration_bounds = array<i64: 4, 1>, scalar_prefetch = 0 : i64, scratch_operands = 0 : i64, tpu.core_type = #tpu.core_type<tc>, window_params = [{transform_indices = @transform_0, window_bounds = array<i64: 1, 32, 256>}, {transform_indices = @transform_1, window_bounds = array<i64: 1, 256, 128>}, {transform_indices = @transform_2, window_bounds = array<i64: 1, 1, 128>}, {transform_indices = @transform_3, window_bounds = array<i64: 1, 32, 128>}]} {
    %c0 = arith.constant 0 : index
    %c0_0 = arith.constant 0 : index
    %c0_1 = arith.constant 0 : index
    %0 = vector.load %arg2[%c0, %c0_0, %c0_1] : memref<1x32x256xbf16, #tpu.memory_space<vmem>>, vector<1x32x256xbf16>
    %1 = vector.shape_cast %0 : vector<1x32x256xbf16> to vector<32x256xbf16>
    %c0_2 = arith.constant 0 : index
    %c0_3 = arith.constant 0 : index
    %c0_4 = arith.constant 0 : index
    %2 = vector.load %arg3[%c0_2, %c0_3, %c0_4] : memref<1x256x128xbf16, #tpu.memory_space<vmem>>, vector<1x256x128xbf16>
    %3 = vector.shape_cast %2 : vector<1x256x128xbf16> to vector<256x128xbf16>
    %cst = arith.constant dense<0.000000e+00> : vector<32x128xf32>
    %4 = tpu.matmul %1, %3, %cst {dimension_numbers = #tpu.dot_dimension_numbers<[1], [0], [0], [1], [0, 0, 1, 1], [], []>} : vector<32x256xbf16>, vector<256x128xbf16>, vector<32x128xf32> -> vector<32x128xf32>
    %c0_5 = arith.constant 0 : index
    %c0_6 = arith.constant 0 : index
    %c0_7 = arith.constant 0 : index
    %5 = vector.load %arg4[%c0_5, %c0_6, %c0_7] : memref<1x1x128xf32, #tpu.memory_space<vmem>>, vector<1x1x128xf32>
    %6 = vector.shape_cast %5 : vector<1x1x128xf32> to vector<1x128xf32>
    %7 = vector.broadcast %6 : vector<1x128xf32> to vector<32x128xf32>
    %8 = arith.addf %4, %7 : vector<32x128xf32>
    %c0_8 = arith.constant 0 : index
    %c0_9 = arith.constant 0 : index
    %c0_10 = arith.constant 0 : index
    %9 = vector.load %arg5[%c0_8, %c0_9, %c0_10] : memref<1x32x128xf32, #tpu.memory_space<vmem>>, vector<1x32x128xf32>
    %10 = vector.shape_cast %9 : vector<1x32x128xf32> to vector<32x128xf32>
    %11 = vector.shape_cast %8 : vector<32x128xf32> to vector<1x32x128xf32>
    tpu.vector_store %arg5[%c0_8, %c0_9, %c0_10], %11 {strides = array<i32>} : memref<1x32x128xf32, #tpu.memory_space<vmem>>, vector<1x32x128xf32>,
    return
  }
  func.func @transform_0(%arg0: i32, %arg1: i32) -> (i32, i32, i32) {
    %c0_i32 = arith.constant 0 : i32
    %c0_i32_0 = arith.constant 0 : i32
    return %arg0, %arg1, %c0_i32 : i32, i32, i32
  }
  func.func @transform_1(%arg0: i32, %arg1: i32) -> (i32, i32, i32) {
    %c0_i32 = arith.constant 0 : i32
    %c0_i32_0 = arith.constant 0 : i32
    %c0_i32_1 = arith.constant 0 : i32
    return %arg0, %c0_i32, %c0_i32_0 : i32, i32, i32
  }
  func.func @transform_2(%arg0: i32, %arg1: i32) -> (i32, i32, i32) {
    %c0_i32 = arith.constant 0 : i32
    %c0_i32_0 = arith.constant 0 : i32
    %c0_i32_1 = arith.constant 0 : i32
    return %arg0, %c0_i32, %c0_i32_0 : i32, i32, i32
  }
  func.func @transform_3(%arg0: i32, %arg1: i32) -> (i32, i32, i32) {
    %c0_i32 = arith.constant 0 : i32
    %c0_i32_0 = arith.constant 0 : i32
    return %arg0, %arg1, %c0_i32 : i32, i32, i32
  }
}

module attributes {stable_mosaic.version = 11 : i64} {
  func.func @_fused_kernel(%arg0: i32, %arg1: i32, %arg2: memref<1x128x128xbf16, #tpu.memory_space<vmem>>, %arg3: memref<1x128x128xbf16, #tpu.memory_space<vmem>>, %arg4: memref<1x1x128xf32, #tpu.memory_space<vmem>>, %arg5: memref<1x128x128xf32, #tpu.memory_space<vmem>>) attributes {dimension_semantics = [#tpu.dimension_semantics<parallel>, #tpu.dimension_semantics<parallel>], iteration_bounds = array<i64: 4, 1>, scalar_prefetch = 0 : i64, scratch_operands = 0 : i64, tpu.core_type = #tpu.core_type<tc>, window_params = [{transform_indices = @transform_0, window_bounds = array<i64: 1, 128, 128>}, {transform_indices = @transform_1, window_bounds = array<i64: 1, 128, 128>}, {transform_indices = @transform_2, window_bounds = array<i64: 1, 1, 128>}, {transform_indices = @transform_3, window_bounds = array<i64: 1, 128, 128>}]} {
    %c0 = arith.constant 0 : index
    %c0_0 = arith.constant 0 : index
    %c0_1 = arith.constant 0 : index
    %0 = vector.load %arg2[%c0, %c0_0, %c0_1] : memref<1x128x128xbf16, #tpu.memory_space<vmem>>, vector<1x128x128xbf16>
    %1 = vector.shape_cast %0 : vector<1x128x128xbf16> to vector<128x128xbf16>
    %c0_2 = arith.constant 0 : index
    %c0_3 = arith.constant 0 : index
    %c0_4 = arith.constant 0 : index
    %2 = vector.load %arg3[%c0_2, %c0_3, %c0_4] : memref<1x128x128xbf16, #tpu.memory_space<vmem>>, vector<1x128x128xbf16>
    %3 = vector.shape_cast %2 : vector<1x128x128xbf16> to vector<128x128xbf16>
    %cst = arith.constant dense<0.000000e+00> : vector<128x128xf32>
    %4 = tpu.matmul %1, %3, %cst {dimension_numbers = #tpu.dot_dimension_numbers<[1], [0], [0], [1], [0, 0, 1, 1], [], []>} : vector<128x128xbf16>, vector<128x128xbf16>, vector<128x128xf32> -> vector<128x128xf32>
    %c0_5 = arith.constant 0 : index
    %c0_6 = arith.constant 0 : index
    %c0_7 = arith.constant 0 : index
    %5 = vector.load %arg4[%c0_5, %c0_6, %c0_7] : memref<1x1x128xf32, #tpu.memory_space<vmem>>, vector<1x1x128xf32>
    %6 = vector.shape_cast %5 : vector<1x1x128xf32> to vector<1x128xf32>
    %7 = vector.broadcast %6 : vector<1x128xf32> to vector<128x128xf32>
    %8 = arith.addf %4, %7 : vector<128x128xf32>
    %c0_8 = arith.constant 0 : index
    %c0_9 = arith.constant 0 : index
    %c0_10 = arith.constant 0 : index
    %9 = vector.load %arg5[%c0_8, %c0_9, %c0_10] : memref<1x128x128xf32, #tpu.memory_space<vmem>>, vector<1x128x128xf32>
    %10 = vector.shape_cast %9 : vector<1x128x128xf32> to vector<128x128xf32>
    %11 = vector.shape_cast %8 : vector<128x128xf32> to vector<1x128x128xf32>
    tpu.vector_store %arg5[%c0_8, %c0_9, %c0_10], %11 {strides = array<i32>} : memref<1x128x128xf32, #tpu.memory_space<vmem>>, vector<1x128x128xf32>,
    return
  }
  func.func @transform_0(%arg0: i32, %arg1: i32) -> (i32, i32, i32) {
    %c0_i32 = arith.constant 0 : i32
    %c0_i32_0 = arith.constant 0 : i32
    return %arg0, %arg1, %c0_i32 : i32, i32, i32
  }
  func.func @transform_1(%arg0: i32, %arg1: i32) -> (i32, i32, i32) {
    %c0_i32 = arith.constant 0 : i32
    %c0_i32_0 = arith.constant 0 : i32
    %c0_i32_1 = arith.constant 0 : i32
    return %arg0, %c0_i32, %c0_i32_0 : i32, i32, i32
  }
  func.func @transform_2(%arg0: i32, %arg1: i32) -> (i32, i32, i32) {
    %c0_i32 = arith.constant 0 : i32
    %c0_i32_0 = arith.constant 0 : i32
    %c0_i32_1 = arith.constant 0 : i32
    return %arg0, %c0_i32, %c0_i32_0 : i32, i32, i32
  }
  func.func @transform_3(%arg0: i32, %arg1: i32) -> (i32, i32, i32) {
    %c0_i32 = arith.constant 0 : i32
    %c0_i32_0 = arith.constant 0 : i32
    return %arg0, %arg1, %c0_i32 : i32, i32, i32
  }
}

module attributes {stable_mosaic.version = 11 : i64} {
  func.func @_fused_kernel(%arg0: i32, %arg1: i32, %arg2: memref<1x512x64xbf16, #tpu.memory_space<vmem>>, %arg3: memref<1x64x128xbf16, #tpu.memory_space<vmem>>, %arg4: memref<1x1x128xf32, #tpu.memory_space<vmem>>, %arg5: memref<1x512x128xf32, #tpu.memory_space<vmem>>) attributes {dimension_semantics = [#tpu.dimension_semantics<parallel>, #tpu.dimension_semantics<parallel>], iteration_bounds = array<i64: 4, 1>, scalar_prefetch = 0 : i64, scratch_operands = 0 : i64, tpu.core_type = #tpu.core_type<tc>, window_params = [{transform_indices = @transform_0, window_bounds = array<i64: 1, 512, 64>}, {transform_indices = @transform_1, window_bounds = array<i64: 1, 64, 128>}, {transform_indices = @transform_2, window_bounds = array<i64: 1, 1, 128>}, {transform_indices = @transform_3, window_bounds = array<i64: 1, 512, 128>}]} {
    %c0 = arith.constant 0 : index
    %c0_0 = arith.constant 0 : index
    %c0_1 = arith.constant 0 : index
    %0 = vector.load %arg2[%c0, %c0_0, %c0_1] : memref<1x512x64xbf16, #tpu.memory_space<vmem>>, vector<1x512x64xbf16>
    %1 = vector.shape_cast %0 : vector<1x512x64xbf16> to vector<512x64xbf16>
    %c0_2 = arith.constant 0 : index
    %c0_3 = arith.constant 0 : index
    %c0_4 = arith.constant 0 : index
    %2 = vector.load %arg3[%c0_2, %c0_3, %c0_4] : memref<1x64x128xbf16, #tpu.memory_space<vmem>>, vector<1x64x128xbf16>
    %3 = vector.shape_cast %2 : vector<1x64x128xbf16> to vector<64x128xbf16>
    %cst = arith.constant dense<0.000000e+00> : vector<512x128xf32>
    %4 = tpu.matmul %1, %3, %cst {dimension_numbers = #tpu.dot_dimension_numbers<[1], [0], [0], [1], [0, 0, 1, 1], [], []>} : vector<512x64xbf16>, vector<64x128xbf16>, vector<512x128xf32> -> vector<512x128xf32>
    %c0_5 = arith.constant 0 : index
    %c0_6 = arith.constant 0 : index
    %c0_7 = arith.constant 0 : index
    %5 = vector.load %arg4[%c0_5, %c0_6, %c0_7] : memref<1x1x128xf32, #tpu.memory_space<vmem>>, vector<1x1x128xf32>
    %6 = vector.shape_cast %5 : vector<1x1x128xf32> to vector<1x128xf32>
    %7 = vector.broadcast %6 : vector<1x128xf32> to vector<512x128xf32>
    %8 = arith.addf %4, %7 : vector<512x128xf32>
    %9 = arith.negf %8 : vector<512x128xf32>
    %10 = math.exp %9 : vector<512x128xf32>
    %cst_8 = arith.constant 1.000000e+00 : f32
    %11 = vector.broadcast %cst_8 : f32 to vector<512x128xf32>
    %12 = arith.addf %11, %10 : vector<512x128xf32>
    %13 = arith.divf %11, %12 : vector<512x128xf32>
    %c0_9 = arith.constant 0 : index
    %c0_10 = arith.constant 0 : index
    %c0_11 = arith.constant 0 : index
    %14 = vector.load %arg5[%c0_9, %c0_10, %c0_11] : memref<1x512x128xf32, #tpu.memory_space<vmem>>, vector<1x512x128xf32>
    %15 = vector.shape_cast %14 : vector<1x512x128xf32> to vector<512x128xf32>
    %16 = vector.shape_cast %13 : vector<512x128xf32> to vector<1x512x128xf32>
    tpu.vector_store %arg5[%c0_9, %c0_10, %c0_11], %16 {strides = array<i32>} : memref<1x512x128xf32, #tpu.memory_space<vmem>>, vector<1x512x128xf32>,
    return
  }
  func.func @transform_0(%arg0: i32, %arg1: i32) -> (i32, i32, i32) {
    %c0_i32 = arith.constant 0 : i32
    %c0_i32_0 = arith.constant 0 : i32
    return %arg0, %arg1, %c0_i32 : i32, i32, i32
  }
  func.func @transform_1(%arg0: i32, %arg1: i32) -> (i32, i32, i32) {
    %c0_i32 = arith.constant 0 : i32
    %c0_i32_0 = arith.constant 0 : i32
    %c0_i32_1 = arith.constant 0 : i32
    return %arg0, %c0_i32, %c0_i32_0 : i32, i32, i32
  }
  func.func @transform_2(%arg0: i32, %arg1: i32) -> (i32, i32, i32) {
    %c0_i32 = arith.constant 0 : i32
    %c0_i32_0 = arith.constant 0 : i32
    %c0_i32_1 = arith.constant 0 : i32
    return %arg0, %c0_i32, %c0_i32_0 : i32, i32, i32
  }
  func.func @transform_3(%arg0: i32, %arg1: i32) -> (i32, i32, i32) {
    %c0_i32 = arith.constant 0 : i32
    %c0_i32_0 = arith.constant 0 : i32
    return %arg0, %arg1, %c0_i32 : i32, i32, i32
  }
}

module attributes {stable_mosaic.version = 11 : i64} {
  func.func @_fused_kernel(%arg0: i32, %arg1: i32, %arg2: memref<1x16x1024xbf16, #tpu.memory_space<vmem>>, %arg3: memref<1x1024x128xbf16, #tpu.memory_space<vmem>>, %arg4: memref<1x1x128xf32, #tpu.memory_space<vmem>>, %arg5: memref<1x16x128xf32, #tpu.memory_space<vmem>>) attributes {dimension_semantics = [#tpu.dimension_semantics<parallel>, #tpu.dimension_semantics<parallel>], iteration_bounds = array<i64: 1, 1>, scalar_prefetch = 0 : i64, scratch_operands = 0 : i64, tpu.core_type = #tpu.core_type<tc>, window_params = [{transform_indices = @transform_0, window_bounds = array<i64: 1, 16, 1024>}, {transform_indices = @transform_1, window_bounds = array<i64: 1, 1024, 128>}, {transform_indices = @transform_2, window_bounds = array<i64: 1, 1, 128>}, {transform_indices = @transform_3, window_bounds = array<i64: 1, 16, 128>}]} {
    %c0 = arith.constant 0 : index
    %c0_0 = arith.constant 0 : index
    %c0_1 = arith.constant 0 : index
    %0 = vector.load %arg2[%c0, %c0_0, %c0_1] : memref<1x16x1024xbf16, #tpu.memory_space<vmem>>, vector<1x16x1024xbf16>
    %1 = vector.shape_cast %0 : vector<1x16x1024xbf16> to vector<16x1024xbf16>
    %c0_2 = arith.constant 0 : index
    %c0_3 = arith.constant 0 : index
    %c0_4 = arith.constant 0 : index
    %2 = vector.load %arg3[%c0_2, %c0_3, %c0_4] : memref<1x1024x128xbf16, #tpu.memory_space<vmem>>, vector<1x1024x128xbf16>
    %3 = vector.shape_cast %2 : vector<1x1024x128xbf16> to vector<1024x128xbf16>
    %cst = arith.constant dense<0.000000e+00> : vector<16x128xf32>
    %4 = tpu.matmul %1, %3, %cst {dimension_numbers = #tpu.dot_dimension_numbers<[1], [0], [0], [1], [0, 0, 1, 1], [], []>} : vector<16x1024xbf16>, vector<1024x128xbf16>, vector<16x128xf32> -> vector<16x128xf32>
    %c0_5 = arith.constant 0 : index
    %c0_6 = arith.constant 0 : index
    %c0_7 = arith.constant 0 : index
    %5 = vector.load %arg4[%c0_5, %c0_6, %c0_7] : memref<1x1x128xf32, #tpu.memory_space<vmem>>, vector<1x1x128xf32>
    %6 = vector.shape_cast %5 : vector<1x1x128xf32> to vector<1x128xf32>
    %7 = vector.broadcast %6 : vector<1x128xf32> to vector<16x128xf32>
    %8 = arith.addf %4, %7 : vector<16x128xf32>
    %c0_8 = arith.constant 0 : index
    %c0_9 = arith.constant 0 : index
    %c0_10 = arith.constant 0 : index
    %9 = vector.load %arg5[%c0_8, %c0_9, %c0_10] : memref<1x16x128xf32, #tpu.memory_space<vmem>>, vector<1x16x128xf32>
    %10 = vector.shape_cast %9 : vector<1x16x128xf32> to vector<16x128xf32>
    %11 = vector.shape_cast %8 : vector<16x128xf32> to vector<1x16x128xf32>
    tpu.vector_store %arg5[%c0_8, %c0_9, %c0_10], %11 {strides = array<i32>} : memref<1x16x128xf32, #tpu.memory_space<vmem>>, vector<1x16x128xf32>,
    return
  }
  func.func @transform_0(%arg0: i32, %arg1: i32) -> (i32, i32, i32) {
    %c0_i32 = arith.constant 0 : i32
    %c0_i32_0 = arith.constant 0 : i32
    return %arg0, %arg1, %c0_i32 : i32, i32, i32
  }
  func.func @transform_1(%arg0: i32, %arg1: i32) -> (i32, i32, i32) {
    %c0_i32 = arith.constant 0 : i32
    %c0_i32_0 = arith.constant 0 : i32
    %c0_i32_1 = arith.constant 0 : i32
    return %arg0, %c0_i32, %c0_i32_0 : i32, i32, i32
  }
  func.func @transform_2(%arg0: i32, %arg1: i32) -> (i32, i32, i32) {
    %c0_i32 = arith.constant 0 : i32
    %c0_i32_0 = arith.constant 0 : i32
    %c0_i32_1 = arith.constant 0 : i32
    return %arg0, %c0_i32, %c0_i32_0 : i32, i32, i32
  }
  func.func @transform_3(%arg0: i32, %arg1: i32) -> (i32, i32, i32) {
    %c0_i32 = arith.constant 0 : i32
    %c0_i32_0 = arith.constant 0 : i32
    return %arg0, %arg1, %c0_i32 : i32, i32, i32
  }
}

</mosaic_0001>

<bundles_post_ra>
// kernel: forward.10
= control target key start
LH: loop header
LB: loop body
LE: loop exit
PB: predicated region body
PF: predicated region fallthrough
CT: control target
= control target key end

     0   :  { %s871_s12 = smov 0   ;;  %s873_s13 = smov 0   ;;  %s1022_s0 = inlined_call_operand.vmem [shape: bf16[1,512,48], index: 0, kind: input, shape index: {}]   ;;  %s1023_s1 = inlined_call_operand.vmem [shape: bf16[1,48,128], index: 1, kind: input, shape index: {}]   ;;  %s1024_s2 = inlined_call_operand.vmem [shape: f32[1,1,128], index: 2, kind: input, shape index: {}]   ;;  %s1025_s3 = inlined_call_operand.vmem [shape: f32[1,512,128], index: 3, kind: output, shape index: {}]  }
   0x1   :  { %s875_s14 = smov 0  }
   0x2 LB: > { %s22_s15 = sadd.s32 1, %s845_s13  ;;  %p675_p0 = scmp.ge.s32.totalorder %s849_s14, 1  ;;  %s849_s14 = sphi %s875_s14, %s13_s14   ;;  %s845_s13 = sphi %s873_s13, %s1027_s13   ;;  %s841_s12 = sphi %s871_s12, %s1026_s12  }
   0x3   : > { %p23_p1 = scmp.ge.s32.totalorder %s22_s15, 2  ;;  %p176_p2 = scmp.lt.s32.totalorder %s849_s14, 3 }
   0x5   : > { %s1029_s15 = smov (%p23_p1, %s22_s15), 0  ;;  %p177_p3 = pnand %p675_p0, %p176_p2 }
   0x6   : > { %s676_s18 = sshll.u32 (!%p177_p3), %s841_s12, 5 }
   0x7   : > { %180 = sbr.rel (%p177_p3) target bundleno = 217 (0xd9), region = 32  ;;  %p219_p4 = scmp.lt.s32.totalorder (!%p177_p3), %s676_s18, 63 }
   0xc   : > { %v792_v0 = vld [vmem:[%s1023_s1 + $0x10] sm:$0xff]  ;;  %v791_v1 = vld [vmem:[%s1023_s1 + $0x8] sm:$0xff]  ;;  %s1031_s18 = smov (!%p219_p4, %s676_s18), 63  ;;  %v790_v2 = vld [vmem:[%s1023_s1] sm:$0xff]  ;;  %vm385_vm0 = vcmask 392192  }
   0xd   : > { %439 = vmatpush.bf16.msra.mxu0 %v792_v0  ;;  %793 = vmatpush.bf16.msra.mxu1 %v792_v0  ;;  %s677_s21 = sshll.u32 %s1031_s18, 2  ;;  %s679_s27 = sshll.u32 %s1031_s18, 3  ;;  %v942_v19 = vld [vmem:[%s1024_s2] ss:$0 sm:$0xff] }
   0xe   : > { %794 = vmatpush.bf16.msra.mxu2 %v792_v0  ;;  %795 = vmatpush.bf16.msra.mxu3 %v792_v0  ;;  %s904_s26 = scalar_lea.vmem %s1022_s0, %s677_s21  ;;  %s947_s5 = scalar_lea.vmem %s1025_s3, %s679_s27 }
   0xf   : > { %v774_v3 = vld [vmem:[%s904_s26] sm:$0xff]  ;;  %v775_v7 = vld [vmem:[%s904_s26 + $0x8] sm:$0xff]  ;;  %v776_v11 = vld [vmem:[%s904_s26 + $0x10] sm:$0xff] }
  0x10   : > { %v778_v4 = vld [vmem:[%s904_s26 + $0x20] sm:$0xff]  ;;  %v779_v8 = vld [vmem:[%s904_s26 + $0x28] sm:$0xff]  ;;  %v780_v12 = vld [vmem:[%s904_s26 + $0x30] sm:$0xff] }
  0x11   : > { %440 = vmatpush.bf16.msra.mxu0 %v791_v1  ;;  %796 = vmatpush.bf16.msra.mxu1 %v791_v1  ;;  %v782_v5 = vld [vmem:[%s904_s26 + $0x40] sm:$0xff]  ;;  %v783_v9 = vld [vmem:[%s904_s26 + $0x48] sm:$0xff]  ;;  %v784_v13 = vld [vmem:[%s904_s26 + $0x50] sm:$0xff] }
  0x12   : > { %797 = vmatpush.bf16.msra.mxu2 %v791_v1  ;;  %798 = vmatpush.bf16.msra.mxu3 %v791_v1  ;;  %v786_v6 = vld [vmem:[%s904_s26 + $0x60] sm:$0xff]  ;;  %v787_v10 = vld [vmem:[%s904_s26 + $0x68] sm:$0xff]  ;;  %v788_v14 = vld [vmem:[%s904_s26 + $0x70] sm:$0xff] }
  0x13   : > { %v777_v15 = vld [vmem:[%s904_s26 + $0x18] sm:$0xff] }
  0x14   : > { %v781_v16 = vld [vmem:[%s904_s26 + $0x38] sm:$0xff] }
  0x15   : > { %441 = vmatpush.bf16.msra.mxu0 %v790_v2  ;;  %799 = vmatpush.bf16.msra.mxu1 %v790_v2  ;;  %v785_v17 = vld [vmem:[%s904_s26 + $0x58] sm:$0xff] }
  0x16   : > { %800 = vmatpush.bf16.msra.mxu2 %v790_v2  ;;  %801 = vmatpush.bf16.msra.mxu3 %v790_v2  ;;  %v789_v18 = vld [vmem:[%s904_s26 + $0x78] sm:$0xff] }
  0x18   : > { %756 = vmatmul.msk.bf16.vlgmr.msra.gmra.mxu0 %vm385_vm0, %v774_v3  ;;  %760 = vmatmul.msk.bf16.vlgmr.msra.gmra.mxu1 %vm385_vm0, %v778_v4 }
  0x19   : > { %764 = vmatmul.msk.bf16.vlgmr.msra.gmra.mxu2 %vm385_vm0, %v782_v5  ;;  %768 = vmatmul.msk.bf16.vlgmr.msra.gmra.mxu3 %vm385_vm0, %v786_v6 }
  0x28   : > { %757 = vmatmul.msk.bf16.gmra.mxu0 %vm385_vm0, %v775_v7  ;;  %761 = vmatmul.msk.bf16.gmra.mxu1 %vm385_vm0, %v779_v8 }
  0x29   : > { %765 = vmatmul.msk.bf16.gmra.mxu2 %vm385_vm0, %v783_v9  ;;  %769 = vmatmul.msk.bf16.gmra.mxu3 %vm385_vm0, %v787_v10 }
  0x38   : > { %758 = vmatmul.msk.bf16.gmra.mxu0 %vm385_vm0, %v776_v11  ;;  %762 = vmatmul.msk.bf16.gmra.mxu1 %vm385_vm0, %v780_v12 }
  0x39   : > { %766 = vmatmul.msk.bf16.gmra.mxu2 %vm385_vm0, %v784_v13  ;;  %770 = vmatmul.msk.bf16.gmra.mxu3 %vm385_vm0, %v788_v14 }
  0x48   : > { %759 = vmatmul.msk.bf16.gmra.mxu0 %vm385_vm0, %v777_v15  ;;  %763 = vmatmul.msk.bf16.gmra.mxu1 %vm385_vm0, %v781_v16 }
  0x49   : > { %767 = vmatmul.msk.bf16.gmra.mxu2 %vm385_vm0, %v785_v17  ;;  %771 = vmatmul.msk.bf16.gmra.mxu3 %vm385_vm0, %v789_v18 }
  0x95   : > { %v443_v20 = vpop.f32.mrf.mxu0  ;;  %v463_v21 = vpop.f32.mrf.mxu1 }
  0x96   : > { %v444_v22 = vadd.f32 %v942_v19, %v443_v20  ;;  %v464_v23 = vadd.f32 %v942_v19, %v463_v21 }
  0x98   : > { %523 = vst [vmem:[%s947_s5] sm:$0xff] %v444_v22 }
  0x99   : > { %531 = vst [vmem:[%s947_s5 + $0x40] sm:$0xff] %v464_v23 }
  0x9c   : > { %v483_v24 = vpop.f32.mrf.mxu2  ;;  %v503_v25 = vpop.f32.mrf.mxu3 }
  0x9d   : > { %v484_v26 = vadd.f32 %v942_v19, %v483_v24  ;;  %v504_v27 = vadd.f32 %v942_v19, %v503_v25  ;;  %v445_v28 = vpop.f32.mrf.mxu0  ;;  %v465_v29 = vpop.f32.mrf.mxu1 }
  0x9e   : > { %v446_v30 = vadd.f32 %v942_v19, %v445_v28  ;;  %v466_v31 = vadd.f32 %v942_v19, %v465_v29 }
  0x9f   : > { %539 = vst [vmem:[%s947_s5 + $0x80] sm:$0xff] %v484_v26 }
  0xa0   : > { %547 = vst [vmem:[%s947_s5 + $0xc0] sm:$0xff] %v504_v27 }
  0xa1   : > { %524 = vst [vmem:[%s947_s5 + $0x8] sm:$0xff] %v446_v30 }
  0xa2   : > { %532 = vst [vmem:[%s947_s5 + $0x48] sm:$0xff] %v466_v31 }
  0xa4   : > { %v485_v32 = vpop.f32.mrf.mxu2  ;;  %v505_v33 = vpop.f32.mrf.mxu3 }
  0xa5   : > { %v486_v34 = vadd.f32 %v942_v19, %v485_v32  ;;  %v506_v35 = vadd.f32 %v942_v19, %v505_v33  ;;  %v448_v36 = vpop.f32.mrf.mxu0  ;;  %v468_v37 = vpop.f32.mrf.mxu1 }
  0xa6   : > { %v449_v38 = vadd.f32 %v942_v19, %v448_v36  ;;  %v469_v39 = vadd.f32 %v942_v19, %v468_v37 }
  0xa7   : > { %540 = vst [vmem:[%s947_s5 + $0x88] sm:$0xff] %v486_v34 }
  0xa8   : > { %548 = vst [vmem:[%s947_s5 + $0xc8] sm:$0xff] %v506_v35 }
  0xa9   : > { %525 = vst [vmem:[%s947_s5 + $0x10] sm:$0xff] %v449_v38 }
  0xaa   : > { %533 = vst [vmem:[%s947_s5 + $0x50] sm:$0xff] %v469_v39 }
  0xac   : > { %v488_v40 = vpop.f32.mrf.mxu2  ;;  %v508_v41 = vpop.f32.mrf.mxu3 }
  0xad   : > { %v489_v42 = vadd.f32 %v942_v19, %v488_v40  ;;  %v509_v43 = vadd.f32 %v942_v19, %v508_v41  ;;  %v450_v44 = vpop.f32.mrf.mxu0  ;;  %v470_v45 = vpop.f32.mrf.mxu1 }
  0xae   : > { %v451_v46 = vadd.f32 %v942_v19, %v450_v44  ;;  %v471_v47 = vadd.f32 %v942_v19, %v470_v45 }
  0xaf   : > { %541 = vst [vmem:[%s947_s5 + $0x90] sm:$0xff] %v489_v42 }
  0xb0   : > { %549 = vst [vmem:[%s947_s5 + $0xd0] sm:$0xff] %v509_v43 }
  0xb1   : > { %526 = vst [vmem:[%s947_s5 + $0x18] sm:$0xff] %v451_v46 }
  0xb2   : > { %534 = vst [vmem:[%s947_s5 + $0x58] sm:$0xff] %v471_v47 }
  0xb4   : > { %v490_v48 = vpop.f32.mrf.mxu2  ;;  %v510_v49 = vpop.f32.mrf.mxu3 }
  0xb5   : > { %v491_v50 = vadd.f32 %v942_v19, %v490_v48  ;;  %v511_v51 = vadd.f32 %v942_v19, %v510_v49  ;;  %v453_v52 = vpop.f32.mrf.mxu0  ;;  %v473_v53 = vpop.f32.mrf.mxu1 }
  0xb6   : > { %v454_v54 = vadd.f32 %v942_v19, %v453_v52  ;;  %v474_v55 = vadd.f32 %v942_v19, %v473_v53 }
  0xb7   : > { %542 = vst [vmem:[%s947_s5 + $0x98] sm:$0xff] %v491_v50 }
  0xb8   : > { %550 = vst [vmem:[%s947_s5 + $0xd8] sm:$0xff] %v511_v51 }
  0xb9   : > { %527 = vst [vmem:[%s947_s5 + $0x20] sm:$0xff] %v454_v54 }
  0xba   : > { %535 = vst [vmem:[%s947_s5 + $0x60] sm:$0xff] %v474_v55 }
  0xbc   : > { %v493_v56 = vpop.f32.mrf.mxu2  ;;  %v513_v57 = vpop.f32.mrf.mxu3 }
  0xbd   : > { %v494_v58 = vadd.f32 %v942_v19, %v493_v56  ;;  %v514_v59 = vadd.f32 %v942_v19, %v513_v57  ;;  %v455_v60 = vpop.f32.mrf.mxu0  ;;  %v475_v61 = vpop.f32.mrf.mxu1 }
  0xbe   : > { %v456_v62 = vadd.f32 %v942_v19, %v455_v60  ;;  %v476_v63 = vadd.f32 %v942_v19, %v475_v61 }
  0xbf   : > { %543 = vst [vmem:[%s947_s5 + $0xa0] sm:$0xff] %v494_v58 }
  0xc0   : > { %551 = vst [vmem:[%s947_s5 + $0xe0] sm:$0xff] %v514_v59 }
  0xc1   : > { %528 = vst [vmem:[%s947_s5 + $0x28] sm:$0xff] %v456_v62 }
  0xc2   : > { %536 = vst [vmem:[%s947_s5 + $0x68] sm:$0xff] %v476_v63 }
  0xc4   : > { %v495_v0 = vpop.f32.mrf.mxu2  ;;  %v515_v1 = vpop.f32.mrf.mxu3 }
  0xc5   : > { %v496_v2 = vadd.f32 %v942_v19, %v495_v0  ;;  %v516_v3 = vadd.f32 %v942_v19, %v515_v1  ;;  %v458_v4 = vpop.f32.mrf.mxu0  ;;  %v478_v5 = vpop.f32.mrf.mxu1 }
  0xc6   : > { %v459_v6 = vadd.f32 %v942_v19, %v458_v4  ;;  %v479_v7 = vadd.f32 %v942_v19, %v478_v5 }
  0xc7   : > { %544 = vst [vmem:[%s947_s5 + $0xa8] sm:$0xff] %v496_v2 }
  0xc8   : > { %552 = vst [vmem:[%s947_s5 + $0xe8] sm:$0xff] %v516_v3 }
  0xc9   : > { %529 = vst [vmem:[%s947_s5 + $0x30] sm:$0xff] %v459_v6 }
  0xca   : > { %537 = vst [vmem:[%s947_s5 + $0x70] sm:$0xff] %v479_v7 }
  0xcc   : > { %v498_v8 = vpop.f32.mrf.mxu2  ;;  %v518_v9 = vpop.f32.mrf.mxu3 }
  0xcd   : > { %v499_v10 = vadd.f32 %v942_v19, %v498_v8  ;;  %v519_v11 = vadd.f32 %v942_v19, %v518_v9  ;;  %v460_v12 = vpop.f32.mrf.mxu0  ;;  %v480_v13 = vpop.f32.mrf.mxu1 }
  0xce   : > { %v461_v14 = vadd.f32 %v942_v19, %v460_v12  ;;  %v481_v15 = vadd.f32 %v942_v19, %v480_v13 }
  0xcf   : > { %545 = vst [vmem:[%s947_s5 + $0xb0] sm:$0xff] %v499_v10 }
  0xd0   : > { %553 = vst [vmem:[%s947_s5 + $0xf0] sm:$0xff] %v519_v11 }
  0xd1   : > { %530 = vst [vmem:[%s947_s5 + $0x38] sm:$0xff] %v461_v14 }
  0xd2   : > { %538 = vst [vmem:[%s947_s5 + $0x78] sm:$0xff] %v481_v15 }
  0xd4   : > { %v500_v16 = vpop.f32.mrf.mxu2  ;;  %v520_v17 = vpop.f32.mrf.mxu3 }
  0xd5   : > { %v501_v18 = vadd.f32 %v942_v19, %v500_v16  ;;  %v521_v20 = vadd.f32 %v942_v19, %v520_v17 }
  0xd7   : > { %546 = vst [vmem:[%s947_s5 + $0xb8] sm:$0xff] %v501_v18 }
  0xd8   : > { %554 = vst [vmem:[%s947_s5 + $0xf8] sm:$0xff] %v521_v20 }
  0xd9 PF: > { %s13_s14 = sadd.s32 1, %s849_s14   ;;  %s1026_s12 = smov %s845_s13 }
  0xda   : > { %p10_p5 = scmp.ge.s32.totalorder %s13_s14, 4   ;;  %s1027_s13 = smov %s1029_s15 }
  0xdc   :  { %12 = sbr.rel (!%p10_p5) target bundleno = 2 (0x2), region = 68 }

// kernel: forward.11
= control target key start
LH: loop header
LB: loop body
LE: loop exit
PB: predicated region body
PF: predicated region fallthrough
CT: control target
= control target key end

     0   :  { %s661_s12 = smov 0   ;;  %s663_s13 = smov 0   ;;  %s724_s0 = inlined_call_operand.vmem [shape: bf16[1,128,128], index: 0, kind: input, shape index: {}]   ;;  %s725_s1 = inlined_call_operand.vmem [shape: bf16[1,128,128], index: 1, kind: input, shape index: {}]   ;;  %s726_s2 = inlined_call_operand.vmem [shape: f32[1,1,128], index: 2, kind: input, shape index: {}]   ;;  %s727_s3 = inlined_call_operand.vmem [shape: f32[1,128,128], index: 3, kind: output, shape index: {}]  }
   0x1   :  { %s665_s14 = smov 0  }
   0x2 LB: > { %s22_s15 = sadd.s32 1, %s635_s13  ;;  %p501_p0 = scmp.ge.s32.totalorder %s639_s14, 1  ;;  %s639_s14 = sphi %s665_s14, %s13_s14   ;;  %s635_s13 = sphi %s663_s13, %s729_s13   ;;  %s631_s12 = sphi %s661_s12, %s728_s12  }
   0x3   : > { %p23_p1 = scmp.ge.s32.totalorder %s22_s15, 2  ;;  %p176_p2 = scmp.lt.s32.totalorder %s639_s14, 3 }
   0x5   : > { %s731_s15 = smov (%p23_p1, %s22_s15), 0  ;;  %p177_p3 = pnand %p501_p0, %p176_p2 }
   0x6   : > { %s502_s24 = sshll.u32 (!%p177_p3), %s631_s12, 3 }
   0x7   : > { %180 = sbr.rel (%p177_p3) target bundleno = 189 (0xbd), region = 32  ;;  %p219_p4 = scmp.lt.s32.totalorder (!%p177_p3), %s502_s24, 15 }
   0xc   : > { %v567_v0 = vld [vmem:[%s725_s1 + $0x38] sm:$0xff]  ;;  %v566_v1 = vld [vmem:[%s725_s1 + $0x30] sm:$0xff]  ;;  %v565_v2 = vld [vmem:[%s725_s1 + $0x28] sm:$0xff]  ;;  %s733_s24 = smov (!%p219_p4, %s502_s24), 15 }
   0xd   : > { %344 = vmatpush.bf16.msra.mxu0 %v567_v0  ;;  %568 = vmatpush.bf16.msra.mxu1 %v567_v0  ;;  %v564_v3 = vld [vmem:[%s725_s1 + $0x20] sm:$0xff]  ;;  %v563_v4 = vld [vmem:[%s725_s1 + $0x18] sm:$0xff]  ;;  %v562_v5 = vld [vmem:[%s725_s1 + $0x10] sm:$0xff]  ;;  %s503_s4 = sshll.u32 %s733_s24, 2  ;;  %s505_s10 = sshll.u32 %s733_s24, 3 }
   0xe   : > { %569 = vmatpush.bf16.msra.mxu2 %v567_v0  ;;  %570 = vmatpush.bf16.msra.mxu3 %v567_v0  ;;  %v561_v6 = vld [vmem:[%s725_s1 + $0x8] sm:$0xff]  ;;  %v560_v7 = vld [vmem:[%s725_s1] sm:$0xff]  ;;  %s224_s9 = scalar_lea.vmem %s724_s0, %s503_s4  ;;  %s242_s18 = scalar_lea.vmem %s727_s3, %s505_s10 }
   0xf   : > { %v556_v8 = vld [vmem:[%s224_s9] sm:$0xff]  ;;  %v557_v9 = vld [vmem:[%s224_s9 + $0x8] sm:$0xff]  ;;  %v558_v10 = vld [vmem:[%s224_s9 + $0x10] sm:$0xff] }
  0x10   : > { %v559_v11 = vld [vmem:[%s224_s9 + $0x18] sm:$0xff]  ;;  %v616_v12 = vld [vmem:[%s726_s2] ss:$0 sm:$0xff] }
  0x11   : > { %345 = vmatpush.bf16.msra.mxu0 %v566_v1  ;;  %571 = vmatpush.bf16.msra.mxu1 %v566_v1 }
  0x12   : > { %572 = vmatpush.bf16.msra.mxu2 %v566_v1  ;;  %573 = vmatpush.bf16.msra.mxu3 %v566_v1 }
  0x15   : > { %346 = vmatpush.bf16.msra.mxu0 %v565_v2  ;;  %574 = vmatpush.bf16.msra.mxu1 %v565_v2 }
  0x16   : > { %575 = vmatpush.bf16.msra.mxu2 %v565_v2  ;;  %576 = vmatpush.bf16.msra.mxu3 %v565_v2 }
  0x19   : > { %347 = vmatpush.bf16.msra.mxu0 %v564_v3  ;;  %577 = vmatpush.bf16.msra.mxu1 %v564_v3 }
  0x1a   : > { %578 = vmatpush.bf16.msra.mxu2 %v564_v3  ;;  %579 = vmatpush.bf16.msra.mxu3 %v564_v3 }
  0x1d   : > { %348 = vmatpush.bf16.msra.mxu0 %v563_v4  ;;  %580 = vmatpush.bf16.msra.mxu1 %v563_v4 }
  0x1e   : > { %581 = vmatpush.bf16.msra.mxu2 %v563_v4  ;;  %582 = vmatpush.bf16.msra.mxu3 %v563_v4 }
  0x21   : > { %349 = vmatpush.bf16.msra.mxu0 %v562_v5  ;;  %583 = vmatpush.bf16.msra.mxu1 %v562_v5 }
  0x22   : > { %584 = vmatpush.bf16.msra.mxu2 %v562_v5  ;;  %585 = vmatpush.bf16.msra.mxu3 %v562_v5 }
  0x25   : > { %350 = vmatpush.bf16.msra.mxu0 %v561_v6  ;;  %586 = vmatpush.bf16.msra.mxu1 %v561_v6 }
  0x26   : > { %587 = vmatpush.bf16.msra.mxu2 %v561_v6  ;;  %588 = vmatpush.bf16.msra.mxu3 %v561_v6 }
  0x29   : > { %351 = vmatpush.bf16.msra.mxu0 %v560_v7  ;;  %589 = vmatpush.bf16.msra.mxu1 %v560_v7 }
  0x2a   : > { %590 = vmatpush.bf16.msra.mxu2 %v560_v7  ;;  %591 = vmatpush.bf16.msra.mxu3 %v560_v7 }
  0x2c   : > { %352 = vmatmul.bf16.vlgmr.msra.gmra.mxu0 %v556_v8  ;;  %357 = vmatmul.bf16.vlgmr.msra.gmra.mxu1 %v557_v9 }
  0x2d   : > { %362 = vmatmul.bf16.vlgmr.msra.gmra.mxu2 %v558_v10  ;;  %367 = vmatmul.bf16.vlgmr.msra.gmra.mxu3 %v559_v11 }
  0xa9   : > { %v353_v13 = vpop.f32.mrf.mxu0  ;;  %v358_v14 = vpop.f32.mrf.mxu1 }
  0xaa   : > { %v354_v15 = vadd.f32 %v616_v12, %v353_v13  ;;  %v359_v16 = vadd.f32 %v616_v12, %v358_v14 }
  0xac   : > { %373 = vst [vmem:[%s242_s18] sm:$0xff] %v354_v15 }
  0xad   : > { %375 = vst [vmem:[%s242_s18 + $0x10] sm:$0xff] %v359_v16 }
  0xb0   : > { %v363_v17 = vpop.f32.mrf.mxu2  ;;  %v368_v18 = vpop.f32.mrf.mxu3 }
  0xb1   : > { %v364_v19 = vadd.f32 %v616_v12, %v363_v17  ;;  %v369_v20 = vadd.f32 %v616_v12, %v368_v18  ;;  %v355_v21 = vpop.f32.mrf.mxu0  ;;  %v360_v22 = vpop.f32.mrf.mxu1 }
  0xb2   : > { %v356_v23 = vadd.f32 %v616_v12, %v355_v21  ;;  %v361_v24 = vadd.f32 %v616_v12, %v360_v22 }
  0xb3   : > { %377 = vst [vmem:[%s242_s18 + $0x20] sm:$0xff] %v364_v19 }
  0xb4   : > { %379 = vst [vmem:[%s242_s18 + $0x30] sm:$0xff] %v369_v20 }
  0xb5   : > { %374 = vst [vmem:[%s242_s18 + $0x8] sm:$0xff] %v356_v23 }
  0xb6   : > { %376 = vst [vmem:[%s242_s18 + $0x18] sm:$0xff] %v361_v24 }
  0xb8   : > { %v365_v25 = vpop.f32.mrf.mxu2  ;;  %v370_v26 = vpop.f32.mrf.mxu3 }
  0xb9   : > { %v366_v27 = vadd.f32 %v616_v12, %v365_v25  ;;  %v371_v28 = vadd.f32 %v616_v12, %v370_v26 }
  0xbb   : > { %378 = vst [vmem:[%s242_s18 + $0x28] sm:$0xff] %v366_v27 }
  0xbc   : > { %380 = vst [vmem:[%s242_s18 + $0x38] sm:$0xff] %v371_v28 }
  0xbd PF: > { %s13_s14 = sadd.s32 1, %s639_s14   ;;  %s728_s12 = smov %s635_s13 }
  0xbe   : > { %p10_p5 = scmp.ge.s32.totalorder %s13_s14, 4   ;;  %s729_s13 = smov %s731_s15 }
  0xc0   :  { %12 = sbr.rel (!%p10_p5) target bundleno = 2 (0x2), region = 68 }

// kernel: forward.12
= control target key start
LH: loop header
LB: loop body
LE: loop exit
PB: predicated region body
PF: predicated region fallthrough
CT: control target
= control target key end

     0   :  { %s440_s1 = inlined_call_operand.vmem [shape: bf16[1,256,128], index: 1, kind: input, shape index: {}]   ;;  %s441_s2 = inlined_call_operand.vmem [shape: f32[1,1,128], index: 2, kind: input, shape index: {}]   ;;  %s442_s0 = inlined_call_operand.vmem [shape: bf16[1,32,256], index: 0, kind: input, shape index: {}]   ;;  %s443_s3 = inlined_call_operand.vmem [shape: f32[1,32,128], index: 3, kind: output, shape index: {}]  }
   0x1   :  { %v307_v0 = vld [vmem:[%s440_s1 + $0x38] sm:$0xff]  ;;  %v306_v2 = vld [vmem:[%s440_s1 + $0x30] sm:$0xff]  ;;  %v305_v4 = vld [vmem:[%s440_s1 + $0x28] sm:$0xff] }
   0x2   :  { %v315_v1 = vld [vmem:[%s440_s1 + $0x78] sm:$0xff]  ;;  %170 = vmatpush.bf16.msra.mxu0 %v307_v0  ;;  %316 = vmatpush.bf16.msra.mxu2 %v307_v0  ;;  %v314_v3 = vld [vmem:[%s440_s1 + $0x70] sm:$0xff]  ;;  %v313_v5 = vld [vmem:[%s440_s1 + $0x68] sm:$0xff] }
   0x3   :  { %189 = vmatpush.bf16.msra.mxu1 %v315_v1  ;;  %324 = vmatpush.bf16.msra.mxu3 %v315_v1  ;;  %v304_v6 = vld [vmem:[%s440_s1 + $0x20] sm:$0xff]  ;;  %v303_v8 = vld [vmem:[%s440_s1 + $0x18] sm:$0xff]  ;;  %v302_v10 = vld [vmem:[%s440_s1 + $0x10] sm:$0xff] }
   0x4   :  { %v312_v7 = vld [vmem:[%s440_s1 + $0x60] sm:$0xff]  ;;  %v311_v9 = vld [vmem:[%s440_s1 + $0x58] sm:$0xff]  ;;  %v310_v11 = vld [vmem:[%s440_s1 + $0x50] sm:$0xff] }
   0x5   :  { %v301_v12 = vld [vmem:[%s440_s1 + $0x8] sm:$0xff]  ;;  %v300_v14 = vld [vmem:[%s440_s1] sm:$0xff]  ;;  %v226_v18 = vld [vmem:[%s442_s0 + $0x10] sm:$0xf] }
   0x6   :  { %171 = vmatpush.bf16.msra.mxu0 %v306_v2  ;;  %317 = vmatpush.bf16.msra.mxu2 %v306_v2  ;;  %v309_v13 = vld [vmem:[%s440_s1 + $0x48] sm:$0xff]  ;;  %v308_v15 = vld [vmem:[%s440_s1 + $0x40] sm:$0xff]  ;;  %v299_v19 = vld [vmem:[%s442_s0 + $0x14] sm:$0xf0] }
   0x7   :  { %190 = vmatpush.bf16.msra.mxu1 %v314_v3  ;;  %325 = vmatpush.bf16.msra.mxu3 %v314_v3  ;;  %v218_v16 = vld [vmem:[%s442_s0] sm:$0xf]  ;;  %v297_v17 = vld [vmem:[%s442_s0 + $0x4] sm:$0xf0]  ;;  %v296_v20 = vld [vmem:[%s442_s0 + $0x4] sm:$0xf]  ;;  %v227_v25 = vor.u32 %v299_v19, %v226_v18 }
   0x8   :  { %v220_v21 = vld [vmem:[%s442_s0 + $0x8] sm:$0xf0]  ;;  %v298_v22 = vld [vmem:[%s442_s0 + $0x14] sm:$0xf]  ;;  %v228_v23 = vld [vmem:[%s442_s0 + $0x18] sm:$0xf0]  ;;  %v219_v24 = vor.u32 %v297_v17, %v218_v16 }
   0x9   :  { %v223_v26 = vor.u32 %v296_v20, %v220_v21  ;;  %v231_v27 = vor.u32 %v298_v22, %v228_v23  ;;  %v332_v28 = vld [vmem:[%s441_s2] ss:$0 sm:$0xff] }
   0xa   :  { %172 = vmatpush.bf16.msra.mxu0 %v305_v4  ;;  %318 = vmatpush.bf16.msra.mxu2 %v305_v4 }
   0xb   :  { %191 = vmatpush.bf16.msra.mxu1 %v313_v5  ;;  %326 = vmatpush.bf16.msra.mxu3 %v313_v5 }
   0xe   :  { %173 = vmatpush.bf16.msra.mxu0 %v304_v6  ;;  %319 = vmatpush.bf16.msra.mxu2 %v304_v6 }
   0xf   :  { %192 = vmatpush.bf16.msra.mxu1 %v312_v7  ;;  %327 = vmatpush.bf16.msra.mxu3 %v312_v7 }
  0x12   :  { %174 = vmatpush.bf16.msra.mxu0 %v303_v8  ;;  %320 = vmatpush.bf16.msra.mxu2 %v303_v8 }
  0x13   :  { %193 = vmatpush.bf16.msra.mxu1 %v311_v9  ;;  %328 = vmatpush.bf16.msra.mxu3 %v311_v9 }
  0x16   :  { %175 = vmatpush.bf16.msra.mxu0 %v302_v10  ;;  %321 = vmatpush.bf16.msra.mxu2 %v302_v10 }
  0x17   :  { %194 = vmatpush.bf16.msra.mxu1 %v310_v11  ;;  %329 = vmatpush.bf16.msra.mxu3 %v310_v11 }
  0x1a   :  { %176 = vmatpush.bf16.msra.mxu0 %v301_v12  ;;  %322 = vmatpush.bf16.msra.mxu2 %v301_v12 }
  0x1b   :  { %195 = vmatpush.bf16.msra.mxu1 %v309_v13  ;;  %330 = vmatpush.bf16.msra.mxu3 %v309_v13 }
  0x1e   :  { %177 = vmatpush.bf16.msra.mxu0 %v300_v14  ;;  %323 = vmatpush.bf16.msra.mxu2 %v300_v14 }
  0x1f   :  { %196 = vmatpush.bf16.msra.mxu1 %v308_v15  ;;  %331 = vmatpush.bf16.msra.mxu3 %v308_v15 }
  0x21   :  { %178 = vmatmul.bf16.vlgmr.msra.gmra.mxu0 %v219_v24  ;;  %183 = vmatmul.bf16.vlgmr.msra.gmra.mxu2 %v227_v25 }
  0x22   :  { %197 = vmatmul.bf16.vlgmr.msra.gmra.mxu1 %v223_v26  ;;  %202 = vmatmul.bf16.vlgmr.msra.gmra.mxu3 %v231_v27 }
  0x9e   :  { %v179_v29 = vpop.f32.mrf.mxu0 }
  0x9f   :  { %v180_v30 = vadd.f32 %v332_v28, %v179_v29  ;;  %v198_v31 = vpop.f32.mrf.mxu1 }
  0xa1   :  { %v199_v32 = vadd.f32 %v198_v31, %v180_v30 }
  0xa3   :  { %208 = vst [vmem:[%s443_s3] sm:$0xff] %v199_v32 }
  0xa4   :  { %v184_v33 = vpop.f32.mrf.mxu2 }
  0xa5   :  { %v185_v34 = vadd.f32 %v332_v28, %v184_v33  ;;  %v203_v35 = vpop.f32.mrf.mxu3 }
  0xa6   :  { %v181_v36 = vpop.f32.mrf.mxu0 }
  0xa7   :  { %v204_v37 = vadd.f32 %v203_v35, %v185_v34  ;;  %v182_v38 = vadd.f32 %v332_v28, %v181_v36  ;;  %v200_v39 = vpop.f32.mrf.mxu1 }
  0xa9   :  { %210 = vst [vmem:[%s443_s3 + $0x10] sm:$0xff] %v204_v37  ;;  %v201_v40 = vadd.f32 %v200_v39, %v182_v38 }
  0xab   :  { %209 = vst [vmem:[%s443_s3 + $0x8] sm:$0xff] %v201_v40 }
  0xac   :  { %v186_v41 = vpop.f32.mrf.mxu2 }
  0xad   :  { %v187_v42 = vadd.f32 %v332_v28, %v186_v41  ;;  %v205_v43 = vpop.f32.mrf.mxu3 }
  0xaf   :  { %v206_v44 = vadd.f32 %v205_v43, %v187_v42 }
  0xb1   :  { %211 = vst [vmem:[%s443_s3 + $0x18] sm:$0xff] %v206_v44 }

// kernel: forward.15
= control target key start
LH: loop header
LB: loop body
LE: loop exit
PB: predicated region body
PF: predicated region fallthrough
CT: control target
= control target key end

     0   :  { %s707_s12 = smov 0   ;;  %s709_s13 = smov 0   ;;  %s774_s0 = inlined_call_operand.vmem [shape: bf16[4,16,256], index: 0, kind: input, shape index: {}]   ;;  %s775_s1 = inlined_call_operand.vmem [shape: bf16[4,256,128], index: 1, kind: input, shape index: {}]   ;;  %s776_s2 = inlined_call_operand.vmem [shape: f32[4,1,128], index: 2, kind: input, shape index: {}]   ;;  %s777_s3 = inlined_call_operand.vmem [shape: f32[4,16,128], index: 3, kind: output, shape index: {}]  }
   0x1   :  { %s711_s14 = smov 0  }
   0x2 LB: > { %s25_s15 = sadd.s32 1, %s681_s13  ;;  %p536_p0 = scmp.ge.s32.totalorder %s685_s14, 1  ;;  %s685_s14 = sphi %s711_s14, %s13_s14   ;;  %s681_s13 = sphi %s709_s13, %s779_s13   ;;  %s677_s12 = sphi %s707_s12, %s778_s12  }
   0x3   : > { %p27_p1 = scmp.ge.s32.totalorder %s25_s15, 4  ;;  %p177_p2 = scmp.lt.s32.totalorder %s685_s14, 5 }
   0x5   : > { %s781_s15 = smov (%p27_p1, %s25_s15), 0  ;;  %p178_p3 = pnand %p536_p0, %p177_p2 }
   0x6   : > { %p219_p4 = scmp.lt.s32.totalorder (!%p178_p3), %s677_s12, 3 }
   0x7   : > { %181 = sbr.rel (%p178_p3) target bundleno = 186 (0xba), region = 32 }
   0xc   : > { %s783_s12 = smov (!%p219_p4, %s677_s12), 3 }
   0xd   : > { %s618_s16 = sshll.u32 %s783_s12, 7  ;;  %s236_s22 = scalar_lea.vmem %s776_s2, %s783_s12 }
   0xe   : > { %s731_s19 = scalar_lea.vmem %s775_s1, %s618_s16  ;;  %s617_s23 = sshll.u32 %s783_s12, 4  ;;  %v662_v22 = vld [vmem:[%s236_s22] ss:$0 sm:$0xff] }
   0xf   : > { %v629_v0 = vld [vmem:[%s731_s19 + $0x38] sm:$0xff]  ;;  %v628_v2 = vld [vmem:[%s731_s19 + $0x30] sm:$0xff]  ;;  %v627_v4 = vld [vmem:[%s731_s19 + $0x28] sm:$0xff]  ;;  %s227_s26 = scalar_lea.vmem %s774_s0, %s617_s23  ;;  %s245_s4 = scalar_lea.vmem %s777_s3, %s617_s23 }
  0x10   : > { %v637_v1 = vld [vmem:[%s731_s19 + $0x78] sm:$0xff]  ;;  %391 = vmatpush.bf16.msra.mxu0 %v629_v0  ;;  %v636_v3 = vld [vmem:[%s731_s19 + $0x70] sm:$0xff]  ;;  %v635_v5 = vld [vmem:[%s731_s19 + $0x68] sm:$0xff] }
  0x11   : > { %405 = vmatpush.bf16.msra.mxu1 %v637_v1  ;;  %v626_v6 = vld [vmem:[%s731_s19 + $0x20] sm:$0xff]  ;;  %v625_v8 = vld [vmem:[%s731_s19 + $0x18] sm:$0xff]  ;;  %v624_v10 = vld [vmem:[%s731_s19 + $0x10] sm:$0xff] }
  0x12   : > { %v634_v7 = vld [vmem:[%s731_s19 + $0x60] sm:$0xff]  ;;  %v633_v9 = vld [vmem:[%s731_s19 + $0x58] sm:$0xff]  ;;  %v632_v11 = vld [vmem:[%s731_s19 + $0x50] sm:$0xff] }
  0x13   : > { %v623_v12 = vld [vmem:[%s731_s19 + $0x8] sm:$0xff]  ;;  %v622_v14 = vld [vmem:[%s731_s19] sm:$0xff] }
  0x14   : > { %392 = vmatpush.bf16.msra.mxu0 %v628_v2  ;;  %v631_v13 = vld [vmem:[%s731_s19 + $0x48] sm:$0xff]  ;;  %v630_v15 = vld [vmem:[%s731_s19 + $0x40] sm:$0xff] }
  0x15   : > { %406 = vmatpush.bf16.msra.mxu1 %v636_v3  ;;  %v545_v16 = vld [vmem:[%s227_s26] sm:$0xf]  ;;  %v621_v17 = vld [vmem:[%s227_s26 + $0x4] sm:$0xf0]  ;;  %v620_v18 = vld [vmem:[%s227_s26 + $0x4] sm:$0xf] }
  0x16   : > { %v547_v19 = vld [vmem:[%s227_s26 + $0x8] sm:$0xf0]  ;;  %v546_v20 = vor.u32 %v621_v17, %v545_v16 }
  0x17   : > { %v550_v21 = vor.u32 %v620_v18, %v547_v19 }
  0x18   : > { %393 = vmatpush.bf16.msra.mxu0 %v627_v4 }
  0x19   : > { %407 = vmatpush.bf16.msra.mxu1 %v635_v5 }
  0x1c   : > { %394 = vmatpush.bf16.msra.mxu0 %v626_v6 }
  0x1d   : > { %408 = vmatpush.bf16.msra.mxu1 %v634_v7 }
  0x20   : > { %395 = vmatpush.bf16.msra.mxu0 %v625_v8 }
  0x21   : > { %409 = vmatpush.bf16.msra.mxu1 %v633_v9 }
  0x24   : > { %396 = vmatpush.bf16.msra.mxu0 %v624_v10 }
  0x25   : > { %410 = vmatpush.bf16.msra.mxu1 %v632_v11 }
  0x28   : > { %397 = vmatpush.bf16.msra.mxu0 %v623_v12 }
  0x29   : > { %411 = vmatpush.bf16.msra.mxu1 %v631_v13 }
  0x2c   : > { %398 = vmatpush.bf16.msra.mxu0 %v622_v14 }
  0x2d   : > { %412 = vmatpush.bf16.msra.mxu1 %v630_v15 }
  0x2f   : > { %399 = vmatmul.bf16.vlgmr.msra.gmra.mxu0 %v546_v20 }
  0x30   : > { %413 = vmatmul.bf16.vlgmr.msra.gmra.mxu1 %v550_v21 }
  0xac   : > { %v400_v23 = vpop.f32.mrf.mxu0 }
  0xad   : > { %v414_v24 = vpop.f32.mrf.mxu1  ;;  %v401_v25 = vadd.f32 %v662_v22, %v400_v23 }
  0xaf   : > { %v415_v26 = vadd.f32 %v414_v24, %v401_v25 }
  0xb1   : > { %419 = vst [vmem:[%s245_s4] sm:$0xff] %v415_v26 }
  0xb4   : > { %v402_v27 = vpop.f32.mrf.mxu0 }
  0xb5   : > { %v403_v28 = vadd.f32 %v662_v22, %v402_v27  ;;  %v416_v29 = vpop.f32.mrf.mxu1 }
  0xb7   : > { %v417_v30 = vadd.f32 %v416_v29, %v403_v28 }
  0xb9   : > { %420 = vst [vmem:[%s245_s4 + $0x8] sm:$0xff] %v417_v30 }
  0xba PF: > { %s13_s14 = sadd.s32 1, %s685_s14   ;;  %s778_s12 = smov %s681_s13 }
  0xbb   : > { %p10_p5 = scmp.ge.s32.totalorder %s13_s14, 6   ;;  %s779_s13 = smov %s781_s15 }
  0xbd   :  { %12 = sbr.rel (!%p10_p5) target bundleno = 2 (0x2), region = 68 }

// kernel: forward.13
= control target key start
LH: loop header
LB: loop body
LE: loop exit
PB: predicated region body
PF: predicated region fallthrough
CT: control target
= control target key end

     0   :  { %s690_s1 = inlined_call_operand.vmem [shape: bf16[1,512,128], index: 1, kind: input, shape index: {}]   ;;  %s691_s2 = inlined_call_operand.vmem [shape: f32[1,1,128], index: 2, kind: input, shape index: {}]   ;;  %s692_s0 = inlined_call_operand.vmem [shape: bf16[1,16,512], index: 0, kind: input, shape index: {}]   ;;  %s693_s3 = inlined_call_operand.vmem [shape: f32[1,16,128], index: 3, kind: output, shape index: {}]  }
   0x1   :  { %v515_v0 = vld [vmem:[%s690_s1 + $0x38] sm:$0xff]  ;;  %v514_v4 = vld [vmem:[%s690_s1 + $0x30] sm:$0xff]  ;;  %v513_v8 = vld [vmem:[%s690_s1 + $0x28] sm:$0xff] }
   0x2   :  { %v523_v1 = vld [vmem:[%s690_s1 + $0x78] sm:$0xff]  ;;  %298 = vmatpush.bf16.msra.mxu0 %v515_v0  ;;  %v522_v5 = vld [vmem:[%s690_s1 + $0x70] sm:$0xff]  ;;  %v521_v9 = vld [vmem:[%s690_s1 + $0x68] sm:$0xff] }
   0x3   :  { %v531_v2 = vld [vmem:[%s690_s1 + $0xb8] sm:$0xff]  ;;  %312 = vmatpush.bf16.msra.mxu1 %v523_v1  ;;  %v530_v6 = vld [vmem:[%s690_s1 + $0xb0] sm:$0xff]  ;;  %v529_v10 = vld [vmem:[%s690_s1 + $0xa8] sm:$0xff] }
   0x4   :  { %v539_v3 = vld [vmem:[%s690_s1 + $0xf8] sm:$0xff]  ;;  %326 = vmatpush.bf16.msra.mxu2 %v531_v2  ;;  %v538_v7 = vld [vmem:[%s690_s1 + $0xf0] sm:$0xff]  ;;  %v537_v11 = vld [vmem:[%s690_s1 + $0xe8] sm:$0xff] }
   0x5   :  { %340 = vmatpush.bf16.msra.mxu3 %v539_v3  ;;  %v512_v12 = vld [vmem:[%s690_s1 + $0x20] sm:$0xff]  ;;  %v511_v16 = vld [vmem:[%s690_s1 + $0x18] sm:$0xff]  ;;  %v510_v20 = vld [vmem:[%s690_s1 + $0x10] sm:$0xff] }
   0x6   :  { %299 = vmatpush.bf16.msra.mxu0 %v514_v4  ;;  %v520_v13 = vld [vmem:[%s690_s1 + $0x60] sm:$0xff]  ;;  %v519_v17 = vld [vmem:[%s690_s1 + $0x58] sm:$0xff]  ;;  %v518_v21 = vld [vmem:[%s690_s1 + $0x50] sm:$0xff] }
   0x7   :  { %313 = vmatpush.bf16.msra.mxu1 %v522_v5  ;;  %v528_v14 = vld [vmem:[%s690_s1 + $0xa0] sm:$0xff]  ;;  %v527_v18 = vld [vmem:[%s690_s1 + $0x98] sm:$0xff]  ;;  %v526_v22 = vld [vmem:[%s690_s1 + $0x90] sm:$0xff] }
   0x8   :  { %327 = vmatpush.bf16.msra.mxu2 %v530_v6  ;;  %v536_v15 = vld [vmem:[%s690_s1 + $0xe0] sm:$0xff]  ;;  %v535_v19 = vld [vmem:[%s690_s1 + $0xd8] sm:$0xff]  ;;  %v534_v23 = vld [vmem:[%s690_s1 + $0xd0] sm:$0xff] }
   0x9   :  { %341 = vmatpush.bf16.msra.mxu3 %v538_v7  ;;  %v509_v24 = vld [vmem:[%s690_s1 + $0x8] sm:$0xff]  ;;  %v508_v28 = vld [vmem:[%s690_s1] sm:$0xff]  ;;  %v506_v33 = vld [vmem:[%s692_s0 + $0xc] sm:$0xf0] }
   0xa   :  { %300 = vmatpush.bf16.msra.mxu0 %v513_v8  ;;  %v517_v25 = vld [vmem:[%s690_s1 + $0x48] sm:$0xff]  ;;  %v516_v29 = vld [vmem:[%s690_s1 + $0x40] sm:$0xff]  ;;  %v364_v35 = vld [vmem:[%s692_s0 + $0x10] sm:$0xf0] }
   0xb   :  { %314 = vmatpush.bf16.msra.mxu1 %v521_v9  ;;  %v525_v26 = vld [vmem:[%s690_s1 + $0x88] sm:$0xff]  ;;  %v524_v30 = vld [vmem:[%s690_s1 + $0x80] sm:$0xff]  ;;  %v507_v37 = vld [vmem:[%s692_s0 + $0x14] sm:$0xf0] }
   0xc   :  { %328 = vmatpush.bf16.msra.mxu2 %v529_v10  ;;  %v533_v27 = vld [vmem:[%s690_s1 + $0xc8] sm:$0xff]  ;;  %v532_v31 = vld [vmem:[%s690_s1 + $0xc0] sm:$0xff]  ;;  %v372_v39 = vld [vmem:[%s692_s0 + $0x18] sm:$0xf0] }
   0xd   :  { %342 = vmatpush.bf16.msra.mxu3 %v537_v11  ;;  %v362_v32 = vld [vmem:[%s692_s0] sm:$0xf]  ;;  %v504_v34 = vld [vmem:[%s692_s0 + $0x4] sm:$0xf]  ;;  %v370_v36 = vld [vmem:[%s692_s0 + $0x8] sm:$0xf] }
   0xe   :  { %301 = vmatpush.bf16.msra.mxu0 %v512_v12  ;;  %v505_v38 = vld [vmem:[%s692_s0 + $0xc] sm:$0xf]  ;;  %v363_v40 = vor.u32 %v506_v33, %v362_v32  ;;  %v367_v41 = vor.u32 %v504_v34, %v364_v35  ;;  %v371_v42 = vor.u32 %v507_v37, %v370_v36  ;;  %v540_v44 = vld [vmem:[%s691_s2] ss:$0 sm:$0xff] }
   0xf   :  { %315 = vmatpush.bf16.msra.mxu1 %v520_v13  ;;  %v375_v43 = vor.u32 %v505_v38, %v372_v39 }
  0x10   :  { %329 = vmatpush.bf16.msra.mxu2 %v528_v14 }
  0x11   :  { %343 = vmatpush.bf16.msra.mxu3 %v536_v15 }
  0x12   :  { %302 = vmatpush.bf16.msra.mxu0 %v511_v16 }
  0x13   :  { %316 = vmatpush.bf16.msra.mxu1 %v519_v17 }
  0x14   :  { %330 = vmatpush.bf16.msra.mxu2 %v527_v18 }
  0x15   :  { %344 = vmatpush.bf16.msra.mxu3 %v535_v19 }
  0x16   :  { %303 = vmatpush.bf16.msra.mxu0 %v510_v20 }
  0x17   :  { %317 = vmatpush.bf16.msra.mxu1 %v518_v21 }
  0x18   :  { %331 = vmatpush.bf16.msra.mxu2 %v526_v22 }
  0x19   :  { %345 = vmatpush.bf16.msra.mxu3 %v534_v23 }
  0x1a   :  { %304 = vmatpush.bf16.msra.mxu0 %v509_v24 }
  0x1b   :  { %318 = vmatpush.bf16.msra.mxu1 %v517_v25 }
  0x1c   :  { %332 = vmatpush.bf16.msra.mxu2 %v525_v26 }
  0x1d   :  { %346 = vmatpush.bf16.msra.mxu3 %v533_v27 }
  0x1e   :  { %305 = vmatpush.bf16.msra.mxu0 %v508_v28 }
  0x1f   :  { %319 = vmatpush.bf16.msra.mxu1 %v516_v29 }
  0x20   :  { %333 = vmatpush.bf16.msra.mxu2 %v524_v30 }
  0x21   :  { %347 = vmatpush.bf16.msra.mxu3 %v532_v31  ;;  %306 = vmatmul.bf16.vlgmr.msra.gmra.mxu0 %v363_v40 }
  0x22   :  { %320 = vmatmul.bf16.vlgmr.msra.gmra.mxu1 %v367_v41 }
  0x23   :  { %334 = vmatmul.bf16.vlgmr.msra.gmra.mxu2 %v371_v42 }
  0x24   :  { %348 = vmatmul.bf16.vlgmr.msra.gmra.mxu3 %v375_v43 }
  0x9e   :  { %v307_v45 = vpop.f32.mrf.mxu0 }
  0x9f   :  { %v308_v46 = vadd.f32 %v540_v44, %v307_v45  ;;  %v321_v47 = vpop.f32.mrf.mxu1 }
  0xa1   :  { %v322_v48 = vadd.f32 %v321_v47, %v308_v46 }
  0xa6   :  { %v335_v49 = vpop.f32.mrf.mxu2  ;;  %v309_v52 = vpop.f32.mrf.mxu0 }
  0xa7   :  { %v349_v50 = vpop.f32.mrf.mxu3  ;;  %v336_v51 = vadd.f32 %v335_v49, %v322_v48  ;;  %v310_v54 = vadd.f32 %v540_v44, %v309_v52  ;;  %v323_v55 = vpop.f32.mrf.mxu1 }
  0xa9   :  { %v350_v53 = vadd.f32 %v349_v50, %v336_v51  ;;  %v324_v56 = vadd.f32 %v323_v55, %v310_v54 }
  0xab   :  { %354 = vst [vmem:[%s693_s3] sm:$0xff] %v350_v53 }
  0xae   :  { %v337_v57 = vpop.f32.mrf.mxu2 }
  0xaf   :  { %v338_v58 = vadd.f32 %v337_v57, %v324_v56  ;;  %v351_v59 = vpop.f32.mrf.mxu3 }
  0xb1   :  { %v352_v60 = vadd.f32 %v351_v59, %v338_v58 }
  0xb3   :  { %355 = vst [vmem:[%s693_s3 + $0x8] sm:$0xff] %v352_v60 }

// kernel: forward.16
= control target key start
LH: loop header
LB: loop body
LE: loop exit
PB: predicated region body
PF: predicated region fallthrough
CT: control target
= control target key end

     0   :  { %s965_s12 = smov 0   ;;  %s967_s13 = smov 0   ;;  %s1049_s0 = inlined_call_operand.vmem [shape: bf16[4,16,512], index: 0, kind: input, shape index: {}]   ;;  %s1050_s1 = inlined_call_operand.vmem [shape: bf16[4,512,128], index: 1, kind: input, shape index: {}]   ;;  %s1051_s2 = inlined_call_operand.vmem [shape: f32[4,1,128], index: 2, kind: input, shape index: {}]   ;;  %s1052_s3 = inlined_call_operand.vmem [shape: f32[4,16,128], index: 3, kind: output, shape index: {}]  }
   0x1   :  { %s969_s14 = smov 0  }
   0x2 LB: > { %s25_s15 = sadd.s32 1, %s939_s13  ;;  %p704_p0 = scmp.ge.s32.totalorder %s943_s14, 1  ;;  %s943_s14 = sphi %s969_s14, %s13_s14   ;;  %s939_s13 = sphi %s967_s13, %s1054_s13   ;;  %s935_s12 = sphi %s965_s12, %s1053_s12  }
   0x3   : > { %p27_p1 = scmp.ge.s32.totalorder %s25_s15, 4  ;;  %p177_p2 = scmp.lt.s32.totalorder %s943_s14, 5 }
   0x5   : > { %s1056_s15 = smov (%p27_p1, %s25_s15), 0  ;;  %p178_p3 = pnand %p704_p0, %p177_p2 }
   0x6   : > { %p219_p4 = scmp.lt.s32.totalorder (!%p178_p3), %s935_s12, 3 }
   0x7   : > { %181 = sbr.rel (%p178_p3) target bundleno = 194 (0xc2), region = 32 }
   0xc   : > { %s1058_s12 = smov (!%p219_p4, %s935_s12), 3 }
   0xd   : > { %s858_s16 = sshll.u32 %s1058_s12, 8  ;;  %s236_s22 = scalar_lea.vmem %s1051_s2, %s1058_s12 }
   0xe   : > { %s989_s19 = scalar_lea.vmem %s1050_s1, %s858_s16  ;;  %s857_s23 = sshll.u32 %s1058_s12, 5  ;;  %v920_v44 = vld [vmem:[%s236_s22] ss:$0 sm:$0xff] }
   0xf   : > { %v871_v0 = vld [vmem:[%s989_s19 + $0x38] sm:$0xff]  ;;  %v870_v4 = vld [vmem:[%s989_s19 + $0x30] sm:$0xff]  ;;  %v869_v8 = vld [vmem:[%s989_s19 + $0x28] sm:$0xff]  ;;  %s227_s26 = scalar_lea.vmem %s1049_s0, %s857_s23  ;;  %s859_s29 = sshll.u32 %s1058_s12, 4 }
  0x10   : > { %v879_v1 = vld [vmem:[%s989_s19 + $0x78] sm:$0xff]  ;;  %531 = vmatpush.bf16.msra.mxu0 %v871_v0  ;;  %v878_v5 = vld [vmem:[%s989_s19 + $0x70] sm:$0xff]  ;;  %v877_v9 = vld [vmem:[%s989_s19 + $0x68] sm:$0xff]  ;;  %s245_s5 = scalar_lea.vmem %s1052_s3, %s859_s29 }
  0x11   : > { %v887_v2 = vld [vmem:[%s989_s19 + $0xb8] sm:$0xff]  ;;  %545 = vmatpush.bf16.msra.mxu1 %v879_v1  ;;  %v886_v6 = vld [vmem:[%s989_s19 + $0xb0] sm:$0xff]  ;;  %v885_v10 = vld [vmem:[%s989_s19 + $0xa8] sm:$0xff] }
  0x12   : > { %v895_v3 = vld [vmem:[%s989_s19 + $0xf8] sm:$0xff]  ;;  %559 = vmatpush.bf16.msra.mxu2 %v887_v2  ;;  %v894_v7 = vld [vmem:[%s989_s19 + $0xf0] sm:$0xff]  ;;  %v893_v11 = vld [vmem:[%s989_s19 + $0xe8] sm:$0xff] }
  0x13   : > { %573 = vmatpush.bf16.msra.mxu3 %v895_v3  ;;  %v868_v12 = vld [vmem:[%s989_s19 + $0x20] sm:$0xff]  ;;  %v867_v16 = vld [vmem:[%s989_s19 + $0x18] sm:$0xff]  ;;  %v866_v20 = vld [vmem:[%s989_s19 + $0x10] sm:$0xff] }
  0x14   : > { %532 = vmatpush.bf16.msra.mxu0 %v870_v4  ;;  %v876_v13 = vld [vmem:[%s989_s19 + $0x60] sm:$0xff]  ;;  %v875_v17 = vld [vmem:[%s989_s19 + $0x58] sm:$0xff]  ;;  %v874_v21 = vld [vmem:[%s989_s19 + $0x50] sm:$0xff] }
  0x15   : > { %546 = vmatpush.bf16.msra.mxu1 %v878_v5  ;;  %v884_v14 = vld [vmem:[%s989_s19 + $0xa0] sm:$0xff]  ;;  %v883_v18 = vld [vmem:[%s989_s19 + $0x98] sm:$0xff]  ;;  %v882_v22 = vld [vmem:[%s989_s19 + $0x90] sm:$0xff] }
  0x16   : > { %560 = vmatpush.bf16.msra.mxu2 %v886_v6  ;;  %v892_v15 = vld [vmem:[%s989_s19 + $0xe0] sm:$0xff]  ;;  %v891_v19 = vld [vmem:[%s989_s19 + $0xd8] sm:$0xff]  ;;  %v890_v23 = vld [vmem:[%s989_s19 + $0xd0] sm:$0xff] }
  0x17   : > { %574 = vmatpush.bf16.msra.mxu3 %v894_v7  ;;  %v865_v24 = vld [vmem:[%s989_s19 + $0x8] sm:$0xff]  ;;  %v864_v28 = vld [vmem:[%s989_s19] sm:$0xff]  ;;  %v862_v33 = vld [vmem:[%s227_s26 + $0xc] sm:$0xf0] }
  0x18   : > { %533 = vmatpush.bf16.msra.mxu0 %v869_v8  ;;  %v873_v25 = vld [vmem:[%s989_s19 + $0x48] sm:$0xff]  ;;  %v872_v29 = vld [vmem:[%s989_s19 + $0x40] sm:$0xff]  ;;  %v715_v35 = vld [vmem:[%s227_s26 + $0x10] sm:$0xf0] }
  0x19   : > { %547 = vmatpush.bf16.msra.mxu1 %v877_v9  ;;  %v881_v26 = vld [vmem:[%s989_s19 + $0x88] sm:$0xff]  ;;  %v880_v30 = vld [vmem:[%s989_s19 + $0x80] sm:$0xff]  ;;  %v863_v37 = vld [vmem:[%s227_s26 + $0x14] sm:$0xf0] }
  0x1a   : > { %561 = vmatpush.bf16.msra.mxu2 %v885_v10  ;;  %v889_v27 = vld [vmem:[%s989_s19 + $0xc8] sm:$0xff]  ;;  %v888_v31 = vld [vmem:[%s989_s19 + $0xc0] sm:$0xff]  ;;  %v723_v39 = vld [vmem:[%s227_s26 + $0x18] sm:$0xf0] }
  0x1b   : > { %575 = vmatpush.bf16.msra.mxu3 %v893_v11  ;;  %v713_v32 = vld [vmem:[%s227_s26] sm:$0xf]  ;;  %v860_v34 = vld [vmem:[%s227_s26 + $0x4] sm:$0xf]  ;;  %v721_v36 = vld [vmem:[%s227_s26 + $0x8] sm:$0xf] }
  0x1c   : > { %534 = vmatpush.bf16.msra.mxu0 %v868_v12  ;;  %v861_v38 = vld [vmem:[%s227_s26 + $0xc] sm:$0xf]  ;;  %v714_v40 = vor.u32 %v862_v33, %v713_v32  ;;  %v718_v41 = vor.u32 %v860_v34, %v715_v35  ;;  %v722_v42 = vor.u32 %v863_v37, %v721_v36 }
  0x1d   : > { %548 = vmatpush.bf16.msra.mxu1 %v876_v13  ;;  %v726_v43 = vor.u32 %v861_v38, %v723_v39 }
  0x1e   : > { %562 = vmatpush.bf16.msra.mxu2 %v884_v14 }
  0x1f   : > { %576 = vmatpush.bf16.msra.mxu3 %v892_v15 }
  0x20   : > { %535 = vmatpush.bf16.msra.mxu0 %v867_v16 }
  0x21   : > { %549 = vmatpush.bf16.msra.mxu1 %v875_v17 }
  0x22   : > { %563 = vmatpush.bf16.msra.mxu2 %v883_v18 }
  0x23   : > { %577 = vmatpush.bf16.msra.mxu3 %v891_v19 }
  0x24   : > { %536 = vmatpush.bf16.msra.mxu0 %v866_v20 }
  0x25   : > { %550 = vmatpush.bf16.msra.mxu1 %v874_v21 }
  0x26   : > { %564 = vmatpush.bf16.msra.mxu2 %v882_v22 }
  0x27   : > { %578 = vmatpush.bf16.msra.mxu3 %v890_v23 }
  0x28   : > { %537 = vmatpush.bf16.msra.mxu0 %v865_v24 }
  0x29   : > { %551 = vmatpush.bf16.msra.mxu1 %v873_v25 }
  0x2a   : > { %565 = vmatpush.bf16.msra.mxu2 %v881_v26 }
  0x2b   : > { %579 = vmatpush.bf16.msra.mxu3 %v889_v27 }
  0x2c   : > { %538 = vmatpush.bf16.msra.mxu0 %v864_v28 }
  0x2d   : > { %552 = vmatpush.bf16.msra.mxu1 %v872_v29 }
  0x2e   : > { %566 = vmatpush.bf16.msra.mxu2 %v880_v30 }
  0x2f   : > { %580 = vmatpush.bf16.msra.mxu3 %v888_v31  ;;  %539 = vmatmul.bf16.vlgmr.msra.gmra.mxu0 %v714_v40 }
  0x30   : > { %553 = vmatmul.bf16.vlgmr.msra.gmra.mxu1 %v718_v41 }
  0x31   : > { %567 = vmatmul.bf16.vlgmr.msra.gmra.mxu2 %v722_v42 }
  0x32   : > { %581 = vmatmul.bf16.vlgmr.msra.gmra.mxu3 %v726_v43 }
  0xac   : > { %v540_v45 = vpop.f32.mrf.mxu0 }
  0xad   : > { %v541_v46 = vadd.f32 %v920_v44, %v540_v45  ;;  %v554_v47 = vpop.f32.mrf.mxu1 }
  0xaf   : > { %v555_v48 = vadd.f32 %v554_v47, %v541_v46 }
  0xb4   : > { %v568_v49 = vpop.f32.mrf.mxu2  ;;  %v542_v52 = vpop.f32.mrf.mxu0 }
  0xb5   : > { %v582_v50 = vpop.f32.mrf.mxu3  ;;  %v569_v51 = vadd.f32 %v568_v49, %v555_v48  ;;  %v543_v54 = vadd.f32 %v920_v44, %v542_v52  ;;  %v556_v55 = vpop.f32.mrf.mxu1 }
  0xb7   : > { %v583_v53 = vadd.f32 %v582_v50, %v569_v51  ;;  %v557_v56 = vadd.f32 %v556_v55, %v543_v54 }
  0xb9   : > { %587 = vst [vmem:[%s245_s5] sm:$0xff] %v583_v53 }
  0xbc   : > { %v570_v57 = vpop.f32.mrf.mxu2 }
  0xbd   : > { %v571_v58 = vadd.f32 %v570_v57, %v557_v56  ;;  %v584_v59 = vpop.f32.mrf.mxu3 }
  0xbf   : > { %v585_v60 = vadd.f32 %v584_v59, %v571_v58 }
  0xc1   : > { %588 = vst [vmem:[%s245_s5 + $0x8] sm:$0xff] %v585_v60 }
  0xc2 PF: > { %s13_s14 = sadd.s32 1, %s943_s14   ;;  %s1053_s12 = smov %s939_s13 }
  0xc3   : > { %p10_p5 = scmp.ge.s32.totalorder %s13_s14, 6   ;;  %s1054_s13 = smov %s1056_s15 }
  0xc5   :  { %12 = sbr.rel (!%p10_p5) target bundleno = 2 (0x2), region = 68 }

// kernel: forward.17
= control target key start
LH: loop header
LB: loop body
LE: loop exit
PB: predicated region body
PF: predicated region fallthrough
CT: control target
= control target key end

     0   :  { %s757_s12 = smov 0   ;;  %s759_s13 = smov 0   ;;  %s828_s0 = inlined_call_operand.vmem [shape: bf16[4,32,256], index: 0, kind: input, shape index: {}]   ;;  %s829_s1 = inlined_call_operand.vmem [shape: bf16[4,256,128], index: 1, kind: input, shape index: {}]   ;;  %s830_s2 = inlined_call_operand.vmem [shape: f32[4,1,128], index: 2, kind: input, shape index: {}]   ;;  %s831_s3 = inlined_call_operand.vmem [shape: f32[4,32,128], index: 3, kind: output, shape index: {}]  }
   0x1   :  { %s761_s14 = smov 0  }
   0x2 LB: > { %s25_s15 = sadd.s32 1, %s731_s13  ;;  %p560_p0 = scmp.ge.s32.totalorder %s735_s14, 1  ;;  %s735_s14 = sphi %s761_s14, %s13_s14   ;;  %s731_s13 = sphi %s759_s13, %s833_s13   ;;  %s727_s12 = sphi %s757_s12, %s832_s12  }
   0x3   : > { %p27_p1 = scmp.ge.s32.totalorder %s25_s15, 4  ;;  %p177_p2 = scmp.lt.s32.totalorder %s735_s14, 5 }
   0x5   : > { %s835_s15 = smov (%p27_p1, %s25_s15), 0  ;;  %p178_p3 = pnand %p560_p0, %p177_p2 }
   0x6   : > { %p219_p4 = scmp.lt.s32.totalorder (!%p178_p3), %s727_s12, 3 }
   0x7   : > { %181 = sbr.rel (%p178_p3) target bundleno = 192 (0xc0), region = 32 }
   0xc   : > { %s837_s12 = smov (!%p219_p4, %s727_s12), 3 }
   0xd   : > { %s650_s16 = sshll.u32 %s837_s12, 7  ;;  %s236_s22 = scalar_lea.vmem %s830_s2, %s837_s12 }
   0xe   : > { %s781_s19 = scalar_lea.vmem %s829_s1, %s650_s16  ;;  %s649_s23 = sshll.u32 %s837_s12, 5  ;;  %v712_v28 = vld [vmem:[%s236_s22] ss:$0 sm:$0xff] }
   0xf   : > { %v663_v0 = vld [vmem:[%s781_s19 + $0x38] sm:$0xff]  ;;  %v662_v2 = vld [vmem:[%s781_s19 + $0x30] sm:$0xff]  ;;  %v661_v4 = vld [vmem:[%s781_s19 + $0x28] sm:$0xff]  ;;  %s227_s26 = scalar_lea.vmem %s828_s0, %s649_s23  ;;  %s245_s4 = scalar_lea.vmem %s831_s3, %s649_s23 }
  0x10   : > { %v671_v1 = vld [vmem:[%s781_s19 + $0x78] sm:$0xff]  ;;  %403 = vmatpush.bf16.msra.mxu0 %v663_v0  ;;  %672 = vmatpush.bf16.msra.mxu2 %v663_v0  ;;  %v670_v3 = vld [vmem:[%s781_s19 + $0x70] sm:$0xff]  ;;  %v669_v5 = vld [vmem:[%s781_s19 + $0x68] sm:$0xff] }
  0x11   : > { %422 = vmatpush.bf16.msra.mxu1 %v671_v1  ;;  %680 = vmatpush.bf16.msra.mxu3 %v671_v1  ;;  %v660_v6 = vld [vmem:[%s781_s19 + $0x20] sm:$0xff]  ;;  %v659_v8 = vld [vmem:[%s781_s19 + $0x18] sm:$0xff]  ;;  %v658_v10 = vld [vmem:[%s781_s19 + $0x10] sm:$0xff] }
  0x12   : > { %v668_v7 = vld [vmem:[%s781_s19 + $0x60] sm:$0xff]  ;;  %v667_v9 = vld [vmem:[%s781_s19 + $0x58] sm:$0xff]  ;;  %v666_v11 = vld [vmem:[%s781_s19 + $0x50] sm:$0xff] }
  0x13   : > { %v657_v12 = vld [vmem:[%s781_s19 + $0x8] sm:$0xff]  ;;  %v656_v14 = vld [vmem:[%s781_s19] sm:$0xff]  ;;  %v577_v18 = vld [vmem:[%s227_s26 + $0x10] sm:$0xf] }
  0x14   : > { %404 = vmatpush.bf16.msra.mxu0 %v662_v2  ;;  %673 = vmatpush.bf16.msra.mxu2 %v662_v2  ;;  %v665_v13 = vld [vmem:[%s781_s19 + $0x48] sm:$0xff]  ;;  %v664_v15 = vld [vmem:[%s781_s19 + $0x40] sm:$0xff]  ;;  %v655_v19 = vld [vmem:[%s227_s26 + $0x14] sm:$0xf0] }
  0x15   : > { %423 = vmatpush.bf16.msra.mxu1 %v670_v3  ;;  %681 = vmatpush.bf16.msra.mxu3 %v670_v3  ;;  %v569_v16 = vld [vmem:[%s227_s26] sm:$0xf]  ;;  %v653_v17 = vld [vmem:[%s227_s26 + $0x4] sm:$0xf0]  ;;  %v652_v20 = vld [vmem:[%s227_s26 + $0x4] sm:$0xf]  ;;  %v578_v25 = vor.u32 %v655_v19, %v577_v18 }
  0x16   : > { %v571_v21 = vld [vmem:[%s227_s26 + $0x8] sm:$0xf0]  ;;  %v654_v22 = vld [vmem:[%s227_s26 + $0x14] sm:$0xf]  ;;  %v579_v23 = vld [vmem:[%s227_s26 + $0x18] sm:$0xf0]  ;;  %v570_v24 = vor.u32 %v653_v17, %v569_v16 }
  0x17   : > { %v574_v26 = vor.u32 %v652_v20, %v571_v21  ;;  %v582_v27 = vor.u32 %v654_v22, %v579_v23 }
  0x18   : > { %405 = vmatpush.bf16.msra.mxu0 %v661_v4  ;;  %674 = vmatpush.bf16.msra.mxu2 %v661_v4 }
  0x19   : > { %424 = vmatpush.bf16.msra.mxu1 %v669_v5  ;;  %682 = vmatpush.bf16.msra.mxu3 %v669_v5 }
  0x1c   : > { %406 = vmatpush.bf16.msra.mxu0 %v660_v6  ;;  %675 = vmatpush.bf16.msra.mxu2 %v660_v6 }
  0x1d   : > { %425 = vmatpush.bf16.msra.mxu1 %v668_v7  ;;  %683 = vmatpush.bf16.msra.mxu3 %v668_v7 }
  0x20   : > { %407 = vmatpush.bf16.msra.mxu0 %v659_v8  ;;  %676 = vmatpush.bf16.msra.mxu2 %v659_v8 }
  0x21   : > { %426 = vmatpush.bf16.msra.mxu1 %v667_v9  ;;  %684 = vmatpush.bf16.msra.mxu3 %v667_v9 }
  0x24   : > { %408 = vmatpush.bf16.msra.mxu0 %v658_v10  ;;  %677 = vmatpush.bf16.msra.mxu2 %v658_v10 }
  0x25   : > { %427 = vmatpush.bf16.msra.mxu1 %v666_v11  ;;  %685 = vmatpush.bf16.msra.mxu3 %v666_v11 }
  0x28   : > { %409 = vmatpush.bf16.msra.mxu0 %v657_v12  ;;  %678 = vmatpush.bf16.msra.mxu2 %v657_v12 }
  0x29   : > { %428 = vmatpush.bf16.msra.mxu1 %v665_v13  ;;  %686 = vmatpush.bf16.msra.mxu3 %v665_v13 }
  0x2c   : > { %410 = vmatpush.bf16.msra.mxu0 %v656_v14  ;;  %679 = vmatpush.bf16.msra.mxu2 %v656_v14 }
  0x2d   : > { %429 = vmatpush.bf16.msra.mxu1 %v664_v15  ;;  %687 = vmatpush.bf16.msra.mxu3 %v664_v15 }
  0x2f   : > { %411 = vmatmul.bf16.vlgmr.msra.gmra.mxu0 %v570_v24  ;;  %416 = vmatmul.bf16.vlgmr.msra.gmra.mxu2 %v578_v25 }
  0x30   : > { %430 = vmatmul.bf16.vlgmr.msra.gmra.mxu1 %v574_v26  ;;  %435 = vmatmul.bf16.vlgmr.msra.gmra.mxu3 %v582_v27 }
  0xac   : > { %v412_v29 = vpop.f32.mrf.mxu0 }
  0xad   : > { %v413_v30 = vadd.f32 %v712_v28, %v412_v29  ;;  %v431_v31 = vpop.f32.mrf.mxu1 }
  0xaf   : > { %v432_v32 = vadd.f32 %v431_v31, %v413_v30 }
  0xb1   : > { %441 = vst [vmem:[%s245_s4] sm:$0xff] %v432_v32 }
  0xb2   : > { %v417_v33 = vpop.f32.mrf.mxu2 }
  0xb3   : > { %v418_v34 = vadd.f32 %v712_v28, %v417_v33  ;;  %v436_v35 = vpop.f32.mrf.mxu3 }
  0xb4   : > { %v414_v36 = vpop.f32.mrf.mxu0 }
  0xb5   : > { %v437_v37 = vadd.f32 %v436_v35, %v418_v34  ;;  %v415_v38 = vadd.f32 %v712_v28, %v414_v36  ;;  %v433_v39 = vpop.f32.mrf.mxu1 }
  0xb7   : > { %443 = vst [vmem:[%s245_s4 + $0x10] sm:$0xff] %v437_v37  ;;  %v434_v40 = vadd.f32 %v433_v39, %v415_v38 }
  0xb9   : > { %442 = vst [vmem:[%s245_s4 + $0x8] sm:$0xff] %v434_v40 }
  0xba   : > { %v419_v41 = vpop.f32.mrf.mxu2 }
  0xbb   : > { %v420_v42 = vadd.f32 %v712_v28, %v419_v41  ;;  %v438_v43 = vpop.f32.mrf.mxu3 }
  0xbd   : > { %v439_v44 = vadd.f32 %v438_v43, %v420_v42 }
  0xbf   : > { %444 = vst [vmem:[%s245_s4 + $0x18] sm:$0xff] %v439_v44 }
  0xc0 PF: > { %s13_s14 = sadd.s32 1, %s735_s14   ;;  %s832_s12 = smov %s731_s13 }
  0xc1   : > { %p10_p5 = scmp.ge.s32.totalorder %s13_s14, 6   ;;  %s833_s13 = smov %s835_s15 }
  0xc3   :  { %12 = sbr.rel (!%p10_p5) target bundleno = 2 (0x2), region = 68 }

// kernel: forward.18
= control target key start
LH: loop header
LB: loop body
LE: loop exit
PB: predicated region body
PF: predicated region fallthrough
CT: control target
= control target key end

     0   :  { %s738_s12 = smov 0   ;;  %s740_s13 = smov 0   ;;  %s819_s0 = inlined_call_operand.vmem [shape: bf16[4,128,128], index: 0, kind: input, shape index: {}]   ;;  %s820_s1 = inlined_call_operand.vmem [shape: bf16[4,128,128], index: 1, kind: input, shape index: {}]   ;;  %s821_s2 = inlined_call_operand.vmem [shape: f32[4,1,128], index: 2, kind: input, shape index: {}]   ;;  %s822_s3 = inlined_call_operand.vmem [shape: f32[4,128,128], index: 3, kind: output, shape index: {}]  }
   0x1   :  { %s742_s14 = smov 0  }
   0x2 LB: > { %s25_s15 = sadd.s32 1, %s712_s13  ;;  %p553_p0 = scmp.ge.s32.totalorder %s716_s14, 1  ;;  %s716_s14 = sphi %s742_s14, %s13_s14   ;;  %s712_s13 = sphi %s740_s13, %s824_s13   ;;  %s708_s12 = sphi %s738_s12, %s823_s12  }
   0x3   : > { %p27_p1 = scmp.ge.s32.totalorder %s25_s15, 4  ;;  %p176_p2 = scmp.lt.s32.totalorder %s716_s14, 5 }
   0x5   : > { %s826_s15 = smov (%p27_p1, %s25_s15), 0  ;;  %p177_p3 = pnand %p553_p0, %p176_p2 }
   0x6   : > { %p217_p4 = scmp.lt.s32.totalorder (!%p177_p3), %s708_s12, 3 }
   0x7   : > { %180 = sbr.rel (%p177_p3) target bundleno = 208 (0xd0), region = 32 }
   0xc   : > { %s828_s12 = smov (!%p217_p4, %s708_s12), 3 }
   0xd   : > { %s626_s16 = sshll.u32 %s828_s12, 6  ;;  %s233_s19 = scalar_lea.vmem %s821_s2, %s828_s12 }
   0xe   : > { %s768_s22 = scalar_lea.vmem %s820_s1, %s626_s16  ;;  %s224_s25 = scalar_lea.vmem %s819_s0, %s626_s16  ;;  %v693_v16 = vld [vmem:[%s233_s19] ss:$0 sm:$0xff] }
   0xf   : > { %v644_v0 = vld [vmem:[%s768_s22 + $0x38] sm:$0xff]  ;;  %v643_v1 = vld [vmem:[%s768_s22 + $0x30] sm:$0xff]  ;;  %v642_v2 = vld [vmem:[%s768_s22 + $0x28] sm:$0xff]  ;;  %s628_s28 = sshll.u32 %s828_s12, 7 }
  0x10   : > { %376 = vmatpush.bf16.msra.mxu0 %v644_v0  ;;  %645 = vmatpush.bf16.msra.mxu1 %v644_v0  ;;  %v641_v3 = vld [vmem:[%s768_s22 + $0x20] sm:$0xff]  ;;  %v640_v4 = vld [vmem:[%s768_s22 + $0x18] sm:$0xff]  ;;  %v639_v5 = vld [vmem:[%s768_s22 + $0x10] sm:$0xff]  ;;  %s792_s4 = scalar_lea.vmem %s822_s3, %s628_s28 }
  0x11   : > { %646 = vmatpush.bf16.msra.mxu2 %v644_v0  ;;  %647 = vmatpush.bf16.msra.mxu3 %v644_v0  ;;  %v638_v6 = vld [vmem:[%s768_s22 + $0x8] sm:$0xff]  ;;  %v637_v7 = vld [vmem:[%s768_s22] sm:$0xff]  ;;  %v631_v9 = vld [vmem:[%s224_s25 + $0x10] sm:$0xff] }
  0x12   : > { %v629_v8 = vld [vmem:[%s224_s25] sm:$0xff]  ;;  %v635_v11 = vld [vmem:[%s224_s25 + $0x30] sm:$0xff]  ;;  %v630_v12 = vld [vmem:[%s224_s25 + $0x8] sm:$0xff] }
  0x13   : > { %v633_v10 = vld [vmem:[%s224_s25 + $0x20] sm:$0xff]  ;;  %v632_v13 = vld [vmem:[%s224_s25 + $0x18] sm:$0xff]  ;;  %v634_v14 = vld [vmem:[%s224_s25 + $0x28] sm:$0xff] }
  0x14   : > { %377 = vmatpush.bf16.msra.mxu0 %v643_v1  ;;  %648 = vmatpush.bf16.msra.mxu1 %v643_v1  ;;  %v636_v15 = vld [vmem:[%s224_s25 + $0x38] sm:$0xff] }
  0x15   : > { %649 = vmatpush.bf16.msra.mxu2 %v643_v1  ;;  %650 = vmatpush.bf16.msra.mxu3 %v643_v1 }
  0x18   : > { %378 = vmatpush.bf16.msra.mxu0 %v642_v2  ;;  %651 = vmatpush.bf16.msra.mxu1 %v642_v2 }
  0x19   : > { %652 = vmatpush.bf16.msra.mxu2 %v642_v2  ;;  %653 = vmatpush.bf16.msra.mxu3 %v642_v2 }
  0x1c   : > { %379 = vmatpush.bf16.msra.mxu0 %v641_v3  ;;  %654 = vmatpush.bf16.msra.mxu1 %v641_v3 }
  0x1d   : > { %655 = vmatpush.bf16.msra.mxu2 %v641_v3  ;;  %656 = vmatpush.bf16.msra.mxu3 %v641_v3 }
  0x20   : > { %380 = vmatpush.bf16.msra.mxu0 %v640_v4  ;;  %657 = vmatpush.bf16.msra.mxu1 %v640_v4 }
  0x21   : > { %658 = vmatpush.bf16.msra.mxu2 %v640_v4  ;;  %659 = vmatpush.bf16.msra.mxu3 %v640_v4 }
  0x24   : > { %381 = vmatpush.bf16.msra.mxu0 %v639_v5  ;;  %660 = vmatpush.bf16.msra.mxu1 %v639_v5 }
  0x25   : > { %661 = vmatpush.bf16.msra.mxu2 %v639_v5  ;;  %662 = vmatpush.bf16.msra.mxu3 %v639_v5 }
  0x28   : > { %382 = vmatpush.bf16.msra.mxu0 %v638_v6  ;;  %663 = vmatpush.bf16.msra.mxu1 %v638_v6 }
  0x29   : > { %664 = vmatpush.bf16.msra.mxu2 %v638_v6  ;;  %665 = vmatpush.bf16.msra.mxu3 %v638_v6 }
  0x2c   : > { %383 = vmatpush.bf16.msra.mxu0 %v637_v7  ;;  %666 = vmatpush.bf16.msra.mxu1 %v637_v7 }
  0x2d   : > { %667 = vmatpush.bf16.msra.mxu2 %v637_v7  ;;  %668 = vmatpush.bf16.msra.mxu3 %v637_v7 }
  0x2f   : > { %384 = vmatmul.bf16.vlgmr.msra.gmra.mxu0 %v629_v8  ;;  %394 = vmatmul.bf16.vlgmr.msra.gmra.mxu1 %v631_v9 }
  0x30   : > { %404 = vmatmul.bf16.vlgmr.msra.gmra.mxu2 %v633_v10  ;;  %414 = vmatmul.bf16.vlgmr.msra.gmra.mxu3 %v635_v11 }
  0x3f   : > { %389 = vmatmul.bf16.gmra.mxu0 %v630_v12  ;;  %399 = vmatmul.bf16.gmra.mxu1 %v632_v13 }
  0x40   : > { %409 = vmatmul.bf16.gmra.mxu2 %v634_v14  ;;  %419 = vmatmul.bf16.gmra.mxu3 %v636_v15 }
  0xac   : > { %v385_v17 = vpop.f32.mrf.mxu0  ;;  %v395_v18 = vpop.f32.mrf.mxu1 }
  0xad   : > { %v386_v19 = vadd.f32 %v693_v16, %v385_v17  ;;  %v396_v20 = vadd.f32 %v693_v16, %v395_v18 }
  0xaf   : > { %425 = vst [vmem:[%s792_s4] sm:$0xff] %v386_v19 }
  0xb0   : > { %429 = vst [vmem:[%s792_s4 + $0x20] sm:$0xff] %v396_v20 }
  0xb3   : > { %v405_v21 = vpop.f32.mrf.mxu2  ;;  %v415_v22 = vpop.f32.mrf.mxu3 }
  0xb4   : > { %v406_v23 = vadd.f32 %v693_v16, %v405_v21  ;;  %v416_v24 = vadd.f32 %v693_v16, %v415_v22  ;;  %v387_v25 = vpop.f32.mrf.mxu0  ;;  %v397_v26 = vpop.f32.mrf.mxu1 }
  0xb5   : > { %v388_v27 = vadd.f32 %v693_v16, %v387_v25  ;;  %v398_v28 = vadd.f32 %v693_v16, %v397_v26 }
  0xb6   : > { %433 = vst [vmem:[%s792_s4 + $0x40] sm:$0xff] %v406_v23 }
  0xb7   : > { %437 = vst [vmem:[%s792_s4 + $0x60] sm:$0xff] %v416_v24 }
  0xb8   : > { %426 = vst [vmem:[%s792_s4 + $0x8] sm:$0xff] %v388_v27 }
  0xb9   : > { %430 = vst [vmem:[%s792_s4 + $0x28] sm:$0xff] %v398_v28 }
  0xbb   : > { %v407_v29 = vpop.f32.mrf.mxu2  ;;  %v417_v30 = vpop.f32.mrf.mxu3 }
  0xbc   : > { %v408_v31 = vadd.f32 %v693_v16, %v407_v29  ;;  %v418_v32 = vadd.f32 %v693_v16, %v417_v30  ;;  %v390_v33 = vpop.f32.mrf.mxu0  ;;  %v400_v34 = vpop.f32.mrf.mxu1 }
  0xbd   : > { %v391_v35 = vadd.f32 %v693_v16, %v390_v33  ;;  %v401_v36 = vadd.f32 %v693_v16, %v400_v34 }
  0xbe   : > { %434 = vst [vmem:[%s792_s4 + $0x48] sm:$0xff] %v408_v31 }
  0xbf   : > { %438 = vst [vmem:[%s792_s4 + $0x68] sm:$0xff] %v418_v32 }
  0xc0   : > { %427 = vst [vmem:[%s792_s4 + $0x10] sm:$0xff] %v391_v35 }
  0xc1   : > { %431 = vst [vmem:[%s792_s4 + $0x30] sm:$0xff] %v401_v36 }
  0xc3   : > { %v410_v37 = vpop.f32.mrf.mxu2  ;;  %v420_v38 = vpop.f32.mrf.mxu3 }
  0xc4   : > { %v411_v39 = vadd.f32 %v693_v16, %v410_v37  ;;  %v421_v40 = vadd.f32 %v693_v16, %v420_v38  ;;  %v392_v41 = vpop.f32.mrf.mxu0  ;;  %v402_v42 = vpop.f32.mrf.mxu1 }
  0xc5   : > { %v393_v43 = vadd.f32 %v693_v16, %v392_v41  ;;  %v403_v44 = vadd.f32 %v693_v16, %v402_v42 }
  0xc6   : > { %435 = vst [vmem:[%s792_s4 + $0x50] sm:$0xff] %v411_v39 }
  0xc7   : > { %439 = vst [vmem:[%s792_s4 + $0x70] sm:$0xff] %v421_v40 }
  0xc8   : > { %428 = vst [vmem:[%s792_s4 + $0x18] sm:$0xff] %v393_v43 }
  0xc9   : > { %432 = vst [vmem:[%s792_s4 + $0x38] sm:$0xff] %v403_v44 }
  0xcb   : > { %v412_v45 = vpop.f32.mrf.mxu2  ;;  %v422_v46 = vpop.f32.mrf.mxu3 }
  0xcc   : > { %v413_v47 = vadd.f32 %v693_v16, %v412_v45  ;;  %v423_v48 = vadd.f32 %v693_v16, %v422_v46 }
  0xce   : > { %436 = vst [vmem:[%s792_s4 + $0x58] sm:$0xff] %v413_v47 }
  0xcf   : > { %440 = vst [vmem:[%s792_s4 + $0x78] sm:$0xff] %v423_v48 }
  0xd0 PF: > { %s13_s14 = sadd.s32 1, %s716_s14   ;;  %s823_s12 = smov %s712_s13 }
  0xd1   : > { %p10_p5 = scmp.ge.s32.totalorder %s13_s14, 6   ;;  %s824_s13 = smov %s826_s15 }
  0xd3   :  { %12 = sbr.rel (!%p10_p5) target bundleno = 2 (0x2), region = 68 }

// kernel: forward.19
= control target key start
LH: loop header
LB: loop body
LE: loop exit
PB: predicated region body
PF: predicated region fallthrough
CT: control target
= control target key end

     0   :  { %s2790_s12 = smov 0   ;;  %s2792_s13 = smov 0   ;;  %s3936_s0 = inlined_call_operand.vmem [shape: bf16[4,512,64], index: 0, kind: input, shape index: {}]   ;;  %s3937_s1 = inlined_call_operand.vmem [shape: bf16[4,64,128], index: 1, kind: input, shape index: {}]   ;;  %s3938_s2 = inlined_call_operand.vmem [shape: f32[4,1,128], index: 2, kind: input, shape index: {}]   ;;  %s3939_s3 = inlined_call_operand.vmem [shape: f32[4,512,128], index: 3, kind: output, shape index: {}]  }
   0x1   :  { %s2794_s14 = smov 0  }
   0x2 LB: > { %s25_s15 = sadd.s32 1, %s2764_s13  ;;  %p2163_p0 = scmp.ge.s32.totalorder %s2768_s14, 1  ;;  %s2768_s14 = sphi %s2794_s14, %s13_s14   ;;  %s2764_s13 = sphi %s2792_s13, %s4033_s13   ;;  %s2760_s12 = sphi %s2790_s12, %s4032_s12  }
   0x3   : > { %p27_p1 = scmp.ge.s32.totalorder %s25_s15, 4  ;;  %p176_p2 = scmp.lt.s32.totalorder %s2768_s14, 5 }
   0x5   : > { %s4035_s15 = smov (%p27_p1, %s25_s15), 0  ;;  %p177_p3 = pnand %p2163_p0, %p176_p2 }
   0x6   : > { %p217_p4 = scmp.lt.s32.totalorder (!%p177_p3), %s2760_s12, 3 }
   0x7   : > { %180 = sbr.rel (%p177_p3) target bundleno = 443 (0x1bb), region = 32 }
   0xc   : > { %s4037_s12 = smov (!%p217_p4, %s2760_s12), 3  ;;  %vm505_vm0 = vcmask 523264  }
   0xd   : > { %s2413_s16 = sshll.u32 %s4037_s12, 5  ;;  %s2818_s22 = scalar_lea.vmem %s3938_s2, %s4037_s12 }
   0xe   : > { %s230_s19 = scalar_lea.vmem %s3937_s1, %s2413_s16  ;;  %s2412_s23 = sshll.u32 %s4037_s12, 8  ;;  %v2891_v36 = vld [vmem:[%s2818_s22] ss:$0 sm:$0xff] }
   0xf   : > { %v2450_v0 = vld [vmem:[%s230_s19 + $0x18] sm:$0xff]  ;;  %v2449_v1 = vld [vmem:[%s230_s19 + $0x10] sm:$0xff]  ;;  %v2448_v2 = vld [vmem:[%s230_s19 + $0x8] sm:$0xff]  ;;  %s2824_s26 = scalar_lea.vmem %s3936_s0, %s2412_s23  ;;  %s2414_s27 = sshll.u32 %s4037_s12, 9 }
  0x10   : > { %606 = vmatpush.bf16.msra.mxu0 %v2450_v0  ;;  %2451 = vmatpush.bf16.msra.mxu1 %v2450_v0  ;;  %v2447_v3 = vld [vmem:[%s230_s19] sm:$0xff]  ;;  %v2416_v8 = vld [vmem:[%s2824_s26 + $0x8] sm:$0xff]  ;;  %v2417_v12 = vld [vmem:[%s2824_s26 + $0x10] sm:$0xff]  ;;  %s2946_s30 = scalar_lea.vmem %s3939_s3, %s2414_s27 }
  0x11   : > { %2452 = vmatpush.bf16.msra.mxu2 %v2450_v0  ;;  %2453 = vmatpush.bf16.msra.mxu3 %v2450_v0  ;;  %v2415_v4 = vld [vmem:[%s2824_s26] sm:$0xff]  ;;  %v2424_v9 = vld [vmem:[%s2824_s26 + $0x48] sm:$0xff]  ;;  %v2425_v13 = vld [vmem:[%s2824_s26 + $0x50] sm:$0xff] }
  0x12   : > { %v2423_v5 = vld [vmem:[%s2824_s26 + $0x40] sm:$0xff]  ;;  %v2432_v10 = vld [vmem:[%s2824_s26 + $0x88] sm:$0xff]  ;;  %v2433_v14 = vld [vmem:[%s2824_s26 + $0x90] sm:$0xff] }
  0x13   : > { %v2431_v6 = vld [vmem:[%s2824_s26 + $0x80] sm:$0xff]  ;;  %v2440_v11 = vld [vmem:[%s2824_s26 + $0xc8] sm:$0xff]  ;;  %v2441_v15 = vld [vmem:[%s2824_s26 + $0xd0] sm:$0xff] }
  0x14   : > { %607 = vmatpush.bf16.msra.mxu0 %v2449_v1  ;;  %2454 = vmatpush.bf16.msra.mxu1 %v2449_v1  ;;  %v2439_v7 = vld [vmem:[%s2824_s26 + $0xc0] sm:$0xff]  ;;  %v2418_v16 = vld [vmem:[%s2824_s26 + $0x18] sm:$0xff]  ;;  %v2420_v24 = vld [vmem:[%s2824_s26 + $0x28] sm:$0xff] }
  0x15   : > { %2455 = vmatpush.bf16.msra.mxu2 %v2449_v1  ;;  %2456 = vmatpush.bf16.msra.mxu3 %v2449_v1  ;;  %v2426_v17 = vld [vmem:[%s2824_s26 + $0x58] sm:$0xff]  ;;  %v2419_v20 = vld [vmem:[%s2824_s26 + $0x20] sm:$0xff]  ;;  %v2428_v25 = vld [vmem:[%s2824_s26 + $0x68] sm:$0xff] }
  0x16   : > { %v2434_v18 = vld [vmem:[%s2824_s26 + $0x98] sm:$0xff]  ;;  %v2427_v21 = vld [vmem:[%s2824_s26 + $0x60] sm:$0xff]  ;;  %v2436_v26 = vld [vmem:[%s2824_s26 + $0xa8] sm:$0xff] }
  0x17   : > { %v2442_v19 = vld [vmem:[%s2824_s26 + $0xd8] sm:$0xff]  ;;  %v2435_v22 = vld [vmem:[%s2824_s26 + $0xa0] sm:$0xff]  ;;  %v2444_v27 = vld [vmem:[%s2824_s26 + $0xe8] sm:$0xff] }
  0x18   : > { %608 = vmatpush.bf16.msra.mxu0 %v2448_v2  ;;  %2457 = vmatpush.bf16.msra.mxu1 %v2448_v2  ;;  %v2443_v23 = vld [vmem:[%s2824_s26 + $0xe0] sm:$0xff]  ;;  %v2421_v28 = vld [vmem:[%s2824_s26 + $0x30] sm:$0xff]  ;;  %v2422_v32 = vld [vmem:[%s2824_s26 + $0x38] sm:$0xff] }
  0x19   : > { %2458 = vmatpush.bf16.msra.mxu2 %v2448_v2  ;;  %2459 = vmatpush.bf16.msra.mxu3 %v2448_v2  ;;  %v2429_v29 = vld [vmem:[%s2824_s26 + $0x70] sm:$0xff]  ;;  %v2430_v33 = vld [vmem:[%s2824_s26 + $0x78] sm:$0xff] }
  0x1a   : > { %v2437_v30 = vld [vmem:[%s2824_s26 + $0xb0] sm:$0xff]  ;;  %v2438_v34 = vld [vmem:[%s2824_s26 + $0xb8] sm:$0xff] }
  0x1b   : > { %v2445_v31 = vld [vmem:[%s2824_s26 + $0xf0] sm:$0xff]  ;;  %v2446_v35 = vld [vmem:[%s2824_s26 + $0xf8] sm:$0xff] }
  0x1c   : > { %609 = vmatpush.bf16.msra.mxu0 %v2447_v3  ;;  %2460 = vmatpush.bf16.msra.mxu1 %v2447_v3 }
  0x1d   : > { %2461 = vmatpush.bf16.msra.mxu2 %v2447_v3  ;;  %2462 = vmatpush.bf16.msra.mxu3 %v2447_v3 }
  0x1f   : > { %2314 = vmatmul.msk.bf16.vlgmr.msra.gmra.mxu0 %vm505_vm0, %v2415_v4  ;;  %2322 = vmatmul.msk.bf16.vlgmr.msra.gmra.mxu1 %vm505_vm0, %v2423_v5 }
  0x20   : > { %2330 = vmatmul.msk.bf16.vlgmr.msra.gmra.mxu2 %vm505_vm0, %v2431_v6  ;;  %2338 = vmatmul.msk.bf16.vlgmr.msra.gmra.mxu3 %vm505_vm0, %v2439_v7 }
  0x2f   : > { %2315 = vmatmul.msk.bf16.gmra.mxu0 %vm505_vm0, %v2416_v8  ;;  %2323 = vmatmul.msk.bf16.gmra.mxu1 %vm505_vm0, %v2424_v9 }
  0x30   : > { %2331 = vmatmul.msk.bf16.gmra.mxu2 %vm505_vm0, %v2432_v10  ;;  %2339 = vmatmul.msk.bf16.gmra.mxu3 %vm505_vm0, %v2440_v11 }
  0x3f   : > { %2316 = vmatmul.msk.bf16.gmra.mxu0 %vm505_vm0, %v2417_v12  ;;  %2324 = vmatmul.msk.bf16.gmra.mxu1 %vm505_vm0, %v2425_v13 }
  0x40   : > { %2332 = vmatmul.msk.bf16.gmra.mxu2 %vm505_vm0, %v2433_v14  ;;  %2340 = vmatmul.msk.bf16.gmra.mxu3 %vm505_vm0, %v2441_v15 }
  0x4f   : > { %2317 = vmatmul.msk.bf16.gmra.mxu0 %vm505_vm0, %v2418_v16  ;;  %2325 = vmatmul.msk.bf16.gmra.mxu1 %vm505_vm0, %v2426_v17 }
  0x50   : > { %2333 = vmatmul.msk.bf16.gmra.mxu2 %vm505_vm0, %v2434_v18  ;;  %2341 = vmatmul.msk.bf16.gmra.mxu3 %vm505_vm0, %v2442_v19 }
  0x5f   : > { %2318 = vmatmul.msk.bf16.gmra.mxu0 %vm505_vm0, %v2419_v20  ;;  %2326 = vmatmul.msk.bf16.gmra.mxu1 %vm505_vm0, %v2427_v21 }
  0x60   : > { %2334 = vmatmul.msk.bf16.gmra.mxu2 %vm505_vm0, %v2435_v22  ;;  %2342 = vmatmul.msk.bf16.gmra.mxu3 %vm505_vm0, %v2443_v23 }
  0x6f   : > { %2319 = vmatmul.msk.bf16.gmra.mxu0 %vm505_vm0, %v2420_v24  ;;  %2327 = vmatmul.msk.bf16.gmra.mxu1 %vm505_vm0, %v2428_v25 }
  0x70   : > { %2335 = vmatmul.msk.bf16.gmra.mxu2 %vm505_vm0, %v2436_v26  ;;  %2343 = vmatmul.msk.bf16.gmra.mxu3 %vm505_vm0, %v2444_v27 }
  0x7f   : > { %2320 = vmatmul.msk.bf16.gmra.mxu0 %vm505_vm0, %v2421_v28  ;;  %2328 = vmatmul.msk.bf16.gmra.mxu1 %vm505_vm0, %v2429_v29 }
  0x80   : > { %2336 = vmatmul.msk.bf16.gmra.mxu2 %vm505_vm0, %v2437_v30  ;;  %2344 = vmatmul.msk.bf16.gmra.mxu3 %vm505_vm0, %v2445_v31 }
  0x8f   : > { %2321 = vmatmul.msk.bf16.gmra.mxu0 %vm505_vm0, %v2422_v32  ;;  %2329 = vmatmul.msk.bf16.gmra.mxu1 %vm505_vm0, %v2430_v33 }
  0x90   : > { %2337 = vmatmul.msk.bf16.gmra.mxu2 %vm505_vm0, %v2438_v34  ;;  %2345 = vmatmul.msk.bf16.gmra.mxu3 %vm505_vm0, %v2446_v35 }
  0x9c   : > { %v611_v37 = vpop.f32.mrf.mxu0  ;;  %v651_v38 = vpop.f32.mrf.mxu1 }
  0x9d   : > { %v612_v39 = vadd.f32 %v2891_v36, %v611_v37  ;;  %v652_v40 = vadd.f32 %v2891_v36, %v651_v38 }
  0x9f   : > { %v2346_v41 = vmul.f32 -1.442695, %v612_v39  ;;  %v2362_v42 = vmul.f32 -1.442695, %v652_v40 }
  0xa1   : > { %2488 = vpow2.f32 %v2346_v41 }
  0xa2   : > { %2490 = vpow2.f32 %v2362_v42 }
  0xa3   : > { %v691_v43 = vpop.f32.mrf.mxu2  ;;  %v731_v44 = vpop.f32.mrf.mxu3 }
  0xa4   : > { %v692_v45 = vadd.f32 %v2891_v36, %v691_v43  ;;  %v732_v46 = vadd.f32 %v2891_v36, %v731_v44  ;;  %v613_v47 = vpop.f32.mrf.mxu0  ;;  %v653_v48 = vpop.f32.mrf.mxu1 }
  0xa5   : > { %v614_v49 = vadd.f32 %v2891_v36, %v613_v47  ;;  %v654_v50 = vadd.f32 %v2891_v36, %v653_v48 }
  0xa6   : > { %v2378_v51 = vmul.f32 -1.442695, %v692_v45  ;;  %v2394_v52 = vmul.f32 -1.442695, %v732_v46 }
  0xa7   : > { %v2489_v53 = vpop.eup %2488  ;;  %v2347_v56 = vmul.f32 -1.442695, %v614_v49  ;;  %v2363_v58 = vmul.f32 -1.442695, %v654_v50 }
  0xa8   : > { %v2491_v54 = vpop.eup %2490  ;;  %v2899_v55 = vadd.f32 1.0, %v2489_v53  ;;  %2492 = vpow2.f32 %v2378_v51 }
  0xa9   : > { %v2901_v57 = vadd.f32 1.0, %v2491_v54  ;;  %2494 = vpow2.f32 %v2394_v52 }
  0xaa   : > { %2496 = vrcp.f32 %v2899_v55  ;;  %v1036_v62 = vand.u32 2147483647, %v2899_v55  ;;  %v1038_v63 = vand.u32 2147483648, %v2899_v55  ;;  %vm1032_vm1 = vweird.f32 %v2899_v55 }
  0xab   : > { %2498 = vrcp.f32 %v2901_v57  ;;  %v693_v59 = vpop.f32.mrf.mxu2  ;;  %v733_v60 = vpop.f32.mrf.mxu3  ;;  %v1276_v2 = vand.u32 2147483647, %v2901_v57  ;;  %v1278_v6 = vand.u32 2147483648, %v2901_v57  ;;  %vm1272_vm2 = vweird.f32 %v2901_v57 }
  0xac   : > { %2500 = vpow2.f32 %v2347_v56  ;;  %v694_v61 = vadd.f32 %v2891_v36, %v693_v59  ;;  %v616_v0 = vpop.f32.mrf.mxu0  ;;  %v734_v4 = vadd.f32 %v2891_v36, %v733_v60  ;;  %v656_v11 = vpop.f32.mrf.mxu1  ;;  %vm2919_vm3 = vcmp.eq.f32.partialorder %v1036_v62, 8.507059e+37 }
  0xad   : > { %2502 = vpow2.f32 %v2363_v58  ;;  %v617_v10 = vadd.f32 %v2891_v36, %v616_v0  ;;  %v1039_v15 = vor.u32 1.1754944e-38, %v1038_v63  ;;  %vm2925_vm4 = vcmp.eq.f32.partialorder %v1276_v2, 8.507059e+37 }
  0xae   : > { %v2493_v1 = vpop.eup %2492  ;;  %v2379_v3 = vmul.f32 -1.442695, %v694_v61  ;;  %v2395_v19 = vmul.f32 -1.442695, %v734_v4  ;;  %v1279_v22 = vor.u32 1.1754944e-38, %v1278_v6  ;;  %v657_v23 = vadd.f32 %v2891_v36, %v656_v11 }
  0xaf   : > { %v2495_v5 = vpop.eup %2494  ;;  %v2911_v7 = vadd.f32 1.0, %v2493_v1  ;;  %v2348_v26 = vmul.f32 -1.442695, %v617_v10 }
  0xb0   : > { %v2497_v8 = vpop.eup %2496  ;;  %v2915_v9 = vadd.f32 1.0, %v2495_v5  ;;  %v2941_v37 = vmul.f32 -1.442695, %v657_v23 }
  0xb1   : > { %v2499_v12 = vpop.eup %2498  ;;  %v1028_v13 = vmul.f32 %v2497_v8, %v2899_v55  ;;  %2504 = vrcp.f32 %v2911_v7  ;;  %vm1033_vm5 = vweird.f32 %v2497_v8  ;;  %v1516_v25 = vand.u32 2147483647, %v2911_v7 }
  0xb2   : > { %v2501_v16 = vpop.eup %2500  ;;  %v1268_v17 = vmul.f32 %v2499_v12, %v2901_v57  ;;  %2506 = vpow2.f32 %v2379_v3  ;;  %v1518_v28 = vand.u32 2147483648, %v2911_v7  ;;  %vm1273_vm6 = vweird.f32 %v2499_v12  ;;  %vm1034_vm7 = vmor %vm1032_vm1, %vm1033_vm5 }
  0xb3   : > { %v2503_v20 = vpop.eup %2502  ;;  %v1029_v21 = vsub.f32 1.0, %v1028_v13  ;;  %2508 = vrcp.f32 %v2915_v9  ;;  %v2934_v29 = vadd.f32 1.0, %v2501_v16  ;;  %v1756_v32 = vand.u32 2147483647, %v2915_v9  ;;  %v696_v41 = vpop.f32.mrf.mxu2  ;;  %vm1274_vm10 = vmor %vm1272_vm2, %vm1273_vm6 }
  0xb4   : > { %v1269_v24 = vsub.f32 1.0, %v1268_v17  ;;  %v2936_v30 = vadd.f32 1.0, %v2503_v20  ;;  %2510 = vpow2.f32 %v2395_v19  ;;  %v1758_v35 = vand.u32 2147483648, %v2915_v9  ;;  %v736_v4 = vpop.f32.mrf.mxu3  ;;  %v618_v23 = vpop.f32.mrf.mxu0 }
  0xb5   : > { %v1030_v27 = vmul.f32 %v2497_v8, %v1029_v21  ;;  %2512 = vrcp.f32 %v2934_v29  ;;  %vm1512_vm8 = vweird.f32 %v2911_v7  ;;  %vm1752_vm9 = vweird.f32 %v2915_v9 }
  0xb6   : > { %v1270_v31 = vmul.f32 %v2499_v12, %v1269_v24  ;;  %vm2957_vm11 = vcmp.eq.f32.partialorder %v1516_v25, 8.507059e+37  ;;  %v1519_v45 = vor.u32 1.1754944e-38, %v1518_v28  ;;  %2514 = vrcp.f32 %v2936_v30 }
  0xb7   : > { %v2505_v33 = vpop.eup %2504  ;;  %v1031_v34 = vadd.f32 %v2497_v8, %v1030_v27  ;;  %vm2965_vm12 = vcmp.eq.f32.partialorder %v1756_v32, 8.507059e+37  ;;  %v1759_v52 = vor.u32 1.1754944e-38, %v1758_v35  ;;  %v1051_v53 = vand.u32 2147483647, %v2934_v29 }
  0xb8   : > { %v2507_v38 = vpop.eup %2506  ;;  %v1271_v39 = vadd.f32 %v2499_v12, %v1270_v31  ;;  %v1508_v40 = vmul.f32 %v2505_v33, %v2911_v7  ;;  %v697_v54 = vadd.f32 %v2891_v36, %v696_v41  ;;  %vm1513_vm13 = vweird.f32 %v2505_v33  ;;  %v658_v41 = vpop.f32.mrf.mxu1 }
  0xb9   : > { %v2509_v42 = vpop.eup %2508  ;;  %v1035_v43 = vsel %vm1034_vm7, %v2497_v8, %v1031_v34  ;;  %v2975_v58 = vadd.f32 1.0, %v2507_v38  ;;  %vm1047_vm15 = vweird.f32 %v2934_v29  ;;  %v1053_v60 = vand.u32 2147483648, %v2934_v29  ;;  %vm1514_vm0 = vmor %vm1512_vm8, %vm1513_vm13 }
  0xba   : > { %v1040_v46 = vsel %vm2919_vm3, %v1039_v15, %v1035_v43  ;;  %v1275_v47 = vsel %vm1274_vm10, %v2499_v12, %v1271_v39  ;;  %v1509_v48 = vsub.f32 1.0, %v1508_v40  ;;  %v1748_v49 = vmul.f32 %v2509_v42, %v2915_v9  ;;  %v2511_v55 = vpop.eup %2510 }
  0xbb   : > { %1987 = vst [vmem:[%s2946_s30] sm:$0xff] %v1040_v46  ;;  %v1280_v51 = vsel %vm2925_vm4, %v1279_v22, %v1275_v47  ;;  %v2513_v59 = vpop.eup %2512  ;;  %vm1753_vm14 = vweird.f32 %v2509_v42  ;;  %2516 = vpow2.f32 %v2348_v26  ;;  %v2980_v0 = vadd.f32 1.0, %v2511_v55 }
  0xbc   : > { %2003 = vst [vmem:[%s2946_s30 + $0x80] sm:$0xff] %v1280_v51  ;;  %v1510_v56 = vmul.f32 %v2505_v33, %v1509_v48  ;;  %v1749_v57 = vsub.f32 1.0, %v1748_v49  ;;  %v1043_v63 = vmul.f32 %v2513_v59, %v2934_v29  ;;  %v2515_v1 = vpop.eup %2514  ;;  %vm2984_vm1 = vcmp.eq.f32.partialorder %v1051_v53, 8.507059e+37  ;;  %vm1754_vm3 = vmor %vm1752_vm9, %vm1753_vm14 }
  0xbd   : > { %vm1287_vm2 = vweird.f32 %v2936_v30  ;;  %v1291_v3 = vand.u32 2147483647, %v2936_v30  ;;  %2518 = vrcp.f32 %v2975_v58  ;;  %v1283_v10 = vmul.f32 %v2515_v1, %v2936_v30 }
  0xbe   : > { %v1511_v61 = vadd.f32 %v2505_v33, %v1510_v56  ;;  %v1750_v62 = vmul.f32 %v2509_v42, %v1749_v57  ;;  %v1044_v8 = vsub.f32 1.0, %v1043_v63  ;;  %vm1048_vm4 = vweird.f32 %v2513_v59 }
  0xbf   : > { %v1293_v11 = vand.u32 2147483648, %v2936_v30  ;;  %v1531_v12 = vand.u32 2147483647, %v2975_v58  ;;  %v1284_v15 = vsub.f32 1.0, %v1283_v10  ;;  %2520 = vrcp.f32 %v2980_v0  ;;  %vm1049_vm7 = vmor %vm1047_vm15, %vm1048_vm4 }
  0xc0   : > { %v1515_v5 = vsel %vm1514_vm0, %v2505_v33, %v1511_v61  ;;  %v1751_v6 = vadd.f32 %v2509_v42, %v1750_v62  ;;  %v1045_v14 = vmul.f32 %v2513_v59, %v1044_v8  ;;  %v1054_v18 = vor.u32 1.1754944e-38, %v1053_v60 }
  0xc1   : > { %v1520_v7 = vsel %vm2957_vm11, %v1519_v45, %v1515_v5  ;;  %v2517_v16 = vpop.eup %2516  ;;  %vm3003_vm5 = vcmp.eq.f32.partialorder %v1291_v3, 8.507059e+37  ;;  %v1533_v9 = vand.u32 2147483648, %v2975_v58  ;;  %v1285_v21 = vmul.f32 %v2515_v1, %v1284_v15  ;;  %v738_v45 = vpop.f32.mrf.mxu3 }
  0xc2   : > { %2019 = vst [vmem:[%s2946_s30 + $0x100] sm:$0xff] %v1520_v7  ;;  %v1755_v13 = vsel %vm1754_vm3, %v2509_v42, %v1751_v6  ;;  %v1046_v20 = vadd.f32 %v2513_v59, %v1045_v14  ;;  %vm1288_vm6 = vweird.f32 %v2515_v1  ;;  %v3009_v22 = vadd.f32 1.0, %v2517_v16  ;;  %v698_v42 = vpop.f32.mrf.mxu2 }
  0xc3   : > { %v1760_v17 = vsel %vm2965_vm12, %v1759_v52, %v1755_v13  ;;  %v2519_v24 = vpop.eup %2518  ;;  %v1294_v25 = vor.u32 1.1754944e-38, %v1293_v11  ;;  %vm1527_vm8 = vweird.f32 %v2975_v58  ;;  %2522 = vpow2.f32 %v2941_v37  ;;  %vm1289_vm10 = vmor %vm1287_vm2, %vm1288_vm6 }
  0xc4   : > { %2035 = vst [vmem:[%s2946_s30 + $0x180] sm:$0xff] %v1760_v17  ;;  %v2380_v26 = vmul.f32 -1.442695, %v697_v54  ;;  %v1050_v27 = vsel %vm1049_vm7, %v2513_v59, %v1046_v20  ;;  %v1286_v28 = vadd.f32 %v2515_v1, %v1285_v21  ;;  %v1523_v31 = vmul.f32 %v2519_v24, %v2975_v58  ;;  %v621_v21 = vpop.f32.mrf.mxu0 }
  0xc5   : > { %vm3017_vm9 = vcmp.eq.f32.partialorder %v1531_v12, 8.507059e+37  ;;  %v737_v33 = vadd.f32 %v2891_v36, %v736_v4  ;;  %v1055_v29 = vsel %vm2984_vm1, %v1054_v18, %v1050_v27  ;;  %v1534_v34 = vor.u32 1.1754944e-38, %v1533_v9  ;;  %v2521_v37 = vpop.eup %2520 }
  0xc6   : > { %2524 = vrcp.f32 %v3009_v22  ;;  %v619_v35 = vadd.f32 %v2891_v36, %v618_v23  ;;  %1988 = vst [vmem:[%s2946_s30 + $0x8] sm:$0xff] %v1055_v29  ;;  %v1290_v38 = vsel %vm1289_vm10, %v2515_v1, %v1286_v28  ;;  %v1524_v39 = vsub.f32 1.0, %v1523_v31 }
  0xc7   : > { %vm1767_vm11 = vweird.f32 %v2980_v0  ;;  %v1771_v40 = vand.u32 2147483647, %v2980_v0  ;;  %v1295_v30 = vsel %vm3003_vm5, %v1294_v25, %v1290_v38  ;;  %v1763_v43 = vmul.f32 %v2521_v37, %v2980_v0 }
  0xc8   : > { %v1773_v44 = vand.u32 2147483648, %v2980_v0  ;;  %2526 = vpow2.f32 %v2380_v26  ;;  %2004 = vst [vmem:[%s2946_s30 + $0x88] sm:$0xff] %v1295_v30  ;;  %v1525_v46 = vmul.f32 %v2519_v24, %v1524_v39  ;;  %vm1528_vm12 = vweird.f32 %v2519_v24 }
  0xc9   : > { %vm1768_vm13 = vweird.f32 %v2521_v37  ;;  %v2396_v47 = vmul.f32 -1.442695, %v737_v33  ;;  %v2523_v48 = vpop.eup %2522  ;;  %v1764_v49 = vsub.f32 1.0, %v1763_v43  ;;  %v2349_v50 = vmul.f32 -1.442695, %v619_v35  ;;  %vm1529_vm14 = vmor %vm1527_vm8, %vm1528_vm12 }
  0xca   : > { %v659_v51 = vadd.f32 %v2891_v36, %v658_v41  ;;  %v699_v52 = vadd.f32 %v2891_v36, %v698_v42  ;;  %v1526_v53 = vadd.f32 %v2519_v24, %v1525_v46  ;;  %v3039_v54 = vadd.f32 1.0, %v2523_v48  ;;  %vm1769_vm1 = vmor %vm1767_vm11, %vm1768_vm13 }
  0xcb   : > { %2528 = vpow2.f32 %v2396_v47  ;;  %v739_v55 = vadd.f32 %v2891_v36, %v738_v45  ;;  %v1765_v57 = vmul.f32 %v2521_v37, %v1764_v49  ;;  %vm3044_vm15 = vcmp.eq.f32.partialorder %v1771_v40, 8.507059e+37 }
  0xcc   : > { %v2525_v56 = vpop.eup %2524  ;;  %2530 = vpow2.f32 %v2349_v50  ;;  %v2365_v59 = vmul.f32 -1.442695, %v659_v51  ;;  %v2381_v60 = vmul.f32 -1.442695, %v699_v52  ;;  %v1530_v61 = vsel %vm1529_vm14, %v2519_v24, %v1526_v53 }
  0xcd   : > { %v1058_v63 = vmul.f32 %v2525_v56, %v3009_v22  ;;  %2532 = vrcp.f32 %v3039_v54  ;;  %v1535_v2 = vsel %vm3017_vm9, %v1534_v34, %v1530_v61  ;;  %v1766_v3 = vadd.f32 %v2521_v37, %v1765_v57 }
  0xce   : > { %v2527_v1 = vpop.eup %2526  ;;  %v1774_v58 = vor.u32 1.1754944e-38, %v1773_v44  ;;  %vm1062_vm0 = vweird.f32 %v3009_v22  ;;  %2020 = vst [vmem:[%s2946_s30 + $0x108] sm:$0xff] %v1535_v2  ;;  %v1066_v5 = vand.u32 2147483647, %v3009_v22  ;;  %2534 = vpow2.f32 %v2365_v59 }
  0xcf   : > { %v1059_v4 = vsub.f32 1.0, %v1058_v63  ;;  %v3058_v6 = vadd.f32 1.0, %v2527_v1  ;;  %v1770_v8 = vsel %vm1769_vm1, %v2521_v37, %v1766_v3  ;;  %v1068_v10 = vand.u32 2147483648, %v3009_v22 }
  0xd0   : > { %2536 = vpow2.f32 %v2381_v60  ;;  %v2397_v7 = vmul.f32 -1.442695, %v739_v55  ;;  %v1775_v12 = vsel %vm3044_vm15, %v1774_v58, %v1770_v8  ;;  %vm1063_vm2 = vweird.f32 %v2525_v56 }
  0xd1   : > { %v2529_v11 = vpop.eup %2528  ;;  %v1060_v13 = vmul.f32 %v2525_v56, %v1059_v4  ;;  %2538 = vrcp.f32 %v3058_v6  ;;  %2036 = vst [vmem:[%s2946_s30 + $0x188] sm:$0xff] %v1775_v12  ;;  %v1306_v14 = vand.u32 2147483647, %v3039_v54  ;;  %v1308_v18 = vand.u32 2147483648, %v3039_v54  ;;  %vm1064_vm3 = vmor %vm1062_vm0, %vm1063_vm2 }
  0xd2   : > { %v2531_v0 = vpop.eup %2530  ;;  %v3066_v15 = vadd.f32 1.0, %v2529_v11  ;;  %2540 = vpow2.f32 %v2397_v7  ;;  %vm1067_vm4 = vcmp.eq.f32.partialorder %v1066_v5, 8.507059e+37  ;;  %v1069_v9 = vor.u32 1.1754944e-38, %v1068_v10  ;;  %v701_v5 = vpop.f32.mrf.mxu2 }
  0xd3   : > { %v2533_v16 = vpop.eup %2532  ;;  %v1061_v17 = vadd.f32 %v2525_v56, %v1060_v13  ;;  %v3069_v19 = vadd.f32 1.0, %v2531_v0  ;;  %v1546_v25 = vand.u32 2147483647, %v3058_v6  ;;  %v1548_v26 = vand.u32 2147483648, %v3058_v6 }
  0xd4   : > { %v1298_v20 = vmul.f32 %v2533_v16, %v3039_v54  ;;  %v2535_v23 = vpop.eup %2534  ;;  %2542 = vrcp.f32 %v3066_v15  ;;  %vm1302_vm5 = vweird.f32 %v3039_v54  ;;  %vm3080_vm6 = vcmp.eq.f32.partialorder %v1306_v14, 8.507059e+37  ;;  %v661_v54 = vpop.f32.mrf.mxu1 }
  0xd5   : > { %v1065_v24 = vsel %vm1064_vm3, %v2525_v56, %v1061_v17  ;;  %2544 = vrcp.f32 %v3069_v19  ;;  %v1309_v33 = vor.u32 1.1754944e-38, %v1308_v18  ;;  %vm1542_vm7 = vweird.f32 %v3058_v6 }
  0xd6   : > { %v2537_v27 = vpop.eup %2536  ;;  %v1070_v28 = vsel %vm1067_vm4, %v1069_v9, %v1065_v24  ;;  %v1299_v31 = vsub.f32 1.0, %v1298_v20  ;;  %v622_v29 = vadd.f32 %v2891_v36, %v621_v21  ;;  %vm1303_vm8 = vweird.f32 %v2533_v16 }
  0xd7   : > { %v2539_v22 = vpop.eup %2538  ;;  %1989 = vst [vmem:[%s2946_s30 + $0x10] sm:$0xff] %v1070_v28  ;;  %v1786_v37 = vand.u32 2147483647, %v3066_v15  ;;  %vm3088_vm9 = vcmp.eq.f32.partialorder %v1546_v25, 8.507059e+37  ;;  %v1549_v40 = vor.u32 1.1754944e-38, %v1548_v26  ;;  %v1788_v41 = vand.u32 2147483648, %v3066_v15  ;;  %vm1304_vm11 = vmor %vm1302_vm5, %vm1303_vm8  ;;  %v741_v26 = vpop.f32.mrf.mxu3 }
  0xd8   : > { %v1300_v34 = vmul.f32 %v2533_v16, %v1299_v31  ;;  %v1538_v35 = vmul.f32 %v2539_v22, %v3058_v6  ;;  %v2541_v38 = vpop.eup %2540  ;;  %v3093_v42 = vadd.f32 1.0, %v2535_v23  ;;  %vm1782_vm10 = vweird.f32 %v3066_v15 }
  0xd9   : > { %v3096_v44 = vadd.f32 1.0, %v2537_v27  ;;  %vm1543_vm12 = vweird.f32 %v2539_v22  ;;  %vm1077_vm13 = vweird.f32 %v3069_v19  ;;  %v1081_v46 = vand.u32 2147483647, %v3069_v19  ;;  %v623_v27 = vpop.f32.mrf.mxu0 }
  0xda   : > { %v1301_v30 = vadd.f32 %v2533_v16, %v1300_v34  ;;  %v1539_v43 = vsub.f32 1.0, %v1538_v35  ;;  %v2543_v45 = vpop.eup %2542  ;;  %v1083_v47 = vand.u32 2147483648, %v3069_v19  ;;  %2546 = vrcp.f32 %v3093_v42  ;;  %vm1544_vm15 = vmor %vm1542_vm7, %vm1543_vm12 }
  0xdb   : > { %v2545_v48 = vpop.eup %2544  ;;  %v1778_v51 = vmul.f32 %v2543_v45, %v3066_v15  ;;  %vm3105_vm14 = vcmp.eq.f32.partialorder %v1786_v37, 8.507059e+37  ;;  %v3109_v53 = vadd.f32 1.0, %v2541_v38  ;;  %v1789_v56 = vor.u32 1.1754944e-38, %v1788_v41 }
  0xdc   : > { %v1305_v49 = vsel %vm1304_vm11, %v2533_v16, %v1301_v30  ;;  %v1540_v50 = vmul.f32 %v2539_v22, %v1539_v43  ;;  %v1073_v57 = vmul.f32 %v2545_v48, %v3069_v19  ;;  %v1321_v59 = vand.u32 2147483647, %v3093_v42 }
  0xdd   : > { %v1310_v55 = vsel %vm3080_vm6, %v1309_v33, %v1305_v49  ;;  %v1779_v61 = vsub.f32 1.0, %v1778_v51  ;;  %v1323_v62 = vand.u32 2147483648, %v3093_v42  ;;  %2548 = vrcp.f32 %v3096_v44  ;;  %v663_v33 = vpop.f32.mrf.mxu1  ;;  %v703_v49 = vpop.f32.mrf.mxu2 }
  0xde   : > { %2005 = vst [vmem:[%s2946_s30 + $0x90] sm:$0xff] %v1310_v55  ;;  %v1541_v60 = vadd.f32 %v2539_v22, %v1540_v50  ;;  %v1074_v63 = vsub.f32 1.0, %v1073_v57  ;;  %vm3121_vm0 = vcmp.eq.f32.partialorder %v1081_v46, 8.507059e+37  ;;  %v1084_v2 = vor.u32 1.1754944e-38, %v1083_v47 }
  0xdf   : > { %v2350_v3 = vmul.f32 -1.442695, %v622_v29  ;;  %v1780_v4 = vmul.f32 %v2543_v45, %v1779_v61  ;;  %vm1783_vm1 = vweird.f32 %v2543_v45  ;;  %2550 = vrcp.f32 %v3109_v53  ;;  %v743_v1 = vpop.f32.mrf.mxu3 }
  0xe0   : > { %v1545_v58 = vsel %vm1544_vm15, %v2539_v22, %v1541_v60  ;;  %v2547_v8 = vpop.eup %2546  ;;  %v1075_v6 = vmul.f32 %v2545_v48, %v1074_v63  ;;  %vm1078_vm2 = vweird.f32 %v2545_v48  ;;  %vm1317_vm3 = vweird.f32 %v3093_v42  ;;  %vm1784_vm5 = vmor %vm1782_vm10, %vm1783_vm1 }
  0xe1   : > { %v1550_v10 = vsel %vm3088_vm9, %v1549_v40, %v1545_v58  ;;  %v1781_v7 = vadd.f32 %v2543_v45, %v1780_v4  ;;  %v1313_v11 = vmul.f32 %v2547_v8, %v3093_v42  ;;  %vm3131_vm4 = vcmp.eq.f32.partialorder %v1321_v59, 8.507059e+37  ;;  %vm1079_vm7 = vmor %vm1077_vm13, %vm1078_vm2  ;;  %v626_v4 = vpop.f32.mrf.mxu0 }
  0xe2   : > { %2021 = vst [vmem:[%s2946_s30 + $0x110] sm:$0xff] %v1550_v10  ;;  %v1324_v13 = vor.u32 1.1754944e-38, %v1323_v62  ;;  %v1561_v0 = vand.u32 2147483647, %v3096_v44  ;;  %v1076_v14 = vadd.f32 %v2545_v48, %v1075_v6  ;;  %vm1557_vm6 = vweird.f32 %v3096_v44 }
  0xe3   : > { %v1563_v16 = vand.u32 2147483648, %v3096_v44  ;;  %2552 = vpow2.f32 %v2350_v3  ;;  %v662_v17 = vadd.f32 %v2891_v36, %v661_v54  ;;  %v2549_v18 = vpop.eup %2548  ;;  %v1785_v9 = vsel %vm1784_vm5, %v2543_v45, %v1781_v7 }
  0xe4   : > { %v1314_v20 = vsub.f32 1.0, %v1313_v11  ;;  %vm1318_vm8 = vweird.f32 %v2547_v8  ;;  %v702_v15 = vadd.f32 %v2891_v36, %v701_v5  ;;  %v1790_v21 = vsel %vm3105_vm14, %v1789_v56, %v1785_v9 }
  0xe5   : > { %v1080_v23 = vsel %vm1079_vm7, %v2545_v48, %v1076_v14  ;;  %v1553_v24 = vmul.f32 %v2549_v18, %v3096_v44  ;;  %vm1797_vm9 = vweird.f32 %v3109_v53  ;;  %v1801_v25 = vand.u32 2147483647, %v3109_v53  ;;  %v2551_v28 = vpop.eup %2550  ;;  %2037 = vst [vmem:[%s2946_s30 + $0x190] sm:$0xff] %v1790_v21  ;;  %vm1319_vm11 = vmor %vm1317_vm3, %vm1318_vm8 }
  0xe6   : > { %v1085_v19 = vsel %vm3121_vm0, %v1084_v2, %v1080_v23  ;;  %v1315_v31 = vmul.f32 %v2547_v8, %v1314_v20  ;;  %v1803_v22 = vand.u32 2147483648, %v3109_v53  ;;  %v2366_v32 = vmul.f32 -1.442695, %v662_v17 }
  0xe7   : > { %1990 = vst [vmem:[%s2946_s30 + $0x18] sm:$0xff] %v1085_v19  ;;  %v1554_v29 = vsub.f32 1.0, %v1553_v24  ;;  %vm1558_vm10 = vweird.f32 %v2549_v18  ;;  %v1793_v34 = vmul.f32 %v2551_v28, %v3109_v53  ;;  %v2382_v35 = vmul.f32 -1.442695, %v702_v15 }
  0xe8   : > { %v1316_v37 = vadd.f32 %v2547_v8, %v1315_v31  ;;  %2554 = vpow2.f32 %v2366_v32  ;;  %v742_v38 = vadd.f32 %v2891_v36, %v741_v26  ;;  %v624_v39 = vadd.f32 %v2891_v36, %v623_v27  ;;  %vm1559_vm13 = vmor %vm1557_vm6, %vm1558_vm10 }
  0xe9   : > { %v2553_v40 = vpop.eup %2552  ;;  %v1555_v41 = vmul.f32 %v2549_v18, %v1554_v29  ;;  %v1794_v30 = vsub.f32 1.0, %v1793_v34  ;;  %2556 = vpow2.f32 %v2382_v35  ;;  %v664_v43 = vadd.f32 %v2891_v36, %v663_v33 }
  0xea   : > { %v1320_v45 = vsel %vm1319_vm11, %v2547_v8, %v1316_v37  ;;  %v3162_v46 = vadd.f32 1.0, %v2553_v40  ;;  %v2398_v47 = vmul.f32 -1.442695, %v742_v38  ;;  %v2351_v48 = vmul.f32 -1.442695, %v624_v39 }
  0xeb   : > { %v1325_v50 = vsel %vm3131_vm4, %v1324_v13, %v1320_v45  ;;  %v1556_v51 = vadd.f32 %v2549_v18, %v1555_v41  ;;  %v1795_v52 = vmul.f32 %v2551_v28, %v1794_v30  ;;  %vm1798_vm12 = vweird.f32 %v2551_v28 }
  0xec   : > { %2006 = vst [vmem:[%s2946_s30 + $0x98] sm:$0xff] %v1325_v50  ;;  %vm1562_vm14 = vcmp.eq.f32.partialorder %v1561_v0, 8.507059e+37  ;;  %v1564_v42 = vor.u32 1.1754944e-38, %v1563_v16  ;;  %2558 = vrcp.f32 %v3162_v46  ;;  %v2367_v54 = vmul.f32 -1.442695, %v664_v43  ;;  %vm1799_vm15 = vmor %vm1797_vm9, %vm1798_vm12  ;;  %v3224_v43 = vpop.f32.mrf.mxu1 }
  0xed   : > { %v1560_v55 = vsel %vm1559_vm13, %v2549_v18, %v1556_v51  ;;  %v1796_v56 = vadd.f32 %v2551_v28, %v1795_v52  ;;  %2560 = vpow2.f32 %v2398_v47  ;;  %v704_v57 = vadd.f32 %v2891_v36, %v703_v49 }
  0xee   : > { %v2555_v59 = vpop.eup %2554  ;;  %v1565_v60 = vsel %vm1562_vm14, %v1564_v42, %v1560_v55  ;;  %v1804_v61 = vor.u32 1.1754944e-38, %v1803_v22  ;;  %2562 = vpow2.f32 %v2351_v48  ;;  %vm1802_vm0 = vcmp.eq.f32.partialorder %v1801_v25, 8.507059e+37 }
  0xef   : > { %v2557_v44 = vpop.eup %2556  ;;  %2022 = vst [vmem:[%s2946_s30 + $0x118] sm:$0xff] %v1565_v60  ;;  %v1800_v62 = vsel %vm1799_vm15, %v2551_v28, %v1796_v56  ;;  %v3175_v63 = vadd.f32 1.0, %v2555_v59  ;;  %2564 = vpow2.f32 %v2367_v54  ;;  %v2383_v58 = vmul.f32 -1.442695, %v704_v57  ;;  %v706_v59 = vpop.f32.mrf.mxu2 }
  0xf0   : > { %v1805_v2 = vsel %vm1802_vm0, %v1804_v61, %v1800_v62  ;;  %v3177_v3 = vadd.f32 1.0, %v2557_v44  ;;  %v1096_v5 = vand.u32 2147483647, %v3162_v46  ;;  %v1098_v8 = vand.u32 2147483648, %v3162_v46 }
  0xf1   : > { %2038 = vst [vmem:[%s2946_s30 + $0x198] sm:$0xff] %v1805_v2  ;;  %2566 = vrcp.f32 %v3175_v63  ;;  %v744_v10 = vadd.f32 %v2891_v36, %v743_v1  ;;  %vm1092_vm1 = vweird.f32 %v3162_v46  ;;  %v1336_v11 = vand.u32 2147483647, %v3175_v63 }
  0xf2   : > { %v2559_v53 = vpop.eup %2558  ;;  %2568 = vrcp.f32 %v3177_v3  ;;  %v627_v12 = vadd.f32 %v2891_v36, %v626_v4  ;;  %v1338_v0 = vand.u32 2147483648, %v3175_v63  ;;  %v1578_v14 = vand.u32 2147483648, %v3177_v3 }
  0xf3   : > { %v2561_v6 = vpop.eup %2560  ;;  %v1088_v7 = vmul.f32 %v2559_v53, %v3162_v46  ;;  %2570 = vpow2.f32 %v2383_v58  ;;  %vm3193_vm2 = vcmp.eq.f32.partialorder %v1096_v5, 8.507059e+37  ;;  %v1576_v9 = vand.u32 2147483647, %v3177_v3 }
  0xf4   : > { %v2563_v13 = vpop.eup %2562  ;;  %v3191_v16 = vadd.f32 1.0, %v2561_v6  ;;  %v1099_v21 = vor.u32 1.1754944e-38, %v1098_v8  ;;  %vm1332_vm3 = vweird.f32 %v3175_v63  ;;  %v2399_v36 = vmul.f32 -1.442695, %v744_v10  ;;  %v746_v10 = vpop.f32.mrf.mxu3 }
  0xf5   : > { %v1089_v17 = vsub.f32 1.0, %v1088_v7  ;;  %v3198_v20 = vadd.f32 1.0, %v2563_v13  ;;  %v2565_v15 = vpop.eup %2564  ;;  %vm1093_vm4 = vweird.f32 %v2559_v53  ;;  %vm1572_vm5 = vweird.f32 %v3177_v3 }
  0xf6   : > { %2572 = vrcp.f32 %v3191_v16  ;;  %v2352_v25 = vmul.f32 -1.442695, %v627_v12  ;;  %vm3205_vm6 = vcmp.eq.f32.partialorder %v1336_v11, 8.507059e+37  ;;  %v1339_v19 = vor.u32 1.1754944e-38, %v1338_v0  ;;  %vm1094_vm8 = vmor %vm1092_vm1, %vm1093_vm4 }
  0xf7   : > { %v2567_v23 = vpop.eup %2566  ;;  %v1090_v24 = vmul.f32 %v2559_v53, %v1089_v17  ;;  %2574 = vrcp.f32 %v3198_v20  ;;  %v1579_v31 = vor.u32 1.1754944e-38, %v1578_v14  ;;  %v1816_v22 = vand.u32 2147483647, %v3191_v16  ;;  %v628_v17 = vpop.f32.mrf.mxu0 }
  0xf8   : > { %v2569_v26 = vpop.eup %2568  ;;  %v1328_v27 = vmul.f32 %v2567_v23, %v3175_v63  ;;  %vm3211_vm7 = vcmp.eq.f32.partialorder %v1576_v9, 8.507059e+37  ;;  %v1818_v34 = vand.u32 2147483648, %v3191_v16  ;;  %v1111_v35 = vand.u32 2147483647, %v3198_v20 }
  0xf9   : > { %v1091_v32 = vadd.f32 %v2559_v53, %v1090_v24  ;;  %v1568_v33 = vmul.f32 %v2569_v26, %v3177_v3  ;;  %v2571_v37 = vpop.eup %2570  ;;  %vm1333_vm9 = vweird.f32 %v2567_v23  ;;  %v3220_v39 = vadd.f32 1.0, %v2565_v15 }
  0xfa   : > { %v1329_v38 = vsub.f32 1.0, %v1328_v27  ;;  %2576 = vpow2.f32 %v2399_v36  ;;  %v3222_v30 = vadd.f32 1.0, %v2571_v37  ;;  %v1113_v46 = vand.u32 2147483648, %v3198_v20  ;;  %vm1334_vm14 = vmor %vm1332_vm3, %vm1333_vm9 }
  0xfb   : > { %v1095_v40 = vsel %vm1094_vm8, %v2559_v53, %v1091_v32  ;;  %v1569_v41 = vsub.f32 1.0, %v1568_v33  ;;  %2578 = vpow2.f32 %v2352_v25  ;;  %vm1573_vm10 = vweird.f32 %v2569_v26  ;;  %v708_v33 = vpop.f32.mrf.mxu2 }
  0xfc   : > { %v2573_v45 = vpop.eup %2572  ;;  %v1100_v47 = vsel %vm3193_vm2, %v1099_v21, %v1095_v40  ;;  %v1330_v48 = vmul.f32 %v2567_v23, %v1329_v38  ;;  %2580 = vrcp.f32 %v3220_v39  ;;  %vm1812_vm11 = vweird.f32 %v3191_v16  ;;  %vm1574_vm15 = vmor %vm1572_vm5, %vm1573_vm10  ;;  %v668_v21 = vpop.f32.mrf.mxu1 }
  0xfd   : > { %v2575_v49 = vpop.eup %2574  ;;  %1991 = vst [vmem:[%s2946_s30 + $0x20] sm:$0xff] %v1100_v47  ;;  %v1570_v50 = vmul.f32 %v2569_v26, %v1569_v41  ;;  %v1808_v51 = vmul.f32 %v2573_v45, %v3191_v16  ;;  %vm3233_vm12 = vcmp.eq.f32.partialorder %v1816_v22, 8.507059e+37  ;;  %vm1107_vm13 = vweird.f32 %v3198_v20 }
  0xfe   : > { %v1331_v52 = vadd.f32 %v2567_v23, %v1330_v48  ;;  %v1103_v54 = vmul.f32 %v2575_v49, %v3198_v20  ;;  %v1819_v57 = vor.u32 1.1754944e-38, %v1818_v34  ;;  %2582 = vrcp.f32 %v3222_v30 }
  0xff   : > { %v1571_v55 = vadd.f32 %v2569_v26, %v1570_v50  ;;  %v1809_v56 = vsub.f32 1.0, %v1808_v51  ;;  %vm3246_vm0 = vcmp.eq.f32.partialorder %v1111_v35, 8.507059e+37  ;;  %v1114_v63 = vor.u32 1.1754944e-38, %v1113_v46  ;;  %v3295_v35 = vld [vmem:[%s2818_s22] ss:$0 sm:$0xff] }
 0x100   : > { %v2577_v60 = vpop.eup %2576  ;;  %v1335_v61 = vsel %vm1334_vm14, %v2567_v23, %v1331_v52  ;;  %v1104_v44 = vsub.f32 1.0, %v1103_v54  ;;  %vm1813_vm1 = vweird.f32 %v2573_v45  ;;  %vm1108_vm2 = vweird.f32 %v2575_v49 }
 0x101   : > { %v2579_v1 = vpop.eup %2578  ;;  %v1340_v2 = vsel %vm3205_vm6, %v1339_v19, %v1335_v61  ;;  %v1575_v58 = vsel %vm1574_vm15, %v2569_v26, %v1571_v55  ;;  %v1810_v4 = vmul.f32 %v2573_v45, %v1809_v56  ;;  %v1351_v8 = vand.u32 2147483647, %v3220_v39  ;;  %vm1814_vm4 = vmor %vm1812_vm11, %vm1813_vm1  ;;  %v631_v61 = vpop.f32.mrf.mxu0 }
 0x102   : > { %v2581_v5 = vpop.eup %2580  ;;  %2007 = vst [vmem:[%s2946_s30 + $0xa0] sm:$0xff] %v1340_v2  ;;  %v1580_v3 = vsel %vm3211_vm7, %v1579_v31, %v1575_v58  ;;  %v1105_v53 = vmul.f32 %v2575_v49, %v1104_v44  ;;  %vm1347_vm3 = vweird.f32 %v3220_v39  ;;  %v3259_v11 = vadd.f32 1.0, %v2577_v60  ;;  %vm1109_vm5 = vmor %vm1107_vm13, %vm1108_vm2 }
 0x103   : > { %2023 = vst [vmem:[%s2946_s30 + $0x120] sm:$0xff] %v1580_v3  ;;  %v1811_v6 = vadd.f32 %v2573_v45, %v1810_v4  ;;  %v1343_v7 = vmul.f32 %v2581_v5, %v3220_v39  ;;  %v1353_v13 = vand.u32 2147483648, %v3220_v39  ;;  %v1591_v0 = vand.u32 2147483647, %v3222_v30 }
 0x104   : > { %v1106_v12 = vadd.f32 %v2575_v49, %v1105_v53  ;;  %v3265_v14 = vadd.f32 1.0, %v2579_v1  ;;  %v2583_v18 = vpop.eup %2582  ;;  %v1593_v16 = vand.u32 2147483648, %v3222_v30  ;;  %2584 = vrcp.f32 %v3259_v11  ;;  %v671_v62 = vpop.f32.mrf.mxu1 }
 0x105   : > { %v1815_v9 = vsel %vm1814_vm4, %v2573_v45, %v1811_v6  ;;  %v1344_v15 = vsub.f32 1.0, %v1343_v7  ;;  %vm3274_vm6 = vcmp.eq.f32.partialorder %v1351_v8, 8.507059e+37  ;;  %v1583_v25 = vmul.f32 %v2583_v18, %v3222_v30  ;;  %v711_v7 = vpop.f32.mrf.mxu2 }
 0x106   : > { %v1820_v36 = vsel %vm3233_vm12, %v1819_v57, %v1815_v9  ;;  %v1110_v23 = vsel %vm1109_vm5, %v2575_v49, %v1106_v12  ;;  %vm1348_vm7 = vweird.f32 %v2581_v5  ;;  %vm1587_vm8 = vweird.f32 %v3222_v30 }
 0x107   : > { %2039 = vst [vmem:[%s2946_s30 + $0x1a0] sm:$0xff] %v1820_v36  ;;  %v1115_v20 = vsel %vm3246_vm0, %v1114_v63, %v1110_v23  ;;  %v1345_v26 = vmul.f32 %v2581_v5, %v1344_v15  ;;  %v1354_v27 = vor.u32 1.1754944e-38, %v1353_v13  ;;  %v1584_v28 = vsub.f32 1.0, %v1583_v25  ;;  %vm1349_vm11 = vmor %vm1347_vm3, %vm1348_vm7 }
 0x108   : > { %1992 = vst [vmem:[%s2946_s30 + $0x28] sm:$0xff] %v1115_v20  ;;  %v1833_v19 = vand.u32 2147483648, %v3259_v11  ;;  %2586 = vrcp.f32 %v3265_v14  ;;  %vm1588_vm9 = vweird.f32 %v2583_v18  ;;  %vm3286_vm10 = vcmp.eq.f32.partialorder %v1591_v0, 8.507059e+37 }
 0x109   : > { %v1346_v31 = vadd.f32 %v2581_v5, %v1345_v26  ;;  %v1594_v32 = vor.u32 1.1754944e-38, %v1593_v16  ;;  %v1585_v29 = vmul.f32 %v2583_v18, %v1584_v28  ;;  %vm1827_vm12 = vweird.f32 %v3259_v11  ;;  %vm1589_vm14 = vmor %vm1587_vm8, %vm1588_vm9 }
 0x10a   : > { %v1831_v34 = vand.u32 2147483647, %v3259_v11  ;;  %v667_v37 = vadd.f32 %v3295_v35, %v3224_v43  ;;  %v707_v38 = vadd.f32 %v3295_v35, %v706_v59  ;;  %v2585_v40 = vpop.eup %2584  ;;  %vm1122_vm13 = vweird.f32 %v3265_v14  ;;  %v748_v43 = vpop.f32.mrf.mxu3 }
 0x10b   : > { %v1350_v41 = vsel %vm1349_vm11, %v2581_v5, %v1346_v31  ;;  %v1126_v39 = vand.u32 2147483647, %v3265_v14  ;;  %v747_v45 = vadd.f32 %v3295_v35, %v746_v10  ;;  %v629_v47 = vadd.f32 %v3295_v35, %v628_v17 }
 0x10c   : > { %v1355_v48 = vsel %vm3274_vm6, %v1354_v27, %v1350_v41  ;;  %v1586_v46 = vadd.f32 %v2583_v18, %v1585_v29  ;;  %v1823_v49 = vmul.f32 %v2585_v40, %v3259_v11  ;;  %v1834_v50 = vor.u32 1.1754944e-38, %v1833_v19  ;;  %v673_v19 = vpop.f32.mrf.mxu1 }
 0x10d   : > { %2008 = vst [vmem:[%s2946_s30 + $0xa8] sm:$0xff] %v1355_v48  ;;  %v2368_v51 = vmul.f32 -1.442695, %v667_v37  ;;  %v2384_v52 = vmul.f32 -1.442695, %v707_v38  ;;  %v669_v42 = vadd.f32 %v3295_v35, %v668_v21  ;;  %v709_v54 = vadd.f32 %v3295_v35, %v708_v33 }
 0x10e   : > { %v2587_v55 = vpop.eup %2586  ;;  %v1590_v56 = vsel %vm1589_vm14, %v2583_v18, %v1586_v46  ;;  %v1824_v57 = vsub.f32 1.0, %v1823_v49  ;;  %v2400_v59 = vmul.f32 -1.442695, %v747_v45  ;;  %v2353_v60 = vmul.f32 -1.442695, %v629_v47 }
 0x10f   : > { %v1595_v44 = vsel %vm3286_vm10, %v1594_v32, %v1590_v56  ;;  %vm1828_vm15 = vweird.f32 %v2585_v40  ;;  %v1118_v30 = vmul.f32 %v2587_v55, %v3265_v14  ;;  %2588 = vpow2.f32 %v2368_v51 }
 0x110   : > { %2024 = vst [vmem:[%s2946_s30 + $0x128] sm:$0xff] %v1595_v44  ;;  %v1825_v63 = vmul.f32 %v2585_v40, %v1824_v57  ;;  %2590 = vpow2.f32 %v2384_v52  ;;  %v2369_v1 = vmul.f32 -1.442695, %v669_v42  ;;  %v2385_v2 = vmul.f32 -1.442695, %v709_v54  ;;  %vm1829_vm1 = vmor %vm1827_vm12, %vm1828_vm15 }
 0x111   : > { %v1119_v58 = vsub.f32 1.0, %v1118_v30  ;;  %v1128_v4 = vand.u32 2147483648, %v3265_v14  ;;  %2592 = vpow2.f32 %v2400_v59  ;;  %v749_v5 = vadd.f32 %v3295_v35, %v748_v43  ;;  %v633_v14 = vpop.f32.mrf.mxu0 }
 0x112   : > { %v1826_v3 = vadd.f32 %v2585_v40, %v1825_v63  ;;  %vm1123_vm0 = vweird.f32 %v2587_v55  ;;  %2594 = vpow2.f32 %v2353_v60  ;;  %v632_v53 = vadd.f32 %v3295_v35, %v631_v61  ;;  %v751_v21 = vpop.f32.mrf.mxu3 }
 0x113   : > { %v1120_v8 = vmul.f32 %v2587_v55, %v1119_v58  ;;  %2596 = vpow2.f32 %v2369_v1  ;;  %v2401_v10 = vmul.f32 -1.442695, %v749_v5  ;;  %v672_v6 = vadd.f32 %v3295_v35, %v671_v62  ;;  %vm1124_vm4 = vmor %vm1122_vm13, %vm1123_vm0 }
 0x114   : > { %v1830_v12 = vsel %vm1829_vm1, %v2585_v40, %v1826_v3  ;;  %vm1832_vm2 = vcmp.eq.f32.partialorder %v1831_v34, 8.507059e+37  ;;  %2598 = vpow2.f32 %v2385_v2  ;;  %vm1127_vm3 = vcmp.eq.f32.partialorder %v1126_v39, 8.507059e+37 }
 0x115   : > { %v2589_v13 = vpop.eup %2588  ;;  %v1835_v0 = vsel %vm1832_vm2, %v1834_v50, %v1830_v12  ;;  %v1121_v17 = vadd.f32 %v2587_v55, %v1120_v8  ;;  %v1129_v11 = vor.u32 1.1754944e-38, %v1128_v4  ;;  %v2354_v15 = vmul.f32 -1.442695, %v632_v53 }
 0x116   : > { %v2591_v18 = vpop.eup %2590  ;;  %2040 = vst [vmem:[%s2946_s30 + $0x1a8] sm:$0xff] %v1835_v0  ;;  %v3328_v9 = vadd.f32 1.0, %v2589_v13  ;;  %v712_v16 = vadd.f32 %v3295_v35, %v711_v7  ;;  %2600 = vpow2.f32 %v2401_v10  ;;  %v2370_v25 = vmul.f32 -1.442695, %v672_v6 }
 0x117   : > { %v2593_v36 = vpop.eup %2592  ;;  %v1125_v23 = vsel %vm1124_vm4, %v2587_v55, %v1121_v17  ;;  %v3331_v24 = vadd.f32 1.0, %v2591_v18  ;;  %v752_v28 = vadd.f32 %v3295_v35, %v751_v21  ;;  %v3347_v37 = vadd.f32 %v3295_v35, %v633_v14 }
 0x118   : > { %v2595_v20 = vpop.eup %2594  ;;  %v1130_v26 = vsel %vm1127_vm3, %v1129_v11, %v1125_v23  ;;  %2602 = vrcp.f32 %v3328_v9  ;;  %v3337_v22 = vadd.f32 1.0, %v2593_v36  ;;  %v3341_v33 = vmul.f32 -1.442695, %v712_v16 }
 0x119   : > { %v2597_v27 = vpop.eup %2596  ;;  %1993 = vst [vmem:[%s2946_s30 + $0x30] sm:$0xff] %v1130_v26  ;;  %2604 = vrcp.f32 %v3331_v24  ;;  %v3339_v32 = vadd.f32 1.0, %v2595_v20  ;;  %v1366_v29 = vand.u32 2147483647, %v3328_v9  ;;  %v1368_v38 = vand.u32 2147483648, %v3328_v9 }
 0x11a   : > { %v2599_v31 = vpop.eup %2598  ;;  %2606 = vpow2.f32 %v2354_v15  ;;  %v3344_v34 = vadd.f32 1.0, %v2597_v27  ;;  %v1606_v40 = vand.u32 2147483647, %v3331_v24  ;;  %v3353_v41 = vadd.f32 %v3295_v35, %v673_v19  ;;  %v753_v6 = vpop.f32.mrf.mxu3 }
 0x11b   : > { %2608 = vpow2.f32 %v2370_v25  ;;  %v1608_v45 = vand.u32 2147483648, %v3331_v24  ;;  %v3357_v47 = vadd.f32 1.0, %v2599_v31  ;;  %v3359_v48 = vmul.f32 -1.442695, %v752_v28 }
 0x11c   : > { %2610 = vrcp.f32 %v3337_v22  ;;  %v2601_v39 = vpop.eup %2600  ;;  %vm1362_vm5 = vweird.f32 %v3328_v9  ;;  %vm1602_vm6 = vweird.f32 %v3331_v24  ;;  %v1848_v49 = vand.u32 2147483648, %v3337_v22 }
 0x11d   : > { %2612 = vrcp.f32 %v3339_v32  ;;  %vm3366_vm7 = vcmp.eq.f32.partialorder %v1366_v29, 8.507059e+37  ;;  %v1846_v52 = vand.u32 2147483647, %v3337_v22  ;;  %v1143_v42 = vand.u32 2147483648, %v3339_v32 }
 0x11e   : > { %v2603_v46 = vpop.eup %2602  ;;  %2614 = vrcp.f32 %v3344_v34  ;;  %v1369_v55 = vor.u32 1.1754944e-38, %v1368_v38  ;;  %vm3373_vm8 = vcmp.eq.f32.partialorder %v1606_v40, 8.507059e+37  ;;  %v1141_v59 = vand.u32 2147483647, %v3339_v32 }
 0x11f   : > { %v2605_v50 = vpop.eup %2604  ;;  %v1358_v43 = vmul.f32 %v2603_v46, %v3328_v9  ;;  %v1609_v44 = vor.u32 1.1754944e-38, %v1608_v45  ;;  %vm1842_vm9 = vweird.f32 %v3337_v22  ;;  %2616 = vrcp.f32 %v3357_v47 }
 0x120   : > { %v2607_v54 = vpop.eup %2606  ;;  %v1598_v56 = vmul.f32 %v2605_v50, %v3331_v24  ;;  %vm1363_vm10 = vweird.f32 %v2603_v46  ;;  %vm1603_vm11 = vweird.f32 %v2605_v50  ;;  %v1849_v63 = vor.u32 1.1754944e-38, %v1848_v49 }
 0x121   : > { %v3378_v60 = vpop.eup %2608  ;;  %v1359_v61 = vsub.f32 1.0, %v1358_v43  ;;  %vm1137_vm12 = vweird.f32 %v3339_v32  ;;  %vm3384_vm13 = vcmp.eq.f32.partialorder %v1846_v52, 8.507059e+37  ;;  %v1144_v5 = vor.u32 1.1754944e-38, %v1143_v42  ;;  %vm1364_vm1 = vmor %vm1362_vm5, %vm1363_vm10 }
 0x122   : > { %v2611_v30 = vpop.eup %2610  ;;  %v1599_v62 = vsub.f32 1.0, %v1598_v56  ;;  %vm1377_vm14 = vweird.f32 %v3344_v34  ;;  %v1381_v3 = vand.u32 2147483647, %v3344_v34  ;;  %vm3391_vm15 = vcmp.eq.f32.partialorder %v1141_v59, 8.507059e+37  ;;  %vm1604_vm3 = vmor %vm1602_vm6, %vm1603_vm11  ;;  %v713_v59 = vpop.f32.mrf.mxu2 }
 0x123   : > { %v2613_v1 = vpop.eup %2612  ;;  %v1360_v2 = vmul.f32 %v2603_v46, %v1359_v61  ;;  %v1838_v58 = vmul.f32 %v2611_v30, %v3337_v22  ;;  %v1383_v7 = vand.u32 2147483648, %v3344_v34  ;;  %v1621_v12 = vand.u32 2147483647, %v3357_v47 }
 0x124   : > { %v2615_v53 = vpop.eup %2614  ;;  %v1600_v8 = vmul.f32 %v2605_v50, %v1599_v62  ;;  %v1133_v10 = vmul.f32 %v2613_v1, %v3339_v32  ;;  %vm1843_vm0 = vweird.f32 %v2611_v30  ;;  %vm1138_vm2 = vweird.f32 %v2613_v1 }
 0x125   : > { %v1361_v13 = vadd.f32 %v2603_v46, %v1360_v2  ;;  %v1839_v0 = vsub.f32 1.0, %v1838_v58  ;;  %v1373_v17 = vmul.f32 %v2615_v53, %v3344_v34  ;;  %v3401_v15 = vadd.f32 1.0, %v2601_v39  ;;  %v2617_v16 = vpop.eup %2616  ;;  %vm1844_vm5 = vmor %vm1842_vm9, %vm1843_vm0 }
 0x126   : > { %v1601_v18 = vadd.f32 %v2605_v50, %v1600_v8  ;;  %v1134_v11 = vsub.f32 1.0, %v1133_v10  ;;  %v3406_v25 = vadd.f32 1.0, %v2607_v54  ;;  %v1613_v14 = vmul.f32 %v2617_v16, %v3357_v47  ;;  %vm1139_vm6 = vmor %vm1137_vm12, %vm1138_vm2 }
 0x127   : > { %v1365_v21 = vsel %vm1364_vm1, %v2603_v46, %v1361_v13  ;;  %v1840_v36 = vmul.f32 %v2611_v30, %v1839_v0  ;;  %v1374_v23 = vsub.f32 1.0, %v1373_v17  ;;  %vm1378_vm4 = vweird.f32 %v2615_v53  ;;  %v636_v0 = vpop.f32.mrf.mxu0 }
 0x128   : > { %v1370_v9 = vsel %vm3366_vm7, %v1369_v55, %v1365_v21  ;;  %v1605_v20 = vsel %vm1604_vm3, %v2605_v50, %v1601_v18  ;;  %v1135_v26 = vmul.f32 %v2613_v1, %v1134_v11  ;;  %v1614_v31 = vsub.f32 1.0, %v1613_v14 }
 0x129   : > { %2009 = vst [vmem:[%s2946_s30 + $0xb0] sm:$0xff] %v1370_v9  ;;  %v1610_v27 = vsel %vm3373_vm8, %v1609_v44, %v1605_v20  ;;  %v1841_v28 = vadd.f32 %v2611_v30, %v1840_v36  ;;  %v1375_v19 = vmul.f32 %v2615_v53, %v1374_v23  ;;  %v1623_v29 = vand.u32 2147483648, %v3357_v47  ;;  %vm1379_vm8 = vmor %vm1377_vm14, %vm1378_vm4 }
 0x12a   : > { %2025 = vst [vmem:[%s2946_s30 + $0x130] sm:$0xff] %v1610_v27  ;;  %v1136_v24 = vadd.f32 %v2613_v1, %v1135_v26  ;;  %2618 = vrcp.f32 %v3401_v15  ;;  %v1384_v39 = vor.u32 1.1754944e-38, %v1383_v7  ;;  %vm1618_vm7 = vweird.f32 %v2617_v16  ;;  %v676_v26 = vpop.f32.mrf.mxu1 }
 0x12b   : > { %v1845_v38 = vsel %vm1844_vm5, %v2611_v30, %v1841_v28  ;;  %v1376_v40 = vadd.f32 %v2615_v53, %v1375_v19  ;;  %v1615_v46 = vmul.f32 %v2617_v16, %v1614_v31  ;;  %2620 = vrcp.f32 %v3406_v25 }
 0x12c   : > { %v1850_v22 = vsel %vm3384_vm13, %v1849_v63, %v1845_v38  ;;  %v1140_v45 = vsel %vm1139_vm6, %v2613_v1, %v1136_v24  ;;  %vm1382_vm9 = vcmp.eq.f32.partialorder %v1381_v3, 8.507059e+37  ;;  %vm1617_vm10 = vweird.f32 %v3357_v47  ;;  %v716_v24 = vpop.f32.mrf.mxu2 }
 0x12d   : > { %2041 = vst [vmem:[%s2946_s30 + $0x1b0] sm:$0xff] %v1850_v22  ;;  %v1145_v49 = vsel %vm3391_vm15, %v1144_v5, %v1140_v45  ;;  %v1380_v32 = vsel %vm1379_vm8, %v2615_v53, %v1376_v40  ;;  %v1616_v43 = vadd.f32 %v2617_v16, %v1615_v46  ;;  %v1624_v51 = vor.u32 1.1754944e-38, %v1623_v29  ;;  %vm1619_vm11 = vmor %vm1617_vm10, %vm1618_vm7 }
 0x12e   : > { %1994 = vst [vmem:[%s2946_s30 + $0x38] sm:$0xff] %v1145_v49  ;;  %v1385_v50 = vsel %vm1382_vm9, %v1384_v39, %v1380_v32  ;;  %v1861_v34 = vand.u32 2147483647, %v3401_v15  ;;  %v3437_v52 = vadd.f32 1.0, %v3378_v60  ;;  %2622 = vpow2.f32 %v3341_v33 }
 0x12f   : > { %2010 = vst [vmem:[%s2946_s30 + $0xb8] sm:$0xff] %v1385_v50  ;;  %v2355_v42 = vmul.f32 -1.442695, %v3347_v37  ;;  %v1620_v55 = vsel %vm1619_vm11, %v2617_v16, %v1616_v43  ;;  %vm1622_vm12 = vcmp.eq.f32.partialorder %v1621_v12, 8.507059e+37  ;;  %2624 = vpow2.f32 %v3359_v48 }
 0x130   : > { %v2619_v54 = vpop.eup %2618  ;;  %v2371_v47 = vmul.f32 -1.442695, %v3353_v41  ;;  %v1625_v56 = vsel %vm1622_vm12, %v1624_v51, %v1620_v55  ;;  %vm1857_vm13 = vweird.f32 %v3401_v15  ;;  %v1863_v60 = vand.u32 2147483648, %v3401_v15 }
 0x131   : > { %v1853_v57 = vmul.f32 %v2619_v54, %v3401_v15  ;;  %v2621_v61 = vpop.eup %2620  ;;  %2026 = vst [vmem:[%s2946_s30 + $0x138] sm:$0xff] %v1625_v56  ;;  %2626 = vrcp.f32 %v3437_v52  ;;  %vm3448_vm14 = vcmp.eq.f32.partialorder %v1861_v34, 8.507059e+37  ;;  %vm1858_vm15 = vweird.f32 %v2619_v54 }
 0x132   : > { %v1148_v48 = vmul.f32 %v2621_v61, %v3406_v25  ;;  %2628 = vpow2.f32 %v2355_v42  ;;  %v1156_v41 = vand.u32 2147483647, %v3406_v25  ;;  %v1158_v44 = vand.u32 2147483648, %v3406_v25  ;;  %vm1859_vm2 = vmor %vm1857_vm13, %vm1858_vm15 }
 0x133   : > { %v1854_v33 = vsub.f32 1.0, %v1853_v57  ;;  %2630 = vpow2.f32 %v2371_v47  ;;  %v1396_v1 = vand.u32 2147483647, %v3437_v52  ;;  %v714_v2 = vadd.f32 %v3295_v35, %v713_v59 }
 0x134   : > { %v2623_v30 = vpop.eup %2622  ;;  %v1149_v63 = vsub.f32 1.0, %v1148_v48  ;;  %v1864_v4 = vor.u32 1.1754944e-38, %v1863_v60  ;;  %vm1152_vm0 = vweird.f32 %v3406_v25  ;;  %v1398_v5 = vand.u32 2147483648, %v3437_v52 }
 0x135   : > { %v1855_v62 = vmul.f32 %v2619_v54, %v1854_v33  ;;  %v2625_v58 = vpop.eup %2624  ;;  %v3459_v3 = vadd.f32 1.0, %v2623_v30  ;;  %vm1153_vm1 = vweird.f32 %v2621_v61  ;;  %vm3466_vm3 = vcmp.eq.f32.partialorder %v1156_v41, 8.507059e+37 }
 0x136   : > { %v1150_v8 = vmul.f32 %v2621_v61, %v1149_v63  ;;  %v3461_v10 = vadd.f32 1.0, %v2625_v58  ;;  %v1159_v13 = vor.u32 1.1754944e-38, %v1158_v44  ;;  %vm1392_vm4 = vweird.f32 %v3437_v52  ;;  %vm1154_vm6 = vmor %vm1152_vm0, %vm1153_vm1 }
 0x137   : > { %v1856_v53 = vadd.f32 %v2619_v54, %v1855_v62  ;;  %v2627_v7 = vpop.eup %2626  ;;  %2632 = vrcp.f32 %v3459_v3  ;;  %vm3473_vm5 = vcmp.eq.f32.partialorder %v1396_v1, 8.507059e+37  ;;  %v2387_v15 = vmul.f32 -1.442695, %v714_v2 }
 0x138   : > { %v2629_v17 = vpop.eup %2628  ;;  %v1151_v11 = vadd.f32 %v2621_v61, %v1150_v8  ;;  %v1388_v16 = vmul.f32 %v2627_v7, %v3437_v52  ;;  %v1399_v9 = vor.u32 1.1754944e-38, %v1398_v5  ;;  %2634 = vrcp.f32 %v3461_v10 }
 0x139   : > { %v1860_v18 = vsel %vm1859_vm2, %v2619_v54, %v1856_v53  ;;  %v2631_v36 = vpop.eup %2630  ;;  %v754_v20 = vadd.f32 %v3295_v35, %v753_v6  ;;  %v1636_v28 = vand.u32 2147483647, %v3459_v3  ;;  %v637_v19 = vadd.f32 %v3295_v35, %v636_v0 }
 0x13a   : > { %v1865_v23 = vsel %vm3448_vm14, %v1864_v4, %v1860_v18  ;;  %v1155_v14 = vsel %vm1154_vm6, %v2621_v61, %v1151_v11  ;;  %v1389_v27 = vsub.f32 1.0, %v1388_v16  ;;  %v1638_v25 = vand.u32 2147483648, %v3459_v3 }
 0x13b   : > { %2042 = vst [vmem:[%s2946_s30 + $0x1b8] sm:$0xff] %v1865_v23  ;;  %v1160_v31 = vsel %vm3466_vm3, %v1159_v13, %v1155_v14  ;;  %v3490_v29 = vadd.f32 1.0, %v2629_v17  ;;  %v3492_v38 = vadd.f32 1.0, %v2631_v36  ;;  %vm1393_vm7 = vweird.f32 %v2627_v7 }
 0x13c   : > { %1995 = vst [vmem:[%s2946_s30 + $0x40] sm:$0xff] %v1160_v31  ;;  %v1390_v40 = vmul.f32 %v2627_v7, %v1389_v27  ;;  %2636 = vpow2.f32 %v2387_v15  ;;  %v677_v39 = vadd.f32 %v3295_v35, %v676_v26  ;;  %v1876_v45 = vand.u32 2147483647, %v3461_v10  ;;  %vm1394_vm9 = vmor %vm1392_vm4, %vm1393_vm7  ;;  %v638_v31 = vpop.f32.mrf.mxu0 }
 0x13d   : > { %v2633_v22 = vpop.eup %2632  ;;  %v1878_v46 = vand.u32 2147483648, %v3461_v10  ;;  %2638 = vrcp.f32 %v3490_v29  ;;  %v717_v49 = vadd.f32 %v3295_v35, %v716_v24  ;;  %vm1632_vm8 = vweird.f32 %v3459_v3 }
 0x13e   : > { %v1391_v32 = vadd.f32 %v2627_v7, %v1390_v40  ;;  %v1628_v50 = vmul.f32 %v2633_v22, %v3459_v3  ;;  %v2403_v43 = vmul.f32 -1.442695, %v754_v20  ;;  %v2635_v51 = vpop.eup %2634  ;;  %vm3504_vm10 = vcmp.eq.f32.partialorder %v1636_v28, 8.507059e+37 }
 0x13f   : > { %v1639_v42 = vor.u32 1.1754944e-38, %v1638_v25  ;;  %2640 = vrcp.f32 %v3492_v38  ;;  %v2356_v54 = vmul.f32 -1.442695, %v637_v19  ;;  %v1868_v56 = vmul.f32 %v2635_v51, %v3461_v10 }
 0x140   : > { %v1395_v55 = vsel %vm1394_vm9, %v2627_v7, %v1391_v32  ;;  %v1629_v47 = vsub.f32 1.0, %v1628_v50  ;;  %vm1872_vm11 = vweird.f32 %v3461_v10  ;;  %vm3513_vm12 = vcmp.eq.f32.partialorder %v1876_v45, 8.507059e+37 }
 0x141   : > { %v1400_v57 = vsel %vm3473_vm5, %v1399_v9, %v1395_v55  ;;  %v1879_v59 = vor.u32 1.1754944e-38, %v1878_v46  ;;  %v1171_v61 = vand.u32 2147483647, %v3490_v29  ;;  %vm1633_vm13 = vweird.f32 %v2633_v22  ;;  %v756_v9 = vpop.f32.mrf.mxu3 }
 0x142   : > { %v2637_v60 = vpop.eup %2636  ;;  %2011 = vst [vmem:[%s2946_s30 + $0xc0] sm:$0xff] %v1400_v57  ;;  %v1630_v33 = vmul.f32 %v2633_v22, %v1629_v47  ;;  %v1869_v37 = vsub.f32 1.0, %v1868_v56  ;;  %vm1167_vm14 = vweird.f32 %v3490_v29  ;;  %2642 = vpow2.f32 %v2403_v43  ;;  %vm1634_vm0 = vmor %vm1632_vm8, %vm1633_vm13 }
 0x143   : > { %v2639_v48 = vpop.eup %2638  ;;  %vm1873_vm15 = vweird.f32 %v2635_v51  ;;  %v1173_v41 = vand.u32 2147483648, %v3490_v29  ;;  %v3521_v44 = vadd.f32 1.0, %v2637_v60  ;;  %2644 = vpow2.f32 %v2356_v54 }
 0x144   : > { %v1631_v30 = vadd.f32 %v2633_v22, %v1630_v33  ;;  %v1870_v62 = vmul.f32 %v2635_v51, %v1869_v37  ;;  %v1163_v63 = vmul.f32 %v2639_v48, %v3490_v29  ;;  %v2372_v1 = vmul.f32 -1.442695, %v677_v39  ;;  %vm1874_vm3 = vmor %vm1872_vm11, %vm1873_vm15 }
 0x145   : > { %v2641_v2 = vpop.eup %2640  ;;  %vm3526_vm1 = vcmp.eq.f32.partialorder %v1171_v61, 8.507059e+37  ;;  %vm1407_vm2 = vweird.f32 %v3492_v38  ;;  %2646 = vrcp.f32 %v3521_v44  ;;  %v2388_v4 = vmul.f32 -1.442695, %v717_v49 }
 0x146   : > { %v1635_v5 = vsel %vm1634_vm0, %v2633_v22, %v1631_v30  ;;  %v1871_v53 = vadd.f32 %v2635_v51, %v1870_v62  ;;  %v1164_v8 = vsub.f32 1.0, %v1163_v63  ;;  %v1403_v6 = vmul.f32 %v2641_v2, %v3492_v38 }
 0x147   : > { %v1640_v7 = vsel %vm3504_vm10, %v1639_v42, %v1635_v5  ;;  %vm1168_vm4 = vweird.f32 %v2639_v48  ;;  %v1411_v3 = vand.u32 2147483647, %v3492_v38  ;;  %v1413_v12 = vand.u32 2147483648, %v3492_v38 }
 0x148   : > { %v2643_v13 = vpop.eup %2642  ;;  %2027 = vst [vmem:[%s2946_s30 + $0x140] sm:$0xff] %v1640_v7  ;;  %v1875_v0 = vsel %vm1874_vm3, %v2635_v51, %v1871_v53  ;;  %v1165_v17 = vmul.f32 %v2639_v48, %v1164_v8  ;;  %v1404_v18 = vsub.f32 1.0, %v1403_v6  ;;  %2648 = vpow2.f32 %v2372_v1  ;;  %vm1169_vm6 = vmor %vm1167_vm14, %vm1168_vm4 }
 0x149   : > { %v2645_v11 = vpop.eup %2644  ;;  %v1880_v16 = vsel %vm3513_vm12, %v1879_v59, %v1875_v0  ;;  %v1174_v21 = vor.u32 1.1754944e-38, %v1173_v41  ;;  %v3543_v15 = vadd.f32 1.0, %v2643_v13  ;;  %2650 = vpow2.f32 %v2388_v4  ;;  %v678_v41 = vpop.f32.mrf.mxu1 }
 0x14a   : > { %2043 = vst [vmem:[%s2946_s30 + $0x1c0] sm:$0xff] %v1880_v16  ;;  %v1166_v10 = vadd.f32 %v2639_v48, %v1165_v17  ;;  %v1405_v36 = vmul.f32 %v2641_v2, %v1404_v18  ;;  %vm1408_vm5 = vweird.f32 %v2641_v2  ;;  %v3546_v23 = vadd.f32 1.0, %v2645_v11  ;;  %v758_v58 = vpop.f32.mrf.mxu3 }
 0x14b   : > { %v2647_v20 = vpop.eup %2646  ;;  %vm3551_vm7 = vcmp.eq.f32.partialorder %v1411_v3, 8.507059e+37  ;;  %v1414_v14 = vor.u32 1.1754944e-38, %v1413_v12  ;;  %vm1647_vm8 = vweird.f32 %v3521_v44  ;;  %2652 = vrcp.f32 %v3543_v15  ;;  %vm1409_vm9 = vmor %vm1407_vm2, %vm1408_vm5  ;;  %v641_v3 = vpop.f32.mrf.mxu0 }
 0x14c   : > { %v1170_v27 = vsel %vm1169_vm6, %v2639_v48, %v1166_v10  ;;  %v1406_v28 = vadd.f32 %v2641_v2, %v1405_v36  ;;  %v1643_v19 = vmul.f32 %v2647_v20, %v3521_v44  ;;  %v1651_v24 = vand.u32 2147483647, %v3521_v44 }
 0x14d   : > { %v1175_v25 = vsel %vm3526_vm1, %v1174_v21, %v1170_v27  ;;  %v1653_v29 = vand.u32 2147483648, %v3521_v44  ;;  %2654 = vrcp.f32 %v3546_v23  ;;  %v757_v40 = vadd.f32 %v3295_v35, %v756_v9 }
 0x14e   : > { %v2649_v39 = vpop.eup %2648  ;;  %1996 = vst [vmem:[%s2946_s30 + $0x48] sm:$0xff] %v1175_v25  ;;  %v1410_v22 = vsel %vm1409_vm9, %v2641_v2, %v1406_v28  ;;  %v1644_v45 = vsub.f32 1.0, %v1643_v19  ;;  %v1891_v46 = vand.u32 2147483647, %v3543_v15  ;;  %v1893_v49 = vand.u32 2147483648, %v3543_v15  ;;  %v718_v2 = vpop.f32.mrf.mxu2 }
 0x14f   : > { %v2651_v32 = vpop.eup %2650  ;;  %v1415_v38 = vsel %vm3551_vm7, %v1414_v14, %v1410_v22  ;;  %v1188_v50 = vand.u32 2147483648, %v3546_v23  ;;  %v3573_v43 = vadd.f32 1.0, %v2649_v39  ;;  %v639_v51 = vadd.f32 %v3295_v35, %v638_v31 }
 0x150   : > { %2012 = vst [vmem:[%s2946_s30 + $0xc8] sm:$0xff] %v1415_v38  ;;  %v1645_v34 = vmul.f32 %v2647_v20, %v1644_v45  ;;  %vm1648_vm10 = vweird.f32 %v2647_v20  ;;  %v1186_v42 = vand.u32 2147483647, %v3546_v23  ;;  %v3578_v54 = vadd.f32 1.0, %v2651_v32 }
 0x151   : > { %v2653_v55 = vpop.eup %2652  ;;  %vm3580_vm11 = vcmp.eq.f32.partialorder %v1651_v24, 8.507059e+37  ;;  %v1654_v56 = vor.u32 1.1754944e-38, %v1653_v29  ;;  %vm1887_vm12 = vweird.f32 %v3543_v15  ;;  %2656 = vrcp.f32 %v3573_v43  ;;  %vm1649_vm14 = vmor %vm1647_vm8, %vm1648_vm10 }
 0x152   : > { %v1646_v57 = vadd.f32 %v2647_v20, %v1645_v34  ;;  %v1883_v52 = vmul.f32 %v2653_v55, %v3543_v15  ;;  %vm3587_vm13 = vcmp.eq.f32.partialorder %v1891_v46, 8.507059e+37  ;;  %v1894_v61 = vor.u32 1.1754944e-38, %v1893_v49  ;;  %v681_v49 = vpop.f32.mrf.mxu1 }
 0x153   : > { %v2404_v60 = vmul.f32 -1.442695, %v757_v40  ;;  %v2655_v33 = vpop.eup %2654  ;;  %vm1182_vm15 = vweird.f32 %v3546_v23  ;;  %v1189_v37 = vor.u32 1.1754944e-38, %v1188_v50  ;;  %2658 = vrcp.f32 %v3578_v54 }
 0x154   : > { %v2357_v48 = vmul.f32 -1.442695, %v639_v51  ;;  %v1650_v30 = vsel %vm1649_vm14, %v2647_v20, %v1646_v57  ;;  %v1884_v62 = vsub.f32 1.0, %v1883_v52  ;;  %v1178_v63 = vmul.f32 %v2655_v33, %v3546_v23 }
 0x155   : > { %vm3596_vm0 = vcmp.eq.f32.partialorder %v1186_v42, 8.507059e+37  ;;  %vm1422_vm1 = vweird.f32 %v3573_v43  ;;  %v1426_v44 = vand.u32 2147483647, %v3573_v43  ;;  %v1655_v4 = vsel %vm3580_vm11, %v1654_v56, %v1650_v30 }
 0x156   : > { %vm1888_vm2 = vweird.f32 %v2653_v55  ;;  %v1428_v5 = vand.u32 2147483648, %v3573_v43  ;;  %v1666_v53 = vand.u32 2147483647, %v3578_v54  ;;  %2028 = vst [vmem:[%s2946_s30 + $0x148] sm:$0xff] %v1655_v4  ;;  %v1885_v8 = vmul.f32 %v2653_v55, %v1884_v62 }
 0x157   : > { %v1179_v6 = vsub.f32 1.0, %v1178_v63  ;;  %2660 = vpow2.f32 %v2404_v60  ;;  %v679_v7 = vadd.f32 %v3295_v35, %v678_v41  ;;  %v2657_v12 = vpop.eup %2656  ;;  %vm1183_vm3 = vweird.f32 %v2655_v33  ;;  %vm1889_vm4 = vmor %vm1887_vm12, %vm1888_vm2 }
 0x158   : > { %2662 = vpow2.f32 %v2357_v48  ;;  %v719_v13 = vadd.f32 %v3295_v35, %v718_v2  ;;  %v759_v0 = vadd.f32 %v3295_v35, %v758_v58  ;;  %v1886_v17 = vadd.f32 %v2653_v55, %v1885_v8  ;;  %vm1184_vm5 = vmor %vm1182_vm15, %vm1183_vm3 }
 0x159   : > { %v1180_v18 = vmul.f32 %v2655_v33, %v1179_v6  ;;  %v1418_v11 = vmul.f32 %v2657_v12, %v3573_v43  ;;  %v1668_v16 = vand.u32 2147483648, %v3578_v54  ;;  %v2659_v21 = vpop.eup %2658  ;;  %v2373_v10 = vmul.f32 -1.442695, %v679_v7 }
 0x15a   : > { %v2389_v36 = vmul.f32 -1.442695, %v719_v13  ;;  %v2405_v9 = vmul.f32 -1.442695, %v759_v0  ;;  %v642_v20 = vadd.f32 %v3295_v35, %v641_v3  ;;  %v1890_v26 = vsel %vm1889_vm4, %v2653_v55, %v1886_v17  ;;  %v761_v17 = vpop.f32.mrf.mxu3 }
 0x15b   : > { %v1181_v14 = vadd.f32 %v2655_v33, %v1180_v18  ;;  %v1419_v27 = vsub.f32 1.0, %v1418_v11  ;;  %v1658_v28 = vmul.f32 %v2659_v21, %v3578_v54  ;;  %v1895_v19 = vsel %vm3587_vm13, %v1894_v61, %v1890_v26 }
 0x15c   : > { %vm1423_vm6 = vweird.f32 %v2657_v12  ;;  %2664 = vpow2.f32 %v2373_v10  ;;  %v2358_v15 = vmul.f32 -1.442695, %v642_v20  ;;  %2044 = vst [vmem:[%s2946_s30 + $0x1c8] sm:$0xff] %v1895_v19  ;;  %vm1663_vm7 = vweird.f32 %v2659_v21 }
 0x15d   : > { %v2661_v24 = vpop.eup %2660  ;;  %v1185_v31 = vsel %vm1184_vm5, %v2655_v33, %v1181_v14  ;;  %v1420_v25 = vmul.f32 %v2657_v12, %v1419_v27  ;;  %v1659_v29 = vsub.f32 1.0, %v1658_v28  ;;  %2666 = vpow2.f32 %v2389_v36  ;;  %vm1424_vm8 = vmor %vm1422_vm1, %vm1423_vm6  ;;  %v721_v33 = vpop.f32.mrf.mxu2 }
 0x15e   : > { %v2663_v40 = vpop.eup %2662  ;;  %v1190_v39 = vsel %vm3596_vm0, %v1189_v37, %v1185_v31  ;;  %v3625_v22 = vadd.f32 1.0, %v2661_v24  ;;  %2668 = vpow2.f32 %v2405_v9  ;;  %vm1427_vm9 = vcmp.eq.f32.partialorder %v1426_v44, 8.507059e+37 }
 0x15f   : > { %1997 = vst [vmem:[%s2946_s30 + $0x50] sm:$0xff] %v1190_v39  ;;  %v1421_v23 = vadd.f32 %v2657_v12, %v1420_v25  ;;  %v1660_v45 = vmul.f32 %v2659_v21, %v1659_v29  ;;  %v3628_v46 = vadd.f32 1.0, %v2663_v40  ;;  %2670 = vpow2.f32 %v2358_v15 }
 0x160   : > { %v1429_v32 = vor.u32 1.1754944e-38, %v1428_v5  ;;  %2672 = vrcp.f32 %v3625_v22  ;;  %vm1662_vm10 = vweird.f32 %v3578_v54  ;;  %vm1667_vm12 = vcmp.eq.f32.partialorder %v1666_v53, 8.507059e+37 }
 0x161   : > { %v1425_v38 = vsel %vm1424_vm8, %v2657_v12, %v1421_v23  ;;  %v1661_v50 = vadd.f32 %v2659_v21, %v1660_v45  ;;  %2674 = vrcp.f32 %v3628_v46  ;;  %vm1664_vm11 = vmor %vm1662_vm10, %vm1663_vm7  ;;  %v1669_v42 = vor.u32 1.1754944e-38, %v1668_v16  ;;  %v3674_v16 = vpop.f32.mrf.mxu0 }
 0x162   : > { %v2665_v51 = vpop.eup %2664  ;;  %v1430_v34 = vsel %vm1427_vm9, %v1429_v32, %v1425_v38  ;;  %v682_v43 = vadd.f32 %v3295_v35, %v681_v49  ;;  %v1906_v56 = vand.u32 2147483647, %v3625_v22  ;;  %v1908_v57 = vand.u32 2147483648, %v3625_v22 }
 0x163   : > { %v2667_v55 = vpop.eup %2666  ;;  %2013 = vst [vmem:[%s2946_s30 + $0xd0] sm:$0xff] %v1430_v34  ;;  %v1665_v47 = vsel %vm1664_vm11, %v2659_v21, %v1661_v50  ;;  %v3641_v52 = vadd.f32 1.0, %v2665_v51  ;;  %v1201_v61 = vand.u32 2147483647, %v3628_v46  ;;  %v1203_v48 = vand.u32 2147483648, %v3628_v46 }
 0x164   : > { %v2669_v54 = vpop.eup %2668  ;;  %v1670_v59 = vsel %vm1667_vm12, %v1669_v42, %v1665_v47  ;;  %v3644_v60 = vadd.f32 1.0, %v2667_v55  ;;  %vm1902_vm13 = vweird.f32 %v3625_v22  ;;  %vm1197_vm14 = vweird.f32 %v3628_v46 }
 0x165   : > { %v2671_v37 = vpop.eup %2670  ;;  %2029 = vst [vmem:[%s2946_s30 + $0x150] sm:$0xff] %v1670_v59  ;;  %2676 = vrcp.f32 %v3641_v52  ;;  %v2374_v30 = vmul.f32 -1.442695, %v682_v43  ;;  %vm3653_vm15 = vcmp.eq.f32.partialorder %v1906_v56, 8.507059e+37  ;;  %v1909_v44 = vor.u32 1.1754944e-38, %v1908_v57  ;;  %v723_v59 = vpop.f32.mrf.mxu2 }
 0x166   : > { %v2673_v41 = vpop.eup %2672  ;;  %2678 = vrcp.f32 %v3644_v60  ;;  %v722_v2 = vadd.f32 %v3295_v35, %v721_v33  ;;  %vm3659_vm0 = vcmp.eq.f32.partialorder %v1201_v61, 8.507059e+37  ;;  %v1441_v5 = vand.u32 2147483647, %v3641_v52 }
 0x167   : > { %v2675_v62 = vpop.eup %2674  ;;  %v1898_v63 = vmul.f32 %v2673_v41, %v3625_v22  ;;  %v1443_v53 = vand.u32 2147483648, %v3641_v52  ;;  %v1683_v8 = vand.u32 2147483648, %v3644_v60  ;;  %v1204_v7 = vor.u32 1.1754944e-38, %v1203_v48 }
 0x168   : > { %v1193_v58 = vmul.f32 %v2675_v62, %v3628_v46  ;;  %v1681_v3 = vand.u32 2147483647, %v3644_v60  ;;  %v3667_v12 = vadd.f32 1.0, %v2669_v54  ;;  %vm1437_vm1 = vweird.f32 %v3641_v52 }
 0x169   : > { %v1899_v6 = vsub.f32 1.0, %v1898_v63  ;;  %v3670_v0 = vadd.f32 1.0, %v2671_v37  ;;  %2680 = vpow2.f32 %v2374_v30  ;;  %vm1903_vm2 = vweird.f32 %v2673_v41 }
 0x16a   : > { %v1194_v13 = vsub.f32 1.0, %v1193_v58  ;;  %vm1198_vm3 = vweird.f32 %v2675_v62  ;;  %vm1677_vm4 = vweird.f32 %v3644_v60  ;;  %2682 = vrcp.f32 %v3667_v12  ;;  %vm1904_vm7 = vmor %vm1902_vm13, %vm1903_vm2 }
 0x16b   : > { %v2677_v18 = vpop.eup %2676  ;;  %v1900_v11 = vmul.f32 %v2673_v41, %v1899_v6  ;;  %vm3677_vm5 = vcmp.eq.f32.partialorder %v1441_v5, 8.507059e+37  ;;  %v1444_v20 = vor.u32 1.1754944e-38, %v1443_v53  ;;  %v1684_v26 = vor.u32 1.1754944e-38, %v1683_v8  ;;  %vm1199_vm8 = vmor %vm1197_vm14, %vm1198_vm3 }
 0x16c   : > { %v2679_v21 = vpop.eup %2678  ;;  %v1195_v10 = vmul.f32 %v2675_v62, %v1194_v13  ;;  %v1433_v36 = vmul.f32 %v2677_v18, %v3641_v52  ;;  %vm3682_vm6 = vcmp.eq.f32.partialorder %v1681_v3, 8.507059e+37  ;;  %v2390_v19 = vmul.f32 -1.442695, %v722_v2  ;;  %v683_v52 = vpop.f32.mrf.mxu1  ;;  %v3732_v2 = vld [vmem:[%s2818_s22] ss:$0 sm:$0xff] }
 0x16d   : > { %v1901_v14 = vadd.f32 %v2673_v41, %v1900_v11  ;;  %v1673_v27 = vmul.f32 %v2679_v21, %v3644_v60  ;;  %v762_v15 = vadd.f32 %v3295_v35, %v761_v17  ;;  %v1921_v25 = vand.u32 2147483647, %v3667_v12  ;;  %v763_v60 = vpop.f32.mrf.mxu3 }
 0x16e   : > { %v1196_v24 = vadd.f32 %v2675_v62, %v1195_v10  ;;  %v1434_v31 = vsub.f32 1.0, %v1433_v36  ;;  %2684 = vrcp.f32 %v3670_v0  ;;  %vm1438_vm9 = vweird.f32 %v2677_v18 }
 0x16f   : > { %v1905_v29 = vsel %vm1904_vm7, %v2673_v41, %v1901_v14  ;;  %v1674_v40 = vsub.f32 1.0, %v1673_v27  ;;  %v1923_v35 = vand.u32 2147483648, %v3667_v12  ;;  %v2681_v39 = vpop.eup %2680  ;;  %vm1678_vm10 = vweird.f32 %v2679_v21  ;;  %vm1439_vm12 = vmor %vm1437_vm1, %vm1438_vm9  ;;  %v646_v41 = vpop.f32.mrf.mxu0 }
 0x170   : > { %v1910_v22 = vsel %vm3653_vm15, %v1909_v44, %v1905_v29  ;;  %v1200_v23 = vsel %vm1199_vm8, %v2675_v62, %v1196_v24  ;;  %v1435_v45 = vmul.f32 %v2677_v18, %v1434_v31  ;;  %v2683_v49 = vpop.eup %2682  ;;  %v1216_v46 = vand.u32 2147483647, %v3670_v0  ;;  %vm1679_vm14 = vmor %vm1677_vm4, %vm1678_vm10  ;;  %v726_v31 = vpop.f32.mrf.mxu2 }
 0x171   : > { %2045 = vst [vmem:[%s2946_s30 + $0x1d0] sm:$0xff] %v1910_v22  ;;  %v1205_v32 = vsel %vm3659_vm0, %v1204_v7, %v1200_v23  ;;  %v1675_v38 = vmul.f32 %v2679_v21, %v1674_v40  ;;  %v3702_v50 = vadd.f32 1.0, %v2681_v39  ;;  %v1913_v34 = vmul.f32 %v2683_v49, %v3667_v12 }
 0x172   : > { %1998 = vst [vmem:[%s2946_s30 + $0x58] sm:$0xff] %v1205_v32  ;;  %v1436_v51 = vadd.f32 %v2677_v18, %v1435_v45  ;;  %vm1917_vm11 = vweird.f32 %v3667_v12  ;;  %v1218_v42 = vand.u32 2147483648, %v3670_v0  ;;  %vm3711_vm13 = vcmp.eq.f32.partialorder %v1921_v25, 8.507059e+37 }
 0x173   : > { %v1676_v43 = vadd.f32 %v2679_v21, %v1675_v38  ;;  %v1924_v47 = vor.u32 1.1754944e-38, %v1923_v35  ;;  %2686 = vrcp.f32 %v3702_v50  ;;  %v1914_v54 = vsub.f32 1.0, %v1913_v34 }
 0x174   : > { %v2685_v56 = vpop.eup %2684  ;;  %v1440_v57 = vsel %vm1439_vm12, %v2677_v18, %v1436_v51  ;;  %vm1212_vm15 = vweird.f32 %v3670_v0  ;;  %2688 = vpow2.f32 %v2390_v19  ;;  %vm1918_vm0 = vweird.f32 %v2683_v49 }
 0x175   : > { %v1445_v61 = vsel %vm3677_vm5, %v1444_v20, %v1440_v57  ;;  %v1680_v33 = vsel %vm1679_vm14, %v2679_v21, %v1676_v43  ;;  %v1208_v37 = vmul.f32 %v2685_v56, %v3670_v0  ;;  %vm3723_vm1 = vcmp.eq.f32.partialorder %v1216_v46, 8.507059e+37  ;;  %vm1919_vm3 = vmor %vm1917_vm11, %vm1918_vm0  ;;  %v686_v0 = vpop.f32.mrf.mxu1  ;;  %v766_v55 = vpop.f32.mrf.mxu3 }
 0x176   : > { %2014 = vst [vmem:[%s2946_s30 + $0xd8] sm:$0xff] %v1445_v61  ;;  %v1685_v30 = vsel %vm3682_vm6, %v1684_v26, %v1680_v33  ;;  %v1915_v62 = vmul.f32 %v2683_v49, %v1914_v54  ;;  %vm1213_vm2 = vweird.f32 %v2685_v56  ;;  %v1219_v63 = vor.u32 1.1754944e-38, %v1218_v42 }
 0x177   : > { %2030 = vst [vmem:[%s2946_s30 + $0x158] sm:$0xff] %v1685_v30  ;;  %v1209_v1 = vsub.f32 1.0, %v1208_v37  ;;  %v2406_v44 = vmul.f32 -1.442695, %v762_v15  ;;  %v644_v58 = vadd.f32 %v3732_v2, %v3674_v16  ;;  %v684_v4 = vadd.f32 %v3732_v2, %v683_v52  ;;  %vm1214_vm5 = vmor %vm1212_vm15, %vm1213_vm2 }
 0x178   : > { %v1916_v5 = vadd.f32 %v2683_v49, %v1915_v62  ;;  %v724_v53 = vadd.f32 %v3732_v2, %v723_v59  ;;  %v764_v8 = vadd.f32 %v3732_v2, %v763_v60  ;;  %v647_v6 = vadd.f32 %v3732_v2, %v646_v41 }
 0x179   : > { %v2687_v7 = vpop.eup %2686  ;;  %v1210_v3 = vmul.f32 %v2685_v56, %v1209_v1  ;;  %2690 = vpow2.f32 %v2406_v44  ;;  %v2359_v13 = vmul.f32 -1.442695, %v644_v58  ;;  %v2375_v17 = vmul.f32 -1.442695, %v684_v4 }
 0x17a   : > { %v2689_v18 = vpop.eup %2688  ;;  %v1920_v11 = vsel %vm1919_vm3, %v2683_v49, %v1916_v5  ;;  %v1448_v16 = vmul.f32 %v2687_v7, %v3702_v50  ;;  %vm1452_vm4 = vweird.f32 %v3702_v50  ;;  %v2391_v21 = vmul.f32 -1.442695, %v724_v53 }
 0x17b   : > { %v1925_v10 = vsel %vm3711_vm13, %v1924_v47, %v1920_v11  ;;  %v1211_v36 = vadd.f32 %v2685_v56, %v1210_v3  ;;  %v3747_v9 = vadd.f32 1.0, %v2689_v18  ;;  %2692 = vpow2.f32 %v2359_v13  ;;  %v648_v47 = vpop.f32.mrf.mxu0 }
 0x17c   : > { %2046 = vst [vmem:[%s2946_s30 + $0x1d8] sm:$0xff] %v1925_v10  ;;  %v1449_v12 = vsub.f32 1.0, %v1448_v16  ;;  %v1456_v20 = vand.u32 2147483647, %v3702_v50  ;;  %2694 = vpow2.f32 %v2375_v17  ;;  %v2407_v26 = vmul.f32 -1.442695, %v764_v8 }
 0x17d   : > { %v1215_v14 = vsel %vm1214_vm5, %v2685_v56, %v1211_v36  ;;  %v1458_v27 = vand.u32 2147483648, %v3702_v50  ;;  %2696 = vrcp.f32 %v3747_v9  ;;  %v2360_v28 = vmul.f32 -1.442695, %v647_v6 }
 0x17e   : > { %v1220_v19 = vsel %vm3723_vm1, %v1219_v63, %v1215_v14  ;;  %v1450_v15 = vmul.f32 %v2687_v7, %v1449_v12  ;;  %vm1453_vm6 = vweird.f32 %v2687_v7  ;;  %2698 = vpow2.f32 %v2391_v21 }
 0x17f   : > { %v2691_v24 = vpop.eup %2690  ;;  %1999 = vst [vmem:[%s2946_s30 + $0x60] sm:$0xff] %v1220_v19  ;;  %2700 = vpow2.f32 %v2407_v26  ;;  %v1696_v29 = vand.u32 2147483647, %v3747_v9  ;;  %vm1454_vm7 = vmor %vm1452_vm4, %vm1453_vm6  ;;  %vm1457_vm8 = vcmp.eq.f32.partialorder %v1456_v20, 8.507059e+37  ;;  %v1459_v39 = vor.u32 1.1754944e-38, %v1458_v27 }
 0x180   : > { %v1451_v25 = vadd.f32 %v2687_v7, %v1450_v15  ;;  %v3760_v40 = vadd.f32 1.0, %v2691_v24  ;;  %2702 = vpow2.f32 %v2360_v28  ;;  %v687_v22 = vadd.f32 %v3732_v2, %v686_v0 }
 0x181   : > { %v2693_v35 = vpop.eup %2692  ;;  %v1698_v49 = vand.u32 2147483648, %v3747_v9  ;;  %v727_v32 = vadd.f32 %v3732_v2, %v726_v31  ;;  %vm1692_vm9 = vweird.f32 %v3747_v9  ;;  %vm3775_vm10 = vcmp.eq.f32.partialorder %v1696_v29, 8.507059e+37 }
 0x182   : > { %v2695_v23 = vpop.eup %2694  ;;  %v1455_v45 = vsel %vm1454_vm7, %v2687_v7, %v1451_v25  ;;  %2704 = vrcp.f32 %v3760_v40  ;;  %v3768_v51 = vadd.f32 1.0, %v2693_v35  ;;  %v1936_v57 = vand.u32 2147483647, %v3760_v40 }
 0x183   : > { %v2697_v38 = vpop.eup %2696  ;;  %v1460_v46 = vsel %vm1457_vm8, %v1459_v39, %v1455_v45  ;;  %v3770_v50 = vadd.f32 1.0, %v2695_v23  ;;  %v1938_v54 = vand.u32 2147483648, %v3760_v40  ;;  %v2376_v52 = vmul.f32 -1.442695, %v687_v22 }
 0x184   : > { %v2699_v34 = vpop.eup %2698  ;;  %2015 = vst [vmem:[%s2946_s30 + $0xe0] sm:$0xff] %v1460_v46  ;;  %v1688_v42 = vmul.f32 %v2697_v38, %v3747_v9  ;;  %2706 = vrcp.f32 %v3768_v51  ;;  %v1699_v61 = vor.u32 1.1754944e-38, %v1698_v49  ;;  %v3783_v33 = vmul.f32 -1.442695, %v727_v32 }
 0x185   : > { %v2701_v56 = vpop.eup %2700  ;;  %2708 = vrcp.f32 %v3770_v50  ;;  %vm1932_vm11 = vweird.f32 %v3760_v40  ;;  %v3786_v48 = vadd.f32 1.0, %v2699_v34  ;;  %v3789_v60 = vadd.f32 %v3732_v2, %v766_v55 }
 0x186   : > { %v1689_v59 = vsub.f32 1.0, %v1688_v42  ;;  %v2703_v37 = vpop.eup %2702  ;;  %v3792_v41 = vadd.f32 %v3732_v2, %v648_v47  ;;  %vm1693_vm12 = vweird.f32 %v2697_v38  ;;  %v1231_v63 = vand.u32 2147483647, %v3768_v51 }
 0x187   : > { %v3795_v1 = vadd.f32 1.0, %v2701_v56  ;;  %vm3798_vm13 = vcmp.eq.f32.partialorder %v1936_v57, 8.507059e+37  ;;  %v1939_v4 = vor.u32 1.1754944e-38, %v1938_v54  ;;  %v1233_v5 = vand.u32 2147483648, %v3768_v51  ;;  %vm1694_vm15 = vmor %vm1692_vm9, %vm1693_vm12 }
 0x188   : > { %v2705_v30 = vpop.eup %2704  ;;  %v1690_v62 = vmul.f32 %v2697_v38, %v1689_v59  ;;  %2710 = vpow2.f32 %v2376_v52  ;;  %vm1227_vm14 = vweird.f32 %v3768_v51  ;;  %v1471_v8 = vand.u32 2147483647, %v3770_v50  ;;  %v688_v52 = vpop.f32.mrf.mxu1 }
 0x189   : > { %v1928_v44 = vmul.f32 %v2705_v30, %v3760_v40  ;;  %v1473_v6 = vand.u32 2147483648, %v3770_v50  ;;  %2712 = vrcp.f32 %v3786_v48  ;;  %vm1467_vm0 = vweird.f32 %v3770_v50 }
 0x18a   : > { %v1691_v53 = vadd.f32 %v2697_v38, %v1690_v62  ;;  %v2707_v7 = vpop.eup %2706  ;;  %2714 = vrcp.f32 %v3795_v1  ;;  %v3811_v13 = vadd.f32 1.0, %v2703_v37  ;;  %vm1933_vm1 = vweird.f32 %v2705_v30 }
 0x18b   : > { %v1929_v3 = vsub.f32 1.0, %v1928_v44  ;;  %v2709_v17 = vpop.eup %2708  ;;  %v1223_v11 = vmul.f32 %v2707_v7, %v3768_v51  ;;  %vm3814_vm2 = vcmp.eq.f32.partialorder %v1231_v63, 8.507059e+37  ;;  %v1711_v21 = vand.u32 2147483647, %v3786_v48  ;;  %vm1934_vm5 = vmor %vm1932_vm11, %vm1933_vm1 }
 0x18c   : > { %v1695_v18 = vsel %vm1694_vm15, %v2697_v38, %v1691_v53  ;;  %v1463_v9 = vmul.f32 %v2709_v17, %v3770_v50  ;;  %v1713_v12 = vand.u32 2147483648, %v3786_v48  ;;  %v1234_v26 = vor.u32 1.1754944e-38, %v1233_v5  ;;  %v768_v53 = vpop.f32.mrf.mxu3 }
 0x18d   : > { %v1700_v10 = vsel %vm3775_vm10, %v1699_v61, %v1695_v18  ;;  %v1930_v36 = vmul.f32 %v2705_v30, %v1929_v3  ;;  %v1224_v20 = vsub.f32 1.0, %v1223_v11  ;;  %vm3824_vm3 = vcmp.eq.f32.partialorder %v1471_v8, 8.507059e+37 }
 0x18e   : > { %2031 = vst [vmem:[%s2946_s30 + $0x160] sm:$0xff] %v1700_v10  ;;  %v1474_v27 = vor.u32 1.1754944e-38, %v1473_v6  ;;  %v2711_v28 = vpop.eup %2710  ;;  %v1464_v15 = vsub.f32 1.0, %v1463_v9  ;;  %vm1707_vm4 = vweird.f32 %v3786_v48  ;;  %2716 = vrcp.f32 %v3811_v13 }
 0x18f   : > { %v1931_v19 = vadd.f32 %v2705_v30, %v1930_v36  ;;  %v2713_v0 = vpop.eup %2712  ;;  %v1225_v24 = vmul.f32 %v2707_v7, %v1224_v20  ;;  %vm1228_vm6 = vweird.f32 %v2707_v7  ;;  %vm1468_vm7 = vweird.f32 %v2709_v17 }
 0x190   : > { %vm1947_vm8 = vweird.f32 %v3795_v1  ;;  %v2715_v31 = vpop.eup %2714  ;;  %v1465_v29 = vmul.f32 %v2709_v17, %v1464_v15  ;;  %v1703_v35 = vmul.f32 %v2713_v0, %v3786_v48  ;;  %vm3835_vm9 = vcmp.eq.f32.partialorder %v1711_v21, 8.507059e+37  ;;  %vm1229_vm10 = vmor %vm1227_vm14, %vm1228_vm6  ;;  %v728_v48 = vpop.f32.mrf.mxu2 }
 0x191   : > { %v1935_v25 = vsel %vm1934_vm5, %v2705_v30, %v1931_v19  ;;  %v1714_v22 = vor.u32 1.1754944e-38, %v1713_v12  ;;  %v1226_v23 = vadd.f32 %v2707_v7, %v1225_v24  ;;  %v1943_v45 = vmul.f32 %v2715_v31, %v3795_v1  ;;  %vm1469_vm12 = vmor %vm1467_vm0, %vm1468_vm7 }
 0x192   : > { %v1940_v40 = vsel %vm3798_vm13, %v1939_v4, %v1935_v25  ;;  %v1951_v49 = vand.u32 2147483647, %v3795_v1  ;;  %v1466_v32 = vadd.f32 %v2709_v17, %v1465_v29  ;;  %v1704_v38 = vsub.f32 1.0, %v1703_v35 }
 0x193   : > { %2047 = vst [vmem:[%s2946_s30 + $0x1e0] sm:$0xff] %v1940_v40  ;;  %v1953_v46 = vand.u32 2147483648, %v3795_v1  ;;  %vm1242_vm11 = vweird.f32 %v3811_v13  ;;  %v1230_v34 = vsel %vm1229_vm10, %v2707_v7, %v1226_v23  ;;  %v1944_v42 = vsub.f32 1.0, %v1943_v45 }
 0x194   : > { %v3851_v43 = vadd.f32 1.0, %v2711_v28  ;;  %2718 = vpow2.f32 %v3783_v33  ;;  %v2717_v51 = vpop.eup %2716  ;;  %v1235_v55 = vsel %vm3814_vm2, %v1234_v26, %v1230_v34  ;;  %v1470_v47 = vsel %vm1469_vm12, %v2709_v17, %v1466_v32 }
 0x195   : > { %v1705_v56 = vmul.f32 %v2713_v0, %v1704_v38  ;;  %vm1708_vm13 = vweird.f32 %v2713_v0  ;;  %2000 = vst [vmem:[%s2946_s30 + $0x68] sm:$0xff] %v1235_v55  ;;  %v1475_v57 = vsel %vm3824_vm3, %v1474_v27, %v1470_v47  ;;  %v1945_v54 = vmul.f32 %v2715_v31, %v1944_v42 }
 0x196   : > { %vm1948_vm14 = vweird.f32 %v2715_v31  ;;  %v1238_v50 = vmul.f32 %v2717_v51, %v3811_v13  ;;  %2016 = vst [vmem:[%s2946_s30 + $0xe8] sm:$0xff] %v1475_v57  ;;  %vm3861_vm15 = vcmp.eq.f32.partialorder %v1951_v49, 8.507059e+37  ;;  %v1954_v33 = vor.u32 1.1754944e-38, %v1953_v46  ;;  %vm1709_vm0 = vmor %vm1707_vm4, %vm1708_vm13 }
 0x197   : > { %v1706_v59 = vadd.f32 %v2713_v0, %v1705_v56  ;;  %2720 = vrcp.f32 %v3851_v43  ;;  %v1946_v37 = vadd.f32 %v2715_v31, %v1945_v54  ;;  %v1246_v62 = vand.u32 2147483647, %v3811_v13  ;;  %vm1949_vm1 = vmor %vm1947_vm8, %vm1948_vm14 }
 0x198   : > { %v1239_v30 = vsub.f32 1.0, %v1238_v50  ;;  %v2408_v63 = vmul.f32 -1.442695, %v3789_v60  ;;  %v1248_v58 = vand.u32 2147483648, %v3811_v13  ;;  %v2361_v4 = vmul.f32 -1.442695, %v3792_v41 }
 0x199   : > { %v1710_v44 = vsel %vm1709_vm0, %v2713_v0, %v1706_v59  ;;  %v689_v5 = vadd.f32 %v3732_v2, %v688_v52  ;;  %v1950_v7 = vsel %vm1949_vm1, %v2715_v31, %v1946_v37  ;;  %vm1243_vm2 = vweird.f32 %v2717_v51 }
 0x19a   : > { %v2719_v8 = vpop.eup %2718  ;;  %v1715_v6 = vsel %vm3835_vm9, %v1714_v22, %v1710_v44  ;;  %v1240_v3 = vmul.f32 %v2717_v51, %v1239_v30  ;;  %v1955_v60 = vsel %vm3861_vm15, %v1954_v33, %v1950_v7  ;;  %2722 = vpow2.f32 %v2408_v63  ;;  %vm1244_vm3 = vmor %vm1242_vm11, %vm1243_vm2 }
 0x19b   : > { %2032 = vst [vmem:[%s2946_s30 + $0x168] sm:$0xff] %v1715_v6  ;;  %v3880_v1 = vadd.f32 1.0, %v2719_v8  ;;  %v2377_v17 = vmul.f32 -1.442695, %v689_v5  ;;  %2724 = vpow2.f32 %v2361_v4  ;;  %v729_v18 = vadd.f32 %v3732_v2, %v728_v48 }
 0x19c   : > { %2048 = vst [vmem:[%s2946_s30 + $0x1e8] sm:$0xff] %v1955_v60  ;;  %v1241_v41 = vadd.f32 %v2717_v51, %v1240_v3  ;;  %v769_v11 = vadd.f32 %v3732_v2, %v768_v53  ;;  %v1249_v21 = vor.u32 1.1754944e-38, %v1248_v58  ;;  %vm1247_vm4 = vcmp.eq.f32.partialorder %v1246_v62, 8.507059e+37 }
 0x19d   : > { %v2721_v16 = vpop.eup %2720  ;;  %2726 = vrcp.f32 %v3880_v1  ;;  %v2393_v12 = vmul.f32 -1.442695, %v729_v18  ;;  %vm1482_vm5 = vweird.f32 %v3851_v43  ;;  %v1486_v2 = vand.u32 2147483647, %v3851_v43 }
 0x19e   : > { %v1245_v10 = vsel %vm1244_vm3, %v2717_v51, %v1241_v41  ;;  %v1478_v36 = vmul.f32 %v2721_v16, %v3851_v43  ;;  %2728 = vpow2.f32 %v2377_v17  ;;  %v2409_v26 = vmul.f32 -1.442695, %v769_v11 }
 0x19f   : > { %v1250_v9 = vsel %vm1247_vm4, %v1249_v21, %v1245_v10  ;;  %v1488_v13 = vand.u32 2147483648, %v3851_v43  ;;  %2730 = vpow2.f32 %v2393_v12  ;;  %vm1483_vm6 = vweird.f32 %v2721_v16 }
 0x1a0   : > { %2001 = vst [vmem:[%s2946_s30 + $0x70] sm:$0xff] %v1250_v9  ;;  %v1479_v20 = vsub.f32 1.0, %v1478_v36  ;;  %v2723_v14 = vpop.eup %2722  ;;  %2732 = vpow2.f32 %v2409_v26  ;;  %vm1484_vm7 = vmor %vm1482_vm5, %vm1483_vm6  ;;  %vm1487_vm8 = vcmp.eq.f32.partialorder %v1486_v2, 8.507059e+37  ;;  %v1726_v23 = vand.u32 2147483647, %v3880_v1 }
 0x1a1   : > { %v2725_v27 = vpop.eup %2724  ;;  %v1025_v19 = vadd.f32 1.0, %v2723_v14  ;;  %v1489_v29 = vor.u32 1.1754944e-38, %v1488_v13  ;;  %v1728_v45 = vand.u32 2147483648, %v3880_v1  ;;  %vm1722_vm10 = vweird.f32 %v3880_v1 }
 0x1a2   : > { %v1480_v28 = vmul.f32 %v2721_v16, %v1479_v20  ;;  %v978_v0 = vadd.f32 1.0, %v2725_v27  ;;  %vm1727_vm12 = vcmp.eq.f32.partialorder %v1726_v23, 8.507059e+37 }
 0x1a3   : > { %v2727_v15 = vpop.eup %2726  ;;  %2734 = vrcp.f32 %v1025_v19  ;;  %v1729_v55 = vor.u32 1.1754944e-38, %v1728_v45  ;;  %v1966_v52 = vand.u32 2147483647, %v1025_v19  ;;  %v1968_v59 = vand.u32 2147483648, %v1025_v19 }
 0x1a4   : > { %v1481_v24 = vadd.f32 %v2721_v16, %v1480_v28  ;;  %v1718_v31 = vmul.f32 %v2727_v15, %v3880_v1  ;;  %v2729_v25 = vpop.eup %2728  ;;  %2736 = vrcp.f32 %v978_v0  ;;  %vm1723_vm9 = vweird.f32 %v2727_v15 }
 0x1a5   : > { %v2731_v22 = vpop.eup %2730  ;;  %v3899_v38 = vadd.f32 1.0, %v2729_v25  ;;  %vm1724_vm11 = vmor %vm1722_vm10, %vm1723_vm9  ;;  %v1261_v33 = vand.u32 2147483647, %v978_v0  ;;  %v1263_v37 = vand.u32 2147483648, %v978_v0  ;;  %vm1962_vm14 = vweird.f32 %v1025_v19 }
 0x1a6   : > { %v1485_v35 = vsel %vm1484_vm7, %v2721_v16, %v1481_v24  ;;  %v1719_v39 = vsub.f32 1.0, %v1718_v31  ;;  %v2733_v49 = vpop.eup %2732  ;;  %v3901_v46 = vadd.f32 1.0, %v2731_v22  ;;  %vm1257_vm15 = vweird.f32 %v978_v0 }
 0x1a7   : > { %v1490_v40 = vsel %vm1487_vm8, %v1489_v29, %v1485_v35  ;;  %2738 = vrcp.f32 %v3899_v38  ;;  %v3905_v43 = vadd.f32 1.0, %v2733_v49  ;;  %vm1967_vm1 = vcmp.eq.f32.partialorder %v1966_v52, 8.507059e+37 }
 0x1a8   : > { %2017 = vst [vmem:[%s2946_s30 + $0xf0] sm:$0xff] %v1490_v40  ;;  %v1720_v32 = vmul.f32 %v2727_v15, %v1719_v39  ;;  %2740 = vrcp.f32 %v3901_v46  ;;  %v1969_v4 = vor.u32 1.1754944e-38, %v1968_v59  ;;  %vm1262_vm3 = vcmp.eq.f32.partialorder %v1261_v33, 8.507059e+37 }
 0x1a9   : > { %v2735_v34 = vpop.eup %2734  ;;  %2742 = vrcp.f32 %v3905_v43  ;;  %v1264_v53 = vor.u32 1.1754944e-38, %v1263_v37  ;;  %v1501_v3 = vand.u32 2147483647, %v3899_v38  ;;  %v1503_v60 = vand.u32 2147483648, %v3899_v38 }
 0x1aa   : > { %v1721_v42 = vadd.f32 %v2727_v15, %v1720_v32  ;;  %v2737_v51 = vpop.eup %2736  ;;  %v1958_v47 = vmul.f32 %v2735_v34, %v1025_v19  ;;  %vm1963_vm13 = vweird.f32 %v2735_v34  ;;  %v1743_v11 = vand.u32 2147483648, %v3901_v46 }
 0x1ab   : > { %v1253_v57 = vmul.f32 %v2737_v51, %v978_v0  ;;  %vm1258_vm0 = vweird.f32 %v2737_v51  ;;  %vm1964_vm2 = vmor %vm1962_vm14, %vm1963_vm13  ;;  %vm1497_vm6 = vweird.f32 %v3899_v38  ;;  %v1741_v9 = vand.u32 2147483647, %v3901_v46 }
 0x1ac   : > { %v1725_v56 = vsel %vm1724_vm11, %v2727_v15, %v1721_v42  ;;  %v1959_v50 = vsub.f32 1.0, %v1958_v47  ;;  %vm1259_vm4 = vmor %vm1257_vm15, %vm1258_vm0  ;;  %vm1502_vm8 = vcmp.eq.f32.partialorder %v1501_v3, 8.507059e+37  ;;  %v1504_v20 = vor.u32 1.1754944e-38, %v1503_v60 }
 0x1ad   : > { %v1730_v54 = vsel %vm1727_vm12, %v1729_v55, %v1725_v56  ;;  %v1254_v61 = vsub.f32 1.0, %v1253_v57  ;;  %v2739_v62 = vpop.eup %2738  ;;  %vm1737_vm10 = vweird.f32 %v3901_v46  ;;  %v1981_v2 = vand.u32 2147483647, %v3905_v43 }
 0x1ae   : > { %2033 = vst [vmem:[%s2946_s30 + $0x170] sm:$0xff] %v1730_v54  ;;  %v1960_v30 = vmul.f32 %v2735_v34, %v1959_v50  ;;  %v2741_v44 = vpop.eup %2740  ;;  %v1493_v5 = vmul.f32 %v2739_v62, %v3899_v38  ;;  %vm1498_vm5 = vweird.f32 %v2739_v62  ;;  %v1983_v13 = vand.u32 2147483648, %v3905_v43 }
 0x1af   : > { %v1255_v63 = vmul.f32 %v2737_v51, %v1254_v61  ;;  %v1733_v8 = vmul.f32 %v2741_v44, %v3901_v46  ;;  %v2743_v1 = vpop.eup %2742  ;;  %vm1738_vm7 = vweird.f32 %v2741_v44  ;;  %vm1499_vm9 = vmor %vm1497_vm6, %vm1498_vm5  ;;  %v1744_v28 = vor.u32 1.1754944e-38, %v1743_v11 }
 0x1b0   : > { %v1961_v58 = vadd.f32 %v2735_v34, %v1960_v30  ;;  %v1494_v7 = vsub.f32 1.0, %v1493_v5  ;;  %v1973_v10 = vmul.f32 %v2743_v1, %v3905_v43  ;;  %vm1739_vm11 = vmor %vm1737_vm10, %vm1738_vm7  ;;  %vm1978_vm12 = vweird.f32 %v2743_v1 }
 0x1b1   : > { %v1256_v48 = vadd.f32 %v2737_v51, %v1255_v63  ;;  %v1734_v18 = vsub.f32 1.0, %v1733_v8  ;;  %vm1742_vm13 = vcmp.eq.f32.partialorder %v1741_v9, 8.507059e+37  ;;  %vm1977_vm14 = vweird.f32 %v3905_v43 }
 0x1b2   : > { %v1965_v6 = vsel %vm1964_vm2, %v2735_v34, %v1961_v58  ;;  %v1495_v21 = vmul.f32 %v2739_v62, %v1494_v7  ;;  %v1974_v26 = vsub.f32 1.0, %v1973_v10  ;;  %vm1979_vm15 = vmor %vm1977_vm14, %vm1978_vm12  ;;  %v1984_v25 = vor.u32 1.1754944e-38, %v1983_v13 }
 0x1b3   : > { %v1970_v17 = vsel %vm1967_vm1, %v1969_v4, %v1965_v6  ;;  %v1260_v41 = vsel %vm1259_vm4, %v2737_v51, %v1256_v48  ;;  %v1735_v36 = vmul.f32 %v2741_v44, %v1734_v18  ;;  %vm1982_vm0 = vcmp.eq.f32.partialorder %v1981_v2, 8.507059e+37 }
 0x1b4   : > { %2049 = vst [vmem:[%s2946_s30 + $0x1f0] sm:$0xff] %v1970_v17  ;;  %v1265_v16 = vsel %vm1262_vm3, %v1264_v53, %v1260_v41  ;;  %v1496_v12 = vadd.f32 %v2739_v62, %v1495_v21  ;;  %v1975_v19 = vmul.f32 %v2743_v1, %v1974_v26 }
 0x1b5   : > { %2002 = vst [vmem:[%s2946_s30 + $0x78] sm:$0xff] %v1265_v16  ;;  %v1736_v14 = vadd.f32 %v2741_v44, %v1735_v36 }
 0x1b6   : > { %v1500_v27 = vsel %vm1499_vm9, %v2739_v62, %v1496_v12  ;;  %v1976_v31 = vadd.f32 %v2743_v1, %v1975_v19 }
 0x1b7   : > { %v1505_v15 = vsel %vm1502_vm8, %v1504_v20, %v1500_v27  ;;  %v1740_v0 = vsel %vm1739_vm11, %v2741_v44, %v1736_v14 }
 0x1b8   : > { %2018 = vst [vmem:[%s2946_s30 + $0xf8] sm:$0xff] %v1505_v15  ;;  %v1745_v24 = vsel %vm1742_vm13, %v1744_v28, %v1740_v0  ;;  %v1980_v29 = vsel %vm1979_vm15, %v2743_v1, %v1976_v31 }
 0x1b9   : > { %2034 = vst [vmem:[%s2946_s30 + $0x178] sm:$0xff] %v1745_v24  ;;  %v1985_v35 = vsel %vm1982_vm0, %v1984_v25, %v1980_v29 }
 0x1ba   : > { %2050 = vst [vmem:[%s2946_s30 + $0x1f8] sm:$0xff] %v1985_v35 }
 0x1bb PF: > { %s13_s14 = sadd.s32 1, %s2768_s14   ;;  %s4032_s12 = smov %s2764_s13 }
 0x1bc   : > { %p10_p5 = scmp.ge.s32.totalorder %s13_s14, 6   ;;  %s4033_s13 = smov %s4035_s15 }
 0x1be   :  { %12 = sbr.rel (!%p10_p5) target bundleno = 2 (0x2), region = 68 }

// kernel: forward.14
= control target key start
LH: loop header
LB: loop body
LE: loop exit
PB: predicated region body
PF: predicated region fallthrough
CT: control target
= control target key end

     0   :  { %s1326_s1 = inlined_call_operand.vmem [shape: bf16[1,1024,128], index: 1, kind: input, shape index: {}]   ;;  %s1327_s2 = inlined_call_operand.vmem [shape: f32[1,1,128], index: 2, kind: input, shape index: {}]   ;;  %s1328_s0 = inlined_call_operand.vmem [shape: bf16[1,16,1024], index: 0, kind: input, shape index: {}]   ;;  %s1329_s3 = inlined_call_operand.vmem [shape: f32[1,16,128], index: 3, kind: output, shape index: {}]  }
   0x1   :  { %v999_v0 = vld [vmem:[%s1326_s1 + $0x38] sm:$0xff]  ;;  %v998_v4 = vld [vmem:[%s1326_s1 + $0x30] sm:$0xff]  ;;  %v997_v8 = vld [vmem:[%s1326_s1 + $0x28] sm:$0xff] }
   0x2   :  { %v1007_v1 = vld [vmem:[%s1326_s1 + $0x78] sm:$0xff]  ;;  %578 = vmatpush.bf16.msra.mxu0 %v999_v0  ;;  %v1006_v5 = vld [vmem:[%s1326_s1 + $0x70] sm:$0xff]  ;;  %v1005_v9 = vld [vmem:[%s1326_s1 + $0x68] sm:$0xff] }
   0x3   :  { %v1015_v2 = vld [vmem:[%s1326_s1 + $0xb8] sm:$0xff]  ;;  %592 = vmatpush.bf16.msra.mxu1 %v1007_v1  ;;  %v1014_v6 = vld [vmem:[%s1326_s1 + $0xb0] sm:$0xff]  ;;  %v1013_v10 = vld [vmem:[%s1326_s1 + $0xa8] sm:$0xff] }
   0x4   :  { %v1023_v3 = vld [vmem:[%s1326_s1 + $0xf8] sm:$0xff]  ;;  %606 = vmatpush.bf16.msra.mxu2 %v1015_v2  ;;  %v1022_v7 = vld [vmem:[%s1326_s1 + $0xf0] sm:$0xff]  ;;  %v1021_v11 = vld [vmem:[%s1326_s1 + $0xe8] sm:$0xff] }
   0x5   :  { %620 = vmatpush.bf16.msra.mxu3 %v1023_v3  ;;  %v996_v12 = vld [vmem:[%s1326_s1 + $0x20] sm:$0xff]  ;;  %v995_v16 = vld [vmem:[%s1326_s1 + $0x18] sm:$0xff]  ;;  %v994_v20 = vld [vmem:[%s1326_s1 + $0x10] sm:$0xff] }
   0x6   :  { %579 = vmatpush.bf16.msra.mxu0 %v998_v4  ;;  %v1004_v13 = vld [vmem:[%s1326_s1 + $0x60] sm:$0xff]  ;;  %v1003_v17 = vld [vmem:[%s1326_s1 + $0x58] sm:$0xff]  ;;  %v1002_v21 = vld [vmem:[%s1326_s1 + $0x50] sm:$0xff] }
   0x7   :  { %593 = vmatpush.bf16.msra.mxu1 %v1006_v5  ;;  %v1012_v14 = vld [vmem:[%s1326_s1 + $0xa0] sm:$0xff]  ;;  %v1011_v18 = vld [vmem:[%s1326_s1 + $0x98] sm:$0xff]  ;;  %v1010_v22 = vld [vmem:[%s1326_s1 + $0x90] sm:$0xff] }
   0x8   :  { %607 = vmatpush.bf16.msra.mxu2 %v1014_v6  ;;  %v1020_v15 = vld [vmem:[%s1326_s1 + $0xe0] sm:$0xff]  ;;  %v1019_v19 = vld [vmem:[%s1326_s1 + $0xd8] sm:$0xff]  ;;  %v1018_v23 = vld [vmem:[%s1326_s1 + $0xd0] sm:$0xff] }
   0x9   :  { %621 = vmatpush.bf16.msra.mxu3 %v1022_v7  ;;  %v993_v24 = vld [vmem:[%s1326_s1 + $0x8] sm:$0xff]  ;;  %v992_v28 = vld [vmem:[%s1326_s1] sm:$0xff]  ;;  %v1031_v32 = vld [vmem:[%s1326_s1 + $0x138] sm:$0xff] }
   0xa   :  { %580 = vmatpush.bf16.msra.mxu0 %v997_v8  ;;  %v1001_v25 = vld [vmem:[%s1326_s1 + $0x48] sm:$0xff]  ;;  %v1000_v29 = vld [vmem:[%s1326_s1 + $0x40] sm:$0xff]  ;;  %v1039_v33 = vld [vmem:[%s1326_s1 + $0x178] sm:$0xff] }
   0xb   :  { %594 = vmatpush.bf16.msra.mxu1 %v1005_v9  ;;  %v1009_v26 = vld [vmem:[%s1326_s1 + $0x88] sm:$0xff]  ;;  %v1008_v30 = vld [vmem:[%s1326_s1 + $0x80] sm:$0xff]  ;;  %v1047_v42 = vld [vmem:[%s1326_s1 + $0x1b8] sm:$0xff] }
   0xc   :  { %608 = vmatpush.bf16.msra.mxu2 %v1013_v10  ;;  %v1017_v27 = vld [vmem:[%s1326_s1 + $0xc8] sm:$0xff]  ;;  %v1016_v31 = vld [vmem:[%s1326_s1 + $0xc0] sm:$0xff]  ;;  %v1055_v43 = vld [vmem:[%s1326_s1 + $0x1f8] sm:$0xff] }
   0xd   :  { %622 = vmatpush.bf16.msra.mxu3 %v1021_v11  ;;  %v706_v34 = vld [vmem:[%s1328_s0 + $0x8] sm:$0xf]  ;;  %v698_v36 = vld [vmem:[%s1328_s0] sm:$0xf]  ;;  %v985_v38 = vld [vmem:[%s1328_s0 + $0xc] sm:$0xf] }
   0xe   :  { %581 = vmatpush.bf16.msra.mxu0 %v996_v12  ;;  %v989_v35 = vld [vmem:[%s1328_s0 + $0x24] sm:$0xf0]  ;;  %v988_v37 = vld [vmem:[%s1328_s0 + $0x1c] sm:$0xf0]  ;;  %v708_v39 = vld [vmem:[%s1328_s0 + $0x28] sm:$0xf0] }
   0xf   :  { %595 = vmatpush.bf16.msra.mxu1 %v1004_v13  ;;  %v984_v40 = vld [vmem:[%s1328_s0 + $0x4] sm:$0xf]  ;;  %v707_v44 = vor.u32 %v989_v35, %v706_v34  ;;  %v699_v45 = vor.u32 %v988_v37, %v698_v36  ;;  %v711_v46 = vor.u32 %v985_v38, %v708_v39  ;;  %v1030_v48 = vld [vmem:[%s1326_s1 + $0x130] sm:$0xff]  ;;  %v1029_v52 = vld [vmem:[%s1326_s1 + $0x128] sm:$0xff] }
  0x10   :  { %609 = vmatpush.bf16.msra.mxu2 %v1012_v14  ;;  %v700_v41 = vld [vmem:[%s1328_s0 + $0x20] sm:$0xf0]  ;;  %v1038_v49 = vld [vmem:[%s1326_s1 + $0x170] sm:$0xff]  ;;  %v1037_v53 = vld [vmem:[%s1326_s1 + $0x168] sm:$0xff] }
  0x11   :  { %623 = vmatpush.bf16.msra.mxu3 %v1020_v15  ;;  %v703_v47 = vor.u32 %v984_v40, %v700_v41  ;;  %v1046_v50 = vld [vmem:[%s1326_s1 + $0x1b0] sm:$0xff]  ;;  %v1045_v54 = vld [vmem:[%s1326_s1 + $0x1a8] sm:$0xff]  ;;  %v1028_v56 = vld [vmem:[%s1326_s1 + $0x120] sm:$0xff] }
  0x12   :  { %582 = vmatpush.bf16.msra.mxu0 %v995_v16  ;;  %v1054_v51 = vld [vmem:[%s1326_s1 + $0x1f0] sm:$0xff]  ;;  %v1053_v55 = vld [vmem:[%s1326_s1 + $0x1e8] sm:$0xff]  ;;  %v1036_v57 = vld [vmem:[%s1326_s1 + $0x160] sm:$0xff] }
  0x13   :  { %596 = vmatpush.bf16.msra.mxu1 %v1003_v17  ;;  %v1044_v58 = vld [vmem:[%s1326_s1 + $0x1a0] sm:$0xff]  ;;  %v1027_v60 = vld [vmem:[%s1326_s1 + $0x118] sm:$0xff]  ;;  %v1026_v0 = vld [vmem:[%s1326_s1 + $0x110] sm:$0xff] }
  0x14   :  { %610 = vmatpush.bf16.msra.mxu2 %v1011_v18  ;;  %v1052_v59 = vld [vmem:[%s1326_s1 + $0x1e0] sm:$0xff]  ;;  %v1035_v61 = vld [vmem:[%s1326_s1 + $0x158] sm:$0xff]  ;;  %v1034_v1 = vld [vmem:[%s1326_s1 + $0x150] sm:$0xff] }
  0x15   :  { %624 = vmatpush.bf16.msra.mxu3 %v1019_v19  ;;  %v1043_v62 = vld [vmem:[%s1326_s1 + $0x198] sm:$0xff]  ;;  %v1042_v2 = vld [vmem:[%s1326_s1 + $0x190] sm:$0xff]  ;;  %v1025_v4 = vld [vmem:[%s1326_s1 + $0x108] sm:$0xff] }
  0x16   :  { %583 = vmatpush.bf16.msra.mxu0 %v994_v20  ;;  %v1051_v63 = vld [vmem:[%s1326_s1 + $0x1d8] sm:$0xff]  ;;  %v1050_v3 = vld [vmem:[%s1326_s1 + $0x1d0] sm:$0xff]  ;;  %v1033_v5 = vld [vmem:[%s1326_s1 + $0x148] sm:$0xff] }
  0x17   :  { %597 = vmatpush.bf16.msra.mxu1 %v1002_v21  ;;  %v1041_v6 = vld [vmem:[%s1326_s1 + $0x188] sm:$0xff]  ;;  %v1024_v8 = vld [vmem:[%s1326_s1 + $0x100] sm:$0xff]  ;;  %v714_v12 = vld [vmem:[%s1328_s0 + $0x10] sm:$0xf] }
  0x18   :  { %611 = vmatpush.bf16.msra.mxu2 %v1010_v22  ;;  %v1049_v7 = vld [vmem:[%s1326_s1 + $0x1c8] sm:$0xff]  ;;  %v1032_v9 = vld [vmem:[%s1326_s1 + $0x140] sm:$0xff]  ;;  %v990_v13 = vld [vmem:[%s1328_s0 + $0x2c] sm:$0xf0] }
  0x19   :  { %625 = vmatpush.bf16.msra.mxu3 %v1018_v23  ;;  %v1040_v10 = vld [vmem:[%s1326_s1 + $0x180] sm:$0xff]  ;;  %v986_v14 = vld [vmem:[%s1328_s0 + $0x14] sm:$0xf]  ;;  %v722_v16 = vld [vmem:[%s1328_s0 + $0x18] sm:$0xf]  ;;  %v715_v20 = vor.u32 %v990_v13, %v714_v12 }
  0x1a   :  { %584 = vmatpush.bf16.msra.mxu0 %v993_v24  ;;  %v1048_v11 = vld [vmem:[%s1326_s1 + $0x1c0] sm:$0xff]  ;;  %v716_v15 = vld [vmem:[%s1328_s0 + $0x30] sm:$0xf0]  ;;  %v991_v17 = vld [vmem:[%s1328_s0 + $0x34] sm:$0xf0] }
  0x1b   :  { %598 = vmatpush.bf16.msra.mxu1 %v1001_v25  ;;  %v987_v18 = vld [vmem:[%s1328_s0 + $0x1c] sm:$0xf]  ;;  %v719_v21 = vor.u32 %v986_v14, %v716_v15  ;;  %v723_v22 = vor.u32 %v991_v17, %v722_v16  ;;  %v1056_v25 = vld [vmem:[%s1327_s2] ss:$0 sm:$0xff] }
  0x1c   :  { %612 = vmatpush.bf16.msra.mxu2 %v1009_v26  ;;  %v724_v19 = vld [vmem:[%s1328_s0 + $0x38] sm:$0xf0] }
  0x1d   :  { %626 = vmatpush.bf16.msra.mxu3 %v1017_v27  ;;  %v727_v23 = vor.u32 %v987_v18, %v724_v19 }
  0x1e   :  { %585 = vmatpush.bf16.msra.mxu0 %v992_v28 }
  0x1f   :  { %599 = vmatpush.bf16.msra.mxu1 %v1000_v29 }
  0x20   :  { %613 = vmatpush.bf16.msra.mxu2 %v1008_v30 }
  0x21   :  { %627 = vmatpush.bf16.msra.mxu3 %v1016_v31  ;;  %586 = vmatmul.bf16.vlgmr.msra.gmra.mxu0 %v699_v45 }
  0x22   :  { %634 = vmatpush.bf16.msrb.mxu0 %v1031_v32  ;;  %600 = vmatmul.bf16.vlgmr.msra.gmra.mxu1 %v703_v47 }
  0x23   :  { %648 = vmatpush.bf16.msrb.mxu1 %v1039_v33  ;;  %614 = vmatmul.bf16.vlgmr.msra.gmra.mxu2 %v707_v44 }
  0x24   :  { %662 = vmatpush.bf16.msrb.mxu2 %v1047_v42  ;;  %628 = vmatmul.bf16.vlgmr.msra.gmra.mxu3 %v711_v46 }
  0x25   :  { %676 = vmatpush.bf16.msrb.mxu3 %v1055_v43 }
  0x26   :  { %635 = vmatpush.bf16.msrb.mxu0 %v1030_v48 }
  0x27   :  { %649 = vmatpush.bf16.msrb.mxu1 %v1038_v49 }
  0x28   :  { %663 = vmatpush.bf16.msrb.mxu2 %v1046_v50 }
  0x29   :  { %677 = vmatpush.bf16.msrb.mxu3 %v1054_v51 }
  0x2a   :  { %636 = vmatpush.bf16.msrb.mxu0 %v1029_v52 }
  0x2b   :  { %650 = vmatpush.bf16.msrb.mxu1 %v1037_v53 }
  0x2c   :  { %664 = vmatpush.bf16.msrb.mxu2 %v1045_v54 }
  0x2d   :  { %678 = vmatpush.bf16.msrb.mxu3 %v1053_v55 }
  0x2e   :  { %637 = vmatpush.bf16.msrb.mxu0 %v1028_v56 }
  0x2f   :  { %651 = vmatpush.bf16.msrb.mxu1 %v1036_v57 }
  0x30   :  { %665 = vmatpush.bf16.msrb.mxu2 %v1044_v58 }
  0x31   :  { %679 = vmatpush.bf16.msrb.mxu3 %v1052_v59 }
  0x32   :  { %638 = vmatpush.bf16.msrb.mxu0 %v1027_v60 }
  0x33   :  { %652 = vmatpush.bf16.msrb.mxu1 %v1035_v61 }
  0x34   :  { %666 = vmatpush.bf16.msrb.mxu2 %v1043_v62 }
  0x35   :  { %680 = vmatpush.bf16.msrb.mxu3 %v1051_v63 }
  0x36   :  { %639 = vmatpush.bf16.msrb.mxu0 %v1026_v0 }
  0x37   :  { %653 = vmatpush.bf16.msrb.mxu1 %v1034_v1 }
  0x38   :  { %667 = vmatpush.bf16.msrb.mxu2 %v1042_v2 }
  0x39   :  { %681 = vmatpush.bf16.msrb.mxu3 %v1050_v3 }
  0x3a   :  { %640 = vmatpush.bf16.msrb.mxu0 %v1025_v4 }
  0x3b   :  { %654 = vmatpush.bf16.msrb.mxu1 %v1033_v5 }
  0x3c   :  { %668 = vmatpush.bf16.msrb.mxu2 %v1041_v6 }
  0x3d   :  { %682 = vmatpush.bf16.msrb.mxu3 %v1049_v7 }
  0x3e   :  { %641 = vmatpush.bf16.msrb.mxu0 %v1024_v8 }
  0x3f   :  { %655 = vmatpush.bf16.msrb.mxu1 %v1032_v9 }
  0x40   :  { %669 = vmatpush.bf16.msrb.mxu2 %v1040_v10 }
  0x41   :  { %683 = vmatpush.bf16.msrb.mxu3 %v1048_v11  ;;  %642 = vmatmul.bf16.vlgmr.msrb.gmra.mxu0 %v715_v20 }
  0x42   :  { %656 = vmatmul.bf16.vlgmr.msrb.gmra.mxu1 %v719_v21 }
  0x43   :  { %670 = vmatmul.bf16.vlgmr.msrb.gmra.mxu2 %v723_v22 }
  0x44   :  { %684 = vmatmul.bf16.vlgmr.msrb.gmra.mxu3 %v727_v23 }
  0x9e   :  { %v587_v24 = vpop.f32.mrf.mxu0 }
  0x9f   :  { %v601_v26 = vpop.f32.mrf.mxu1  ;;  %v588_v27 = vadd.f32 %v1056_v25, %v587_v24 }
  0xa1   :  { %v602_v30 = vadd.f32 %v601_v26, %v588_v27 }
  0xa6   :  { %v615_v28 = vpop.f32.mrf.mxu2  ;;  %v589_v31 = vpop.f32.mrf.mxu0 }
  0xa7   :  { %v629_v29 = vpop.f32.mrf.mxu3  ;;  %v603_v32 = vpop.f32.mrf.mxu1  ;;  %v616_v33 = vadd.f32 %v615_v28, %v602_v30  ;;  %v590_v34 = vadd.f32 %v1056_v25, %v589_v31 }
  0xa9   :  { %v630_v37 = vadd.f32 %v629_v29, %v616_v33  ;;  %v604_v38 = vadd.f32 %v603_v32, %v590_v34 }
  0xae   :  { %v617_v35 = vpop.f32.mrf.mxu2 }
  0xaf   :  { %v631_v36 = vpop.f32.mrf.mxu3  ;;  %v618_v42 = vadd.f32 %v617_v35, %v604_v38 }
  0xb1   :  { %v632_v46 = vadd.f32 %v631_v36, %v618_v42 }
  0xbe   :  { %v643_v39 = vpop.f32.mrf.mxu0 }
  0xbf   :  { %v644_v40 = vadd.f32 %v643_v39, %v630_v37  ;;  %v657_v41 = vpop.f32.mrf.mxu1 }
  0xc1   :  { %v658_v43 = vadd.f32 %v657_v41, %v644_v40 }
  0xc6   :  { %v671_v44 = vpop.f32.mrf.mxu2  ;;  %v645_v48 = vpop.f32.mrf.mxu0 }
  0xc7   :  { %v685_v45 = vpop.f32.mrf.mxu3  ;;  %v672_v47 = vadd.f32 %v671_v44, %v658_v43  ;;  %v646_v50 = vadd.f32 %v645_v48, %v632_v46  ;;  %v659_v51 = vpop.f32.mrf.mxu1 }
  0xc9   :  { %v686_v49 = vadd.f32 %v685_v45, %v672_v47  ;;  %v660_v52 = vadd.f32 %v659_v51, %v646_v50 }
  0xcb   :  { %690 = vst [vmem:[%s1329_s3] sm:$0xff] %v686_v49 }
  0xce   :  { %v673_v53 = vpop.f32.mrf.mxu2 }
  0xcf   :  { %v674_v54 = vadd.f32 %v673_v53, %v660_v52  ;;  %v687_v55 = vpop.f32.mrf.mxu3 }
  0xd1   :  { %v688_v56 = vadd.f32 %v687_v55, %v674_v54 }
  0xd3   :  { %691 = vst [vmem:[%s1329_s3 + $0x8] sm:$0xff] %v688_v56 }

</bundles_post_ra>
